<compile_context>
chip_gen: v6e
topology: v6e:2x2x1
jax: 0.10.0
libtpu: 0.0.40
codegen_flags: <defaults>
</compile_context>

<pallas_src>
import jax
import jax.numpy as jnp
from jax.experimental import pallas as pl
from jax.experimental.pallas import tpu as pltpu


# ----------------------------------------------------------------------------
# Fused forward kernel (grid over the 2*nb+1 stages)
# ----------------------------------------------------------------------------


def _make_fused_kernel(num_heads, n_blocks, frame_dim):
    Hn, nb, Cf = num_heads, n_blocks, frame_dim
    Dh = Cf // Hn
    last = 2 * nb
    f32, bf16 = jnp.float32, jnp.bfloat16

    def kernel(x_ref, tcol_ref, audio_ref, mask_t_ref, mask_a_ref,
               dk_ref, db_ref, dtp_ref,
               uk_ref, ub_ref, utp_ref,
               mk_ref, mb_ref, mtp_ref,
               wqkv_ref, wproj_ref, bproj_ref,
               wfrm_ref, bfrm_ref, waud_ref, baud_ref,
               wout_ref, bout_ref,
               o_ref, cur_ref, res_ref):
        s = pl.program_id(0)
        tcol = tcol_ref[...]                          # (N, 1) per-sample timestep

        def silu(pre):
            return pre * jax.lax.logistic(pre)        # f32 elementwise (v5e-safe)

        def mha(q_all, k_all, v_all, mask, wproj, bproj):
            """Multi-head attention.  q_all/k_all/v_all are full-width (.., Cf)
            activations from ONE projection matmul; per-head work is only the
            tiny logits / PV matmuls.  Head outputs are lane-concatenated and
            pushed through ONE K=Cf output-projection matmul."""
            outs = []
            for h in range(Hn):
                lo, hi = h * Dh, (h + 1) * Dh
                q_h = q_all[:, lo:hi]
                k_h = k_all[:, lo:hi]
                v_h = v_all[:, lo:hi]
                lg = jax.lax.dot_general(q_h, k_h, (((1,), (1,)), ((), ())),
                                         preferred_element_type=f32)
                lg = lg + mask
                lg = lg - jnp.max(lg, axis=-1, keepdims=True)
                p = jnp.exp(lg)
                p = p * pl.reciprocal(jnp.sum(p, axis=-1, keepdims=True),
                                      approx=True)
                outs.append(jnp.dot(p, v_h, preferred_element_type=f32))
            o_cat = jnp.concatenate(outs, axis=-1).astype(bf16)      # (N, Cf)
            return (jnp.dot(o_cat, wproj, preferred_element_type=f32) + bproj)

        # ---- stage 0: load input frame features into the persistent scratch --
        @pl.when(s == 0)
        def _():
            cur_ref[...] = x_ref[...].astype(f32)

        # ---- down stages: s in [0, nb) ---------------------------------------
        @pl.when(s < nb)
        def _():
            cur = cur_ref[...]
            mask_t = mask_t_ref[...]
            mask_a = mask_a_ref[...]
            audio_bf = audio_ref[...].astype(bf16)

            # synthetic down block: x + silu(1x1conv(x) + b + t*tproj)
            cb = cur.astype(bf16)
            pre = (jnp.dot(cb, dk_ref[0], preferred_element_type=f32)
                   + db_ref[0] + tcol * dtp_ref[0])
            cur = cur + silu(pre)

            # TemporalAttention (qkv bias-free; temperature folded into wq)
            cb = cur.astype(bf16)
            qkv = jnp.dot(cb, wqkv_ref[0], preferred_element_type=f32)  # (N,3Cf)
            cur = mha(qkv[:, :Cf], qkv[:, Cf:2 * Cf], qkv[:, 2 * Cf:],
                      mask_t, wproj_ref[0], bproj_ref[0])

            # AudioAttention (cross-attn; softmax scale folded into frame_proj;
            # audio K=V projection hoisted out of the head loop)
            cb = cur.astype(bf16)
            q_all = (jnp.dot(cb, wfrm_ref[0], preferred_element_type=f32)
                     + bfrm_ref[0])
            kv_all = (jnp.dot(audio_bf, waud_ref[0], preferred_element_type=f32)
                      + baud_ref[0])
            cur = mha(q_all, kv_all, kv_all, mask_a, wout_ref[0], bout_ref[0])

            res_ref[s] = cur                    # residual for matching up block
            cur_ref[...] = cur

        # ---- mid stage: s == nb ----------------------------------------------
        @pl.when(s == nb)
        def _():
            cur = cur_ref[...]
            cb = cur.astype(bf16)
            pre = (jnp.dot(cb, mk_ref[0], preferred_element_type=f32)
                   + mb_ref[0] + tcol * mtp_ref[0])
            cur_ref[...] = cur + silu(pre)

        # ---- up stages: s in (nb, 2*nb] (skip handled as one 2*Cf matmul) -----
        @pl.when(s > nb)
        def _():
            cur = cur_ref[...]
            res = res_ref[2 * nb - s]                                  # LIFO skip
            cat = jnp.concatenate([cur, res], axis=-1).astype(bf16)   # (N, 2Cf)
            pre = (jnp.dot(cat, uk_ref[0], preferred_element_type=f32)
                   + ub_ref[0] + tcol * utp_ref[0])
            cur_ref[...] = cur + silu(pre)

        # ---- final stage: single output write (constant out index => one
        #      copy-out at the end of the grid) --------------------------------
        @pl.when(s == last)
        def _():
            o_ref[...] = cur_ref[...].astype(o_ref.dtype)

    return kernel


# ----------------------------------------------------------------------------
# Forward wrapper (one pallas_call, grid over stages)
# ----------------------------------------------------------------------------


def temporal_unet_forward(packed, latents, timesteps, audio_features,
                          num_heads=8, reference_frame=None):
    """TemporalUNet.forward -- latents: (B, T, C, H, W)."""
    # TODO(synk): reference_net path not implemented (external module); only the
    #             reference_frame=None branch (ref_features=None) is reproduced.
    del reference_frame
    B, T, C, H, W = latents.shape
    P = H * W
    Cf = C * P
    N = B * T
    S, A = audio_features.shape[1], audio_features.shape[2]
    Sp = max(8, ((S + 7) // 8) * 8)
    nb = packed["dk"].shape[0]
    n_stages = 2 * nb + 1

    # Frame features in CHW-flatten order == torch x.reshape(B, T, -1) on NCHW.
    x0 = latents.reshape(N, Cf).astype(jnp.float32)
    tcol = timesteps.reshape(N, 1).astype(jnp.float32)
    audio_pad = jnp.pad(audio_features.astype(jnp.float32),
                        ((0, 0), (0, Sp - S), (0, 0))).reshape(B * Sp, A)

    # Batches stacked along sublanes; block-diagonal masks keep attention
    # inside the own batch and mask the zero-padded audio positions.
    neg = jnp.float32(-1e30)
    row_b = jnp.arange(N, dtype=jnp.int32)[:, None] // T
    col_t = jnp.arange(N, dtype=jnp.int32)[None, :] // T
    mask_t = jnp.where(row_b == col_t, 0.0, neg).astype(jnp.float32)
    col_a = jnp.arange(B * Sp, dtype=jnp.int32)[None, :]
    mask_a = jnp.where((row_b == col_a // Sp) & (col_a % Sp < S),
                       0.0, neg).astype(jnp.float32)

    kernel = _make_fused_kernel(num_heads, nb, Cf)

    # ---- BlockSpecs: stage weights streamed on the leading nb axis ----------
    def const_spec(arr):
        nd = arr.ndim
        return pl.BlockSpec(arr.shape, lambda s, _nd=nd: (0,) * _nd)

    def down_spec(arr):                      # stages 0..nb-1, clamped afterwards
        nd = arr.ndim
        return pl.BlockSpec(
            (1,) + arr.shape[1:],
            lambda s, _nd=nd: (jnp.minimum(s, nb - 1),) + (0,) * (_nd - 1))

    def up_spec(arr):                        # stages nb+1..2nb, clamped before
        nd = arr.ndim
        return pl.BlockSpec(
            (1,) + arr.shape[1:],
            lambda s, _nd=nd: (jnp.maximum(s - nb - 1, 0),) + (0,) * (_nd - 1))

    in_args = (x0, tcol, audio_pad, mask_t, mask_a,
               packed["dk"], packed["db"], packed["dtp"],
               packed["uk"], packed["ub"], packed["utp"],
               packed["mk"], packed["mb"], packed["mtp"],
               packed["wqkv"], packed["wproj"], packed["bproj"],
               packed["wfrm"], packed["bfrm"], packed["waud"], packed["baud"],
               packed["wout"], packed["bout"])
    in_specs = [const_spec(x0), const_spec(tcol), const_spec(audio_pad),
                const_spec(mask_t), const_spec(mask_a),
                down_spec(packed["dk"]), down_spec(packed["db"]),
                down_spec(packed["dtp"]),
                up_spec(packed["uk"]), up_spec(packed["ub"]),
                up_spec(packed["utp"]),
                const_spec(packed["mk"]), const_spec(packed["mb"]),
                const_spec(packed["mtp"]),
                down_spec(packed["wqkv"]), down_spec(packed["wproj"]),
                down_spec(packed["bproj"]),
                down_spec(packed["wfrm"]), down_spec(packed["bfrm"]),
                down_spec(packed["waud"]), down_spec(packed["baud"]),
                down_spec(packed["wout"]), down_spec(packed["bout"])]

    out = pl.pallas_call(
        kernel,
        out_shape=jax.ShapeDtypeStruct((N, Cf), jnp.float32),
        grid_spec=pltpu.PrefetchScalarGridSpec(
            num_scalar_prefetch=0,
            grid=(n_stages,),
            in_specs=in_specs,
            out_specs=pl.BlockSpec((N, Cf), lambda s: (0, 0)),
            scratch_shapes=[pltpu.VMEM((N, Cf), jnp.float32),        # cur
                            pltpu.VMEM((nb, N, Cf), jnp.float32)]),  # down res
        compiler_params=pltpu.CompilerParams(
            dimension_semantics=("arbitrary",),
            vmem_limit_bytes=16 * 1024 * 1024),
    )(*in_args)
    return out.reshape(B, T, C, H, W)


# ----------------------------------------------------------------------------
# Parameter init (logical layout) + one-time packing into the kernel layout
# ----------------------------------------------------------------------------


def init_params(key, n_blocks, c, frame_dim, audio_dim, num_heads):
    keys = iter(jax.random.split(key, 16 * n_blocks + 8))

    def nrm(shape, scale=0.02):
        return jax.random.normal(next(keys), shape, jnp.float32) * scale

    params = {"down": [], "up": [], "temporal": [], "audio": []}
    for _ in range(n_blocks):
        params["down"].append(
            {"w": nrm((c, c)), "b": jnp.zeros((c,), jnp.float32),
             "tproj": nrm((c,), 0.01)})
        params["up"].append(
            {"w": nrm((c, 2 * c)), "b": jnp.zeros((c,), jnp.float32),
             "tproj": nrm((c,), 0.01)})
        params["temporal"].append({
            "w_qkv": nrm((frame_dim, 3 * frame_dim)),       # bias=False in torch
            "temperature": jnp.ones((num_heads,), jnp.float32),
            "w_proj": nrm((frame_dim, frame_dim)),
            "b_proj": jnp.zeros((frame_dim,), jnp.float32),
        })
        params["audio"].append({
            "w_frame": nrm((frame_dim, frame_dim)),
            "b_frame": jnp.zeros((frame_dim,), jnp.float32),
            "w_audio": nrm((audio_dim, frame_dim)),
            "b_audio": jnp.zeros((frame_dim,), jnp.float32),
            "w_out": nrm((frame_dim, frame_dim)),
            "b_out": jnp.zeros((frame_dim,), jnp.float32),
        })
    params["mid"] = {"w": nrm((c, c)), "b": jnp.zeros((c,), jnp.float32),
                     "tproj": nrm((c,), 0.01)}
    return params


def pack_params(params, num_heads, spatial):
    """One-time (outside jit) repack: bf16 full-width matmul weights, kron-
    expanded 1x1-conv mixes, per-head temperature folded into q columns,
    audio softmax scale folded into frame_proj, up-block skip weights
    pre-concatenated, lane-replicated biases."""
    P = spatial
    f32, bf16 = jnp.float32, jnp.bfloat16
    c = params["down"][0]["w"].shape[0]
    cf = params["temporal"][0]["w_proj"].shape[0]
    dh = cf // num_heads
    audio_scale = float(dh) ** -0.5

    def kron_t(w):                       # (Cout, Cin) -> (Cin*P, Cout*P)
        return jnp.kron(w.T, jnp.eye(P, dtype=w.dtype))

    def rep(v):                          # (C,) -> (1, C*P) channel-major
        return jnp.repeat(v, P)[None, :]

    p = {}
    # synthetic down / mid blocks
    p["dk"] = jnp.stack([kron_t(d["w"]) for d in params["down"]]).astype(bf16)
    p["db"] = jnp.stack([rep(d["b"]) for d in params["down"]]).astype(f32)
    p["dtp"] = jnp.stack([rep(d["tproj"]) for d in params["down"]]).astype(f32)
    p["mk"] = kron_t(params["mid"]["w"]).astype(bf16)[None]
    p["mb"] = rep(params["mid"]["b"]).astype(f32)[None]
    p["mtp"] = rep(params["mid"]["tproj"]).astype(f32)[None]
    # synthetic up blocks: [x-mix ; skip-mix] stacked so the kernel does one
    # (N, 2*Cf) @ (2*Cf, Cf) matmul per up block.
    p["uk"] = jnp.stack([
        jnp.concatenate([kron_t(u["w"][:, :c]), kron_t(u["w"][:, c:])], axis=0)
        for u in params["up"]]).astype(bf16)
    p["ub"] = jnp.stack([rep(u["b"]) for u in params["up"]]).astype(f32)
    p["utp"] = jnp.stack([rep(u["tproj"]) for u in params["up"]]).astype(f32)

    # TemporalAttention: per-head temperature folded into the q columns
    # ((q * t_h) k^T == t_h (q k^T)); qkv kept as ONE (Cf, 3*Cf) matrix.
    wqkv = []
    for t in params["temporal"]:
        q_col_scale = jnp.repeat(t["temperature"], dh)               # (cf,)
        col_scale = jnp.concatenate([q_col_scale, jnp.ones((2 * cf,), f32)])
        wqkv.append(t["w_qkv"] * col_scale[None, :])
    p["wqkv"] = jnp.stack(wqkv).astype(bf16)                         # (nb,Cf,3Cf)
    p["wproj"] = jnp.stack([t["w_proj"]
                            for t in params["temporal"]]).astype(bf16)
    p["bproj"] = jnp.stack([t["b_proj"][None, :]
                            for t in params["temporal"]]).astype(f32)

    # AudioAttention: softmax scale folded into frame_proj weight + bias.
    p["wfrm"] = jnp.stack([a["w_frame"] * audio_scale
                           for a in params["audio"]]).astype(bf16)
    p["bfrm"] = jnp.stack([(a["b_frame"] * audio_scale)[None, :]
                           for a in params["audio"]]).astype(f32)
    p["waud"] = jnp.stack([a["w_audio"] for a in params["audio"]]).astype(bf16)
    p["baud"] = jnp.stack([a["b_audio"][None, :]
                           for a in params["audio"]]).astype(f32)
    p["wout"] = jnp.stack([a["w_out"] for a in params["audio"]]).astype(bf16)
    p["bout"] = jnp.stack([a["b_out"][None, :]
                           for a in params["audio"]]).astype(f32)
    return p


# ----------------------------------------------------------------------------
# Demo
# ----------------------------------------------------------------------------

if __name__ == "__main__":
    B, T, C, H, W = 2, 8, 4, 8, 8            # num_frames = 8
    FRAME_DIM = C * H * W                    # 256 == C*H*W (torch reshape(B,T,-1))
    AUDIO_DIM = 64
    S_AUDIO = 6
    NUM_HEADS = 8
    N_BLOCKS = 4                             # len(down_blocks) == len(up_blocks)

    root = jax.random.PRNGKey(0)
    k_lat, k_aud, k_par = jax.random.split(root, 3)

    latents = jax.random.normal(k_lat, (B, T, C, H, W), jnp.float32)
    audio_features = jax.random.normal(k_aud, (B, S_AUDIO, AUDIO_DIM), jnp.float32)
    timesteps = jnp.arange(B * T, dtype=jnp.float32) * 0.1

    params = init_params(k_par, N_BLOCKS, C, FRAME_DIM, AUDIO_DIM, NUM_HEADS)
    packed = pack_params(params, NUM_HEADS, H * W)     # once, outside jit

    fwd = jax.jit(lambda pk, lat, ts, au: temporal_unet_forward(
        pk, lat, ts, au, num_heads=NUM_HEADS))
    out = jax.block_until_ready(fwd(packed, latents, timesteps, audio_features))

    assert out.shape == (B, T, C, H, W), out.shape
    assert bool(jnp.all(jnp.isfinite(out)))
    print("KERNEL_OK")
</pallas_src>

<mosaic_0001>
module attributes {stable_mosaic.version = 11 : i64} {
  func.func @kernel(%arg0: i32, %arg1: memref<16x256xf32, #tpu.memory_space<vmem>>, %arg2: memref<16x1xf32, #tpu.memory_space<vmem>>, %arg3: memref<16x64xf32, #tpu.memory_space<vmem>>, %arg4: memref<16x16xf32, #tpu.memory_space<vmem>>, %arg5: memref<16x16xf32, #tpu.memory_space<vmem>>, %arg6: memref<1x256x256xbf16, #tpu.memory_space<vmem>>, %arg7: memref<1x1x256xf32, #tpu.memory_space<vmem>>, %arg8: memref<1x1x256xf32, #tpu.memory_space<vmem>>, %arg9: memref<1x512x256xbf16, #tpu.memory_space<vmem>>, %arg10: memref<1x1x256xf32, #tpu.memory_space<vmem>>, %arg11: memref<1x1x256xf32, #tpu.memory_space<vmem>>, %arg12: memref<1x256x256xbf16, #tpu.memory_space<vmem>>, %arg13: memref<1x1x256xf32, #tpu.memory_space<vmem>>, %arg14: memref<1x1x256xf32, #tpu.memory_space<vmem>>, %arg15: memref<1x256x768xbf16, #tpu.memory_space<vmem>>, %arg16: memref<1x256x256xbf16, #tpu.memory_space<vmem>>, %arg17: memref<1x1x256xf32, #tpu.memory_space<vmem>>, %arg18: memref<1x256x256xbf16, #tpu.memory_space<vmem>>, %arg19: memref<1x1x256xf32, #tpu.memory_space<vmem>>, %arg20: memref<1x64x256xbf16, #tpu.memory_space<vmem>>, %arg21: memref<1x1x256xf32, #tpu.memory_space<vmem>>, %arg22: memref<1x256x256xbf16, #tpu.memory_space<vmem>>, %arg23: memref<1x1x256xf32, #tpu.memory_space<vmem>>, %arg24: memref<16x256xf32, #tpu.memory_space<vmem>>, %arg25: memref<16x256xf32, #tpu.memory_space<vmem>>, %arg26: memref<4x16x256xf32, #tpu.memory_space<vmem>>) attributes {dimension_semantics = [#tpu.dimension_semantics<arbitrary>], iteration_bounds = array<i64: 9>, scalar_prefetch = 0 : i64, scratch_operands = 2 : i64, tpu.core_type = #tpu.core_type<tc>, window_params = [{pipeline_mode = #tpu.pipeline_mode<synchronous>, transform_indices = @transform_0, window_bounds = array<i64: 16, 256>}, {pipeline_mode = #tpu.pipeline_mode<synchronous>, transform_indices = @transform_1, window_bounds = array<i64: 16, 1>}, {pipeline_mode = #tpu.pipeline_mode<synchronous>, transform_indices = @transform_2, window_bounds = array<i64: 16, 64>}, {pipeline_mode = #tpu.pipeline_mode<synchronous>, transform_indices = @transform_3, window_bounds = array<i64: 16, 16>}, {pipeline_mode = #tpu.pipeline_mode<synchronous>, transform_indices = @transform_4, window_bounds = array<i64: 16, 16>}, {transform_indices = @transform_5, window_bounds = array<i64: 1, 256, 256>}, {transform_indices = @transform_6, window_bounds = array<i64: 1, 1, 256>}, {transform_indices = @transform_7, window_bounds = array<i64: 1, 1, 256>}, {transform_indices = @transform_8, window_bounds = array<i64: 1, 512, 256>}, {transform_indices = @transform_9, window_bounds = array<i64: 1, 1, 256>}, {transform_indices = @transform_10, window_bounds = array<i64: 1, 1, 256>}, {pipeline_mode = #tpu.pipeline_mode<synchronous>, transform_indices = @transform_11, window_bounds = array<i64: 1, 256, 256>}, {pipeline_mode = #tpu.pipeline_mode<synchronous>, transform_indices = @transform_12, window_bounds = array<i64: 1, 1, 256>}, {pipeline_mode = #tpu.pipeline_mode<synchronous>, transform_indices = @transform_13, window_bounds = array<i64: 1, 1, 256>}, {transform_indices = @transform_14, window_bounds = array<i64: 1, 256, 768>}, {transform_indices = @transform_15, window_bounds = array<i64: 1, 256, 256>}, {transform_indices = @transform_16, window_bounds = array<i64: 1, 1, 256>}, {transform_indices = @transform_17, window_bounds = array<i64: 1, 256, 256>}, {transform_indices = @transform_18, window_bounds = array<i64: 1, 1, 256>}, {transform_indices = @transform_19, window_bounds = array<i64: 1, 64, 256>}, {transform_indices = @transform_20, window_bounds = array<i64: 1, 1, 256>}, {transform_indices = @transform_21, window_bounds = array<i64: 1, 256, 256>}, {transform_indices = @transform_22, window_bounds = array<i64: 1, 1, 256>}, {pipeline_mode = #tpu.pipeline_mode<synchronous>, transform_indices = @transform_23, window_bounds = array<i64: 16, 256>}]} {
    %c0 = arith.constant 0 : index
    %c0_0 = arith.constant 0 : index
    %0 = vector.load %arg2[%c0, %c0_0] : memref<16x1xf32, #tpu.memory_space<vmem>>, vector<16x1xf32>
    %c0_i32 = arith.constant 0 : i32
    %1 = arith.cmpi eq, %arg0, %c0_i32 : i32
    %2 = arith.extui %1 : i1 to i32
    %c0_i32_1 = arith.constant 0 : i32
    %3 = arith.cmpi ne, %2, %c0_i32_1 : i32
    scf.if %3 {
      %c0_8 = arith.constant 0 : index
      %c0_9 = arith.constant 0 : index
      %16 = vector.load %arg1[%c0_8, %c0_9] : memref<16x256xf32, #tpu.memory_space<vmem>>, vector<16x256xf32>
      %c0_10 = arith.constant 0 : index
      %c0_11 = arith.constant 0 : index
      %17 = vector.load %arg25[%c0_10, %c0_11] : memref<16x256xf32, #tpu.memory_space<vmem>>, vector<16x256xf32>
      tpu.vector_store %arg25[%c0_10, %c0_11], %16 {strides = array<i32>} : memref<16x256xf32, #tpu.memory_space<vmem>>, vector<16x256xf32>,
    } else {
    }
    %c4_i32 = arith.constant 4 : i32
    %4 = arith.cmpi slt, %arg0, %c4_i32 : i32
    %5 = arith.extui %4 : i1 to i32
    %c0_i32_2 = arith.constant 0 : i32
    %6 = arith.cmpi ne, %5, %c0_i32_2 : i32
    scf.if %6 {
      %c0_8 = arith.constant 0 : index
      %c0_9 = arith.constant 0 : index
      %16 = vector.load %arg25[%c0_8, %c0_9] : memref<16x256xf32, #tpu.memory_space<vmem>>, vector<16x256xf32>
      %c0_10 = arith.constant 0 : index
      %c0_11 = arith.constant 0 : index
      %17 = vector.load %arg4[%c0_10, %c0_11] : memref<16x16xf32, #tpu.memory_space<vmem>>, vector<16x16xf32>
      %c0_12 = arith.constant 0 : index
      %c0_13 = arith.constant 0 : index
      %18 = vector.load %arg5[%c0_12, %c0_13] : memref<16x16xf32, #tpu.memory_space<vmem>>, vector<16x16xf32>
      %c0_14 = arith.constant 0 : index
      %c0_15 = arith.constant 0 : index
      %19 = vector.load %arg3[%c0_14, %c0_15] : memref<16x64xf32, #tpu.memory_space<vmem>>, vector<16x64xf32>
      %20 = arith.truncf %19 : vector<16x64xf32> to vector<16x64xbf16>
      %21 = arith.truncf %16 : vector<16x256xf32> to vector<16x256xbf16>
      %c0_16 = arith.constant 0 : index
      %c0_17 = arith.constant 0 : index
      %c0_18 = arith.constant 0 : index
      %22 = vector.load %arg6[%c0_16, %c0_17, %c0_18] : memref<1x256x256xbf16, #tpu.memory_space<vmem>>, vector<1x256x256xbf16>
      %23 = vector.shape_cast %22 : vector<1x256x256xbf16> to vector<256x256xbf16>
      %cst = arith.constant dense<0.000000e+00> : vector<16x256xf32>
      %24 = tpu.matmul %21, %23, %cst {dimension_numbers = #tpu.dot_dimension_numbers<[1], [0], [0], [1], [0, 0, 1, 1], [], []>} : vector<16x256xbf16>, vector<256x256xbf16>, vector<16x256xf32> -> vector<16x256xf32>
      %c0_19 = arith.constant 0 : index
      %c0_20 = arith.constant 0 : index
      %c0_21 = arith.constant 0 : index
      %25 = vector.load %arg7[%c0_19, %c0_20, %c0_21] : memref<1x1x256xf32, #tpu.memory_space<vmem>>, vector<1x1x256xf32>
      %26 = vector.shape_cast %25 : vector<1x1x256xf32> to vector<1x256xf32>
      %27 = vector.broadcast %26 : vector<1x256xf32> to vector<16x256xf32>
      %28 = arith.addf %24, %27 : vector<16x256xf32>
      %c0_22 = arith.constant 0 : index
      %c0_23 = arith.constant 0 : index
      %c0_24 = arith.constant 0 : index
      %29 = vector.load %arg8[%c0_22, %c0_23, %c0_24] : memref<1x1x256xf32, #tpu.memory_space<vmem>>, vector<1x1x256xf32>
      %30 = vector.shape_cast %29 : vector<1x1x256xf32> to vector<1x256xf32>
      %31 = vector.broadcast %0 : vector<16x1xf32> to vector<16x256xf32>
      %32 = vector.broadcast %30 : vector<1x256xf32> to vector<16x256xf32>
      %33 = arith.mulf %31, %32 : vector<16x256xf32>
      %34 = arith.addf %28, %33 : vector<16x256xf32>
      %35 = arith.negf %34 : vector<16x256xf32>
      %36 = math.exp %35 : vector<16x256xf32>
      %cst_25 = arith.constant 1.000000e+00 : f32
      %37 = vector.broadcast %cst_25 : f32 to vector<16x256xf32>
      %38 = arith.addf %37, %36 : vector<16x256xf32>
      %39 = arith.divf %37, %38 : vector<16x256xf32>
      %40 = arith.mulf %34, %39 : vector<16x256xf32>
      %41 = arith.addf %16, %40 : vector<16x256xf32>
      %42 = arith.truncf %41 : vector<16x256xf32> to vector<16x256xbf16>
      %c0_26 = arith.constant 0 : index
      %c0_27 = arith.constant 0 : index
      %c0_28 = arith.constant 0 : index
      %43 = vector.load %arg15[%c0_26, %c0_27, %c0_28] : memref<1x256x768xbf16, #tpu.memory_space<vmem>>, vector<1x256x768xbf16>
      %44 = vector.shape_cast %43 : vector<1x256x768xbf16> to vector<256x768xbf16>
      %cst_29 = arith.constant dense<0.000000e+00> : vector<16x768xf32>
      %45 = tpu.matmul %42, %44, %cst_29 {dimension_numbers = #tpu.dot_dimension_numbers<[1], [0], [0], [1], [0, 0, 1, 1], [], []>} : vector<16x256xbf16>, vector<256x768xbf16>, vector<16x768xf32> -> vector<16x768xf32>
      %46 = vector.extract_strided_slice %45 {offsets = [0, 0], sizes = [16, 256], strides = [1, 1]} : vector<16x768xf32> to vector<16x256xf32>
      %47 = vector.extract_strided_slice %45 {offsets = [0, 256], sizes = [16, 256], strides = [1, 1]} : vector<16x768xf32> to vector<16x256xf32>
      %48 = vector.extract_strided_slice %45 {offsets = [0, 512], sizes = [16, 256], strides = [1, 1]} : vector<16x768xf32> to vector<16x256xf32>
      %c0_30 = arith.constant 0 : index
      %c0_31 = arith.constant 0 : index
      %c0_32 = arith.constant 0 : index
      %49 = vector.load %arg16[%c0_30, %c0_31, %c0_32] : memref<1x256x256xbf16, #tpu.memory_space<vmem>>, vector<1x256x256xbf16>
      %50 = vector.shape_cast %49 : vector<1x256x256xbf16> to vector<256x256xbf16>
      %c0_33 = arith.constant 0 : index
      %c0_34 = arith.constant 0 : index
      %c0_35 = arith.constant 0 : index
      %51 = vector.load %arg17[%c0_33, %c0_34, %c0_35] : memref<1x1x256xf32, #tpu.memory_space<vmem>>, vector<1x1x256xf32>
      %52 = vector.shape_cast %51 : vector<1x1x256xf32> to vector<1x256xf32>
      %53 = vector.extract_strided_slice %46 {offsets = [0, 0], sizes = [16, 32], strides = [1, 1]} : vector<16x256xf32> to vector<16x32xf32>
      %54 = vector.extract_strided_slice %47 {offsets = [0, 0], sizes = [16, 32], strides = [1, 1]} : vector<16x256xf32> to vector<16x32xf32>
      %55 = vector.extract_strided_slice %48 {offsets = [0, 0], sizes = [16, 32], strides = [1, 1]} : vector<16x256xf32> to vector<16x32xf32>
      %cst_36 = arith.constant dense<0.000000e+00> : vector<16x16xf32>
      %56 = tpu.matmul %53, %54, %cst_36 {dimension_numbers = #tpu.dot_dimension_numbers<[1], [1], [0], [0], [0, 0, 1, 0], [], []>} : vector<16x32xf32>, vector<16x32xf32>, vector<16x16xf32> -> vector<16x16xf32>
      %57 = arith.addf %56, %17 : vector<16x16xf32>
      %cst_37 = arith.constant dense<0xFF800000> : vector<16xf32>
      %58 = vector.multi_reduction <maximumf>, %57, %cst_37 [1] : vector<16x16xf32> to vector<16xf32>
      %59 = vector.shape_cast %58 : vector<16xf32> to vector<16x1xf32>
      %60 = vector.broadcast %59 : vector<16x1xf32> to vector<16x16xf32>
      %61 = arith.subf %57, %60 : vector<16x16xf32>
      %62 = math.exp %61 : vector<16x16xf32>
      %cst_38 = arith.constant dense<0.000000e+00> : vector<16xf32>
      %63 = vector.multi_reduction <add>, %62, %cst_38 [1] : vector<16x16xf32> to vector<16xf32>
      %64 = vector.shape_cast %63 : vector<16xf32> to vector<16x1xf32>
      %65 = tpu.reciprocal %64 {approx = true} : vector<16x1xf32> -> vector<16x1xf32>
      %66 = vector.broadcast %65 : vector<16x1xf32> to vector<16x16xf32>
      %67 = arith.mulf %62, %66 : vector<16x16xf32>
      %cst_39 = arith.constant dense<0.000000e+00> : vector<16x32xf32>
      %68 = tpu.matmul %67, %55, %cst_39 {dimension_numbers = #tpu.dot_dimension_numbers<[1], [0], [0], [1], [0, 0, 1, 1], [], []>} : vector<16x16xf32>, vector<16x32xf32>, vector<16x32xf32> -> vector<16x32xf32>
      %69 = vector.extract_strided_slice %46 {offsets = [0, 32], sizes = [16, 32], strides = [1, 1]} : vector<16x256xf32> to vector<16x32xf32>
      %70 = vector.extract_strided_slice %47 {offsets = [0, 32], sizes = [16, 32], strides = [1, 1]} : vector<16x256xf32> to vector<16x32xf32>
      %71 = vector.extract_strided_slice %48 {offsets = [0, 32], sizes = [16, 32], strides = [1, 1]} : vector<16x256xf32> to vector<16x32xf32>
      %cst_40 = arith.constant dense<0.000000e+00> : vector<16x16xf32>
      %72 = tpu.matmul %69, %70, %cst_40 {dimension_numbers = #tpu.dot_dimension_numbers<[1], [1], [0], [0], [0, 0, 1, 0], [], []>} : vector<16x32xf32>, vector<16x32xf32>, vector<16x16xf32> -> vector<16x16xf32>
      %73 = arith.addf %72, %17 : vector<16x16xf32>
      %cst_41 = arith.constant dense<0xFF800000> : vector<16xf32>
      %74 = vector.multi_reduction <maximumf>, %73, %cst_41 [1] : vector<16x16xf32> to vector<16xf32>
      %75 = vector.shape_cast %74 : vector<16xf32> to vector<16x1xf32>
      %76 = vector.broadcast %75 : vector<16x1xf32> to vector<16x16xf32>
      %77 = arith.subf %73, %76 : vector<16x16xf32>
      %78 = math.exp %77 : vector<16x16xf32>
      %cst_42 = arith.constant dense<0.000000e+00> : vector<16xf32>
      %79 = vector.multi_reduction <add>, %78, %cst_42 [1] : vector<16x16xf32> to vector<16xf32>
      %80 = vector.shape_cast %79 : vector<16xf32> to vector<16x1xf32>
      %81 = tpu.reciprocal %80 {approx = true} : vector<16x1xf32> -> vector<16x1xf32>
      %82 = vector.broadcast %81 : vector<16x1xf32> to vector<16x16xf32>
      %83 = arith.mulf %78, %82 : vector<16x16xf32>
      %cst_43 = arith.constant dense<0.000000e+00> : vector<16x32xf32>
      %84 = tpu.matmul %83, %71, %cst_43 {dimension_numbers = #tpu.dot_dimension_numbers<[1], [0], [0], [1], [0, 0, 1, 1], [], []>} : vector<16x16xf32>, vector<16x32xf32>, vector<16x32xf32> -> vector<16x32xf32>
      %85 = vector.extract_strided_slice %46 {offsets = [0, 64], sizes = [16, 32], strides = [1, 1]} : vector<16x256xf32> to vector<16x32xf32>
      %86 = vector.extract_strided_slice %47 {offsets = [0, 64], sizes = [16, 32], strides = [1, 1]} : vector<16x256xf32> to vector<16x32xf32>
      %87 = vector.extract_strided_slice %48 {offsets = [0, 64], sizes = [16, 32], strides = [1, 1]} : vector<16x256xf32> to vector<16x32xf32>
      %cst_44 = arith.constant dense<0.000000e+00> : vector<16x16xf32>
      %88 = tpu.matmul %85, %86, %cst_44 {dimension_numbers = #tpu.dot_dimension_numbers<[1], [1], [0], [0], [0, 0, 1, 0], [], []>} : vector<16x32xf32>, vector<16x32xf32>, vector<16x16xf32> -> vector<16x16xf32>
      %89 = arith.addf %88, %17 : vector<16x16xf32>
      %cst_45 = arith.constant dense<0xFF800000> : vector<16xf32>
      %90 = vector.multi_reduction <maximumf>, %89, %cst_45 [1] : vector<16x16xf32> to vector<16xf32>
      %91 = vector.shape_cast %90 : vector<16xf32> to vector<16x1xf32>
      %92 = vector.broadcast %91 : vector<16x1xf32> to vector<16x16xf32>
      %93 = arith.subf %89, %92 : vector<16x16xf32>
      %94 = math.exp %93 : vector<16x16xf32>
      %cst_46 = arith.constant dense<0.000000e+00> : vector<16xf32>
      %95 = vector.multi_reduction <add>, %94, %cst_46 [1] : vector<16x16xf32> to vector<16xf32>
      %96 = vector.shape_cast %95 : vector<16xf32> to vector<16x1xf32>
      %97 = tpu.reciprocal %96 {approx = true} : vector<16x1xf32> -> vector<16x1xf32>
      %98 = vector.broadcast %97 : vector<16x1xf32> to vector<16x16xf32>
      %99 = arith.mulf %94, %98 : vector<16x16xf32>
      %cst_47 = arith.constant dense<0.000000e+00> : vector<16x32xf32>
      %100 = tpu.matmul %99, %87, %cst_47 {dimension_numbers = #tpu.dot_dimension_numbers<[1], [0], [0], [1], [0, 0, 1, 1], [], []>} : vector<16x16xf32>, vector<16x32xf32>, vector<16x32xf32> -> vector<16x32xf32>
      %101 = vector.extract_strided_slice %46 {offsets = [0, 96], sizes = [16, 32], strides = [1, 1]} : vector<16x256xf32> to vector<16x32xf32>
      %102 = vector.extract_strided_slice %47 {offsets = [0, 96], sizes = [16, 32], strides = [1, 1]} : vector<16x256xf32> to vector<16x32xf32>
      %103 = vector.extract_strided_slice %48 {offsets = [0, 96], sizes = [16, 32], strides = [1, 1]} : vector<16x256xf32> to vector<16x32xf32>
      %cst_48 = arith.constant dense<0.000000e+00> : vector<16x16xf32>
      %104 = tpu.matmul %101, %102, %cst_48 {dimension_numbers = #tpu.dot_dimension_numbers<[1], [1], [0], [0], [0, 0, 1, 0], [], []>} : vector<16x32xf32>, vector<16x32xf32>, vector<16x16xf32> -> vector<16x16xf32>
      %105 = arith.addf %104, %17 : vector<16x16xf32>
      %cst_49 = arith.constant dense<0xFF800000> : vector<16xf32>
      %106 = vector.multi_reduction <maximumf>, %105, %cst_49 [1] : vector<16x16xf32> to vector<16xf32>
      %107 = vector.shape_cast %106 : vector<16xf32> to vector<16x1xf32>
      %108 = vector.broadcast %107 : vector<16x1xf32> to vector<16x16xf32>
      %109 = arith.subf %105, %108 : vector<16x16xf32>
      %110 = math.exp %109 : vector<16x16xf32>
      %cst_50 = arith.constant dense<0.000000e+00> : vector<16xf32>
      %111 = vector.multi_reduction <add>, %110, %cst_50 [1] : vector<16x16xf32> to vector<16xf32>
      %112 = vector.shape_cast %111 : vector<16xf32> to vector<16x1xf32>
      %113 = tpu.reciprocal %112 {approx = true} : vector<16x1xf32> -> vector<16x1xf32>
      %114 = vector.broadcast %113 : vector<16x1xf32> to vector<16x16xf32>
      %115 = arith.mulf %110, %114 : vector<16x16xf32>
      %cst_51 = arith.constant dense<0.000000e+00> : vector<16x32xf32>
      %116 = tpu.matmul %115, %103, %cst_51 {dimension_numbers = #tpu.dot_dimension_numbers<[1], [0], [0], [1], [0, 0, 1, 1], [], []>} : vector<16x16xf32>, vector<16x32xf32>, vector<16x32xf32> -> vector<16x32xf32>
      %117 = vector.extract_strided_slice %46 {offsets = [0, 128], sizes = [16, 32], strides = [1, 1]} : vector<16x256xf32> to vector<16x32xf32>
      %118 = vector.extract_strided_slice %47 {offsets = [0, 128], sizes = [16, 32], strides = [1, 1]} : vector<16x256xf32> to vector<16x32xf32>
      %119 = vector.extract_strided_slice %48 {offsets = [0, 128], sizes = [16, 32], strides = [1, 1]} : vector<16x256xf32> to vector<16x32xf32>
      %cst_52 = arith.constant dense<0.000000e+00> : vector<16x16xf32>
      %120 = tpu.matmul %117, %118, %cst_52 {dimension_numbers = #tpu.dot_dimension_numbers<[1], [1], [0], [0], [0, 0, 1, 0], [], []>} : vector<16x32xf32>, vector<16x32xf32>, vector<16x16xf32> -> vector<16x16xf32>
      %121 = arith.addf %120, %17 : vector<16x16xf32>
      %cst_53 = arith.constant dense<0xFF800000> : vector<16xf32>
      %122 = vector.multi_reduction <maximumf>, %121, %cst_53 [1] : vector<16x16xf32> to vector<16xf32>
      %123 = vector.shape_cast %122 : vector<16xf32> to vector<16x1xf32>
      %124 = vector.broadcast %123 : vector<16x1xf32> to vector<16x16xf32>
      %125 = arith.subf %121, %124 : vector<16x16xf32>
      %126 = math.exp %125 : vector<16x16xf32>
      %cst_54 = arith.constant dense<0.000000e+00> : vector<16xf32>
      %127 = vector.multi_reduction <add>, %126, %cst_54 [1] : vector<16x16xf32> to vector<16xf32>
      %128 = vector.shape_cast %127 : vector<16xf32> to vector<16x1xf32>
      %129 = tpu.reciprocal %128 {approx = true} : vector<16x1xf32> -> vector<16x1xf32>
      %130 = vector.broadcast %129 : vector<16x1xf32> to vector<16x16xf32>
      %131 = arith.mulf %126, %130 : vector<16x16xf32>
      %cst_55 = arith.constant dense<0.000000e+00> : vector<16x32xf32>
      %132 = tpu.matmul %131, %119, %cst_55 {dimension_numbers = #tpu.dot_dimension_numbers<[1], [0], [0], [1], [0, 0, 1, 1], [], []>} : vector<16x16xf32>, vector<16x32xf32>, vector<16x32xf32> -> vector<16x32xf32>
      %133 = vector.extract_strided_slice %46 {offsets = [0, 160], sizes = [16, 32], strides = [1, 1]} : vector<16x256xf32> to vector<16x32xf32>
      %134 = vector.extract_strided_slice %47 {offsets = [0, 160], sizes = [16, 32], strides = [1, 1]} : vector<16x256xf32> to vector<16x32xf32>
      %135 = vector.extract_strided_slice %48 {offsets = [0, 160], sizes = [16, 32], strides = [1, 1]} : vector<16x256xf32> to vector<16x32xf32>
      %cst_56 = arith.constant dense<0.000000e+00> : vector<16x16xf32>
      %136 = tpu.matmul %133, %134, %cst_56 {dimension_numbers = #tpu.dot_dimension_numbers<[1], [1], [0], [0], [0, 0, 1, 0], [], []>} : vector<16x32xf32>, vector<16x32xf32>, vector<16x16xf32> -> vector<16x16xf32>
      %137 = arith.addf %136, %17 : vector<16x16xf32>
      %cst_57 = arith.constant dense<0xFF800000> : vector<16xf32>
      %138 = vector.multi_reduction <maximumf>, %137, %cst_57 [1] : vector<16x16xf32> to vector<16xf32>
      %139 = vector.shape_cast %138 : vector<16xf32> to vector<16x1xf32>
      %140 = vector.broadcast %139 : vector<16x1xf32> to vector<16x16xf32>
      %141 = arith.subf %137, %140 : vector<16x16xf32>
      %142 = math.exp %141 : vector<16x16xf32>
      %cst_58 = arith.constant dense<0.000000e+00> : vector<16xf32>
      %143 = vector.multi_reduction <add>, %142, %cst_58 [1] : vector<16x16xf32> to vector<16xf32>
      %144 = vector.shape_cast %143 : vector<16xf32> to vector<16x1xf32>
      %145 = tpu.reciprocal %144 {approx = true} : vector<16x1xf32> -> vector<16x1xf32>
      %146 = vector.broadcast %145 : vector<16x1xf32> to vector<16x16xf32>
      %147 = arith.mulf %142, %146 : vector<16x16xf32>
      %cst_59 = arith.constant dense<0.000000e+00> : vector<16x32xf32>
      %148 = tpu.matmul %147, %135, %cst_59 {dimension_numbers = #tpu.dot_dimension_numbers<[1], [0], [0], [1], [0, 0, 1, 1], [], []>} : vector<16x16xf32>, vector<16x32xf32>, vector<16x32xf32> -> vector<16x32xf32>
      %149 = vector.extract_strided_slice %46 {offsets = [0, 192], sizes = [16, 32], strides = [1, 1]} : vector<16x256xf32> to vector<16x32xf32>
      %150 = vector.extract_strided_slice %47 {offsets = [0, 192], sizes = [16, 32], strides = [1, 1]} : vector<16x256xf32> to vector<16x32xf32>
      %151 = vector.extract_strided_slice %48 {offsets = [0, 192], sizes = [16, 32], strides = [1, 1]} : vector<16x256xf32> to vector<16x32xf32>
      %cst_60 = arith.constant dense<0.000000e+00> : vector<16x16xf32>
      %152 = tpu.matmul %149, %150, %cst_60 {dimension_numbers = #tpu.dot_dimension_numbers<[1], [1], [0], [0], [0, 0, 1, 0], [], []>} : vector<16x32xf32>, vector<16x32xf32>, vector<16x16xf32> -> vector<16x16xf32>
      %153 = arith.addf %152, %17 : vector<16x16xf32>
      %cst_61 = arith.constant dense<0xFF800000> : vector<16xf32>
      %154 = vector.multi_reduction <maximumf>, %153, %cst_61 [1] : vector<16x16xf32> to vector<16xf32>
      %155 = vector.shape_cast %154 : vector<16xf32> to vector<16x1xf32>
      %156 = vector.broadcast %155 : vector<16x1xf32> to vector<16x16xf32>
      %157 = arith.subf %153, %156 : vector<16x16xf32>
      %158 = math.exp %157 : vector<16x16xf32>
      %cst_62 = arith.constant dense<0.000000e+00> : vector<16xf32>
      %159 = vector.multi_reduction <add>, %158, %cst_62 [1] : vector<16x16xf32> to vector<16xf32>
      %160 = vector.shape_cast %159 : vector<16xf32> to vector<16x1xf32>
      %161 = tpu.reciprocal %160 {approx = true} : vector<16x1xf32> -> vector<16x1xf32>
      %162 = vector.broadcast %161 : vector<16x1xf32> to vector<16x16xf32>
      %163 = arith.mulf %158, %162 : vector<16x16xf32>
      %cst_63 = arith.constant dense<0.000000e+00> : vector<16x32xf32>
      %164 = tpu.matmul %163, %151, %cst_63 {dimension_numbers = #tpu.dot_dimension_numbers<[1], [0], [0], [1], [0, 0, 1, 1], [], []>} : vector<16x16xf32>, vector<16x32xf32>, vector<16x32xf32> -> vector<16x32xf32>
      %165 = vector.extract_strided_slice %46 {offsets = [0, 224], sizes = [16, 32], strides = [1, 1]} : vector<16x256xf32> to vector<16x32xf32>
      %166 = vector.extract_strided_slice %47 {offsets = [0, 224], sizes = [16, 32], strides = [1, 1]} : vector<16x256xf32> to vector<16x32xf32>
      %167 = vector.extract_strided_slice %48 {offsets = [0, 224], sizes = [16, 32], strides = [1, 1]} : vector<16x256xf32> to vector<16x32xf32>
      %cst_64 = arith.constant dense<0.000000e+00> : vector<16x16xf32>
      %168 = tpu.matmul %165, %166, %cst_64 {dimension_numbers = #tpu.dot_dimension_numbers<[1], [1], [0], [0], [0, 0, 1, 0], [], []>} : vector<16x32xf32>, vector<16x32xf32>, vector<16x16xf32> -> vector<16x16xf32>
      %169 = arith.addf %168, %17 : vector<16x16xf32>
      %cst_65 = arith.constant dense<0xFF800000> : vector<16xf32>
      %170 = vector.multi_reduction <maximumf>, %169, %cst_65 [1] : vector<16x16xf32> to vector<16xf32>
      %171 = vector.shape_cast %170 : vector<16xf32> to vector<16x1xf32>
      %172 = vector.broadcast %171 : vector<16x1xf32> to vector<16x16xf32>
      %173 = arith.subf %169, %172 : vector<16x16xf32>
      %174 = math.exp %173 : vector<16x16xf32>
      %cst_66 = arith.constant dense<0.000000e+00> : vector<16xf32>
      %175 = vector.multi_reduction <add>, %174, %cst_66 [1] : vector<16x16xf32> to vector<16xf32>
      %176 = vector.shape_cast %175 : vector<16xf32> to vector<16x1xf32>
      %177 = tpu.reciprocal %176 {approx = true} : vector<16x1xf32> -> vector<16x1xf32>
      %178 = vector.broadcast %177 : vector<16x1xf32> to vector<16x16xf32>
      %179 = arith.mulf %174, %178 : vector<16x16xf32>
      %cst_67 = arith.constant dense<0.000000e+00> : vector<16x32xf32>
      %180 = tpu.matmul %179, %167, %cst_67 {dimension_numbers = #tpu.dot_dimension_numbers<[1], [0], [0], [1], [0, 0, 1, 1], [], []>} : vector<16x16xf32>, vector<16x32xf32>, vector<16x32xf32> -> vector<16x32xf32>
      %181 = tpu.concatenate %68, %84, %100, %116, %132, %148, %164, %180 in 1 : vector<16x32xf32>, vector<16x32xf32>, vector<16x32xf32>, vector<16x32xf32>, vector<16x32xf32>, vector<16x32xf32>, vector<16x32xf32>, vector<16x32xf32> -> vector<16x256xf32>
      %182 = arith.truncf %181 : vector<16x256xf32> to vector<16x256xbf16>
      %cst_68 = arith.constant dense<0.000000e+00> : vector<16x256xf32>
      %183 = tpu.matmul %182, %50, %cst_68 {dimension_numbers = #tpu.dot_dimension_numbers<[1], [0], [0], [1], [0, 0, 1, 1], [], []>} : vector<16x256xbf16>, vector<256x256xbf16>, vector<16x256xf32> -> vector<16x256xf32>
      %184 = vector.broadcast %52 : vector<1x256xf32> to vector<16x256xf32>
      %185 = arith.addf %183, %184 : vector<16x256xf32>
      %186 = arith.truncf %185 : vector<16x256xf32> to vector<16x256xbf16>
      %c0_69 = arith.constant 0 : index
      %c0_70 = arith.constant 0 : index
      %c0_71 = arith.constant 0 : index
      %187 = vector.load %arg18[%c0_69, %c0_70, %c0_71] : memref<1x256x256xbf16, #tpu.memory_space<vmem>>, vector<1x256x256xbf16>
      %188 = vector.shape_cast %187 : vector<1x256x256xbf16> to vector<256x256xbf16>
      %cst_72 = arith.constant dense<0.000000e+00> : vector<16x256xf32>
      %189 = tpu.matmul %186, %188, %cst_72 {dimension_numbers = #tpu.dot_dimension_numbers<[1], [0], [0], [1], [0, 0, 1, 1], [], []>} : vector<16x256xbf16>, vector<256x256xbf16>, vector<16x256xf32> -> vector<16x256xf32>
      %c0_73 = arith.constant 0 : index
      %c0_74 = arith.constant 0 : index
      %c0_75 = arith.constant 0 : index
      %190 = vector.load %arg19[%c0_73, %c0_74, %c0_75] : memref<1x1x256xf32, #tpu.memory_space<vmem>>, vector<1x1x256xf32>
      %191 = vector.shape_cast %190 : vector<1x1x256xf32> to vector<1x256xf32>
      %192 = vector.broadcast %191 : vector<1x256xf32> to vector<16x256xf32>
      %193 = arith.addf %189, %192 : vector<16x256xf32>
      %c0_76 = arith.constant 0 : index
      %c0_77 = arith.constant 0 : index
      %c0_78 = arith.constant 0 : index
      %194 = vector.load %arg20[%c0_76, %c0_77, %c0_78] : memref<1x64x256xbf16, #tpu.memory_space<vmem>>, vector<1x64x256xbf16>
      %195 = vector.shape_cast %194 : vector<1x64x256xbf16> to vector<64x256xbf16>
      %cst_79 = arith.constant dense<0.000000e+00> : vector<16x256xf32>
      %196 = tpu.matmul %20, %195, %cst_79 {dimension_numbers = #tpu.dot_dimension_numbers<[1], [0], [0], [1], [0, 0, 1, 1], [], []>} : vector<16x64xbf16>, vector<64x256xbf16>, vector<16x256xf32> -> vector<16x256xf32>
      %c0_80 = arith.constant 0 : index
      %c0_81 = arith.constant 0 : index
      %c0_82 = arith.constant 0 : index
      %197 = vector.load %arg21[%c0_80, %c0_81, %c0_82] : memref<1x1x256xf32, #tpu.memory_space<vmem>>, vector<1x1x256xf32>
      %198 = vector.shape_cast %197 : vector<1x1x256xf32> to vector<1x256xf32>
      %199 = vector.broadcast %198 : vector<1x256xf32> to vector<16x256xf32>
      %200 = arith.addf %196, %199 : vector<16x256xf32>
      %c0_83 = arith.constant 0 : index
      %c0_84 = arith.constant 0 : index
      %c0_85 = arith.constant 0 : index
      %201 = vector.load %arg22[%c0_83, %c0_84, %c0_85] : memref<1x256x256xbf16, #tpu.memory_space<vmem>>, vector<1x256x256xbf16>
      %202 = vector.shape_cast %201 : vector<1x256x256xbf16> to vector<256x256xbf16>
      %c0_86 = arith.constant 0 : index
      %c0_87 = arith.constant 0 : index
      %c0_88 = arith.constant 0 : index
      %203 = vector.load %arg23[%c0_86, %c0_87, %c0_88] : memref<1x1x256xf32, #tpu.memory_space<vmem>>, vector<1x1x256xf32>
      %204 = vector.shape_cast %203 : vector<1x1x256xf32> to vector<1x256xf32>
      %205 = vector.extract_strided_slice %193 {offsets = [0, 0], sizes = [16, 32], strides = [1, 1]} : vector<16x256xf32> to vector<16x32xf32>
      %206 = vector.extract_strided_slice %200 {offsets = [0, 0], sizes = [16, 32], strides = [1, 1]} : vector<16x256xf32> to vector<16x32xf32>
      %207 = vector.extract_strided_slice %200 {offsets = [0, 0], sizes = [16, 32], strides = [1, 1]} : vector<16x256xf32> to vector<16x32xf32>
      %cst_89 = arith.constant dense<0.000000e+00> : vector<16x16xf32>
      %208 = tpu.matmul %205, %206, %cst_89 {dimension_numbers = #tpu.dot_dimension_numbers<[1], [1], [0], [0], [0, 0, 1, 0], [], []>} : vector<16x32xf32>, vector<16x32xf32>, vector<16x16xf32> -> vector<16x16xf32>
      %209 = arith.addf %208, %18 : vector<16x16xf32>
      %cst_90 = arith.constant dense<0xFF800000> : vector<16xf32>
      %210 = vector.multi_reduction <maximumf>, %209, %cst_90 [1] : vector<16x16xf32> to vector<16xf32>
      %211 = vector.shape_cast %210 : vector<16xf32> to vector<16x1xf32>
      %212 = vector.broadcast %211 : vector<16x1xf32> to vector<16x16xf32>
      %213 = arith.subf %209, %212 : vector<16x16xf32>
      %214 = math.exp %213 : vector<16x16xf32>
      %cst_91 = arith.constant dense<0.000000e+00> : vector<16xf32>
      %215 = vector.multi_reduction <add>, %214, %cst_91 [1] : vector<16x16xf32> to vector<16xf32>
      %216 = vector.shape_cast %215 : vector<16xf32> to vector<16x1xf32>
      %217 = tpu.reciprocal %216 {approx = true} : vector<16x1xf32> -> vector<16x1xf32>
      %218 = vector.broadcast %217 : vector<16x1xf32> to vector<16x16xf32>
      %219 = arith.mulf %214, %218 : vector<16x16xf32>
      %cst_92 = arith.constant dense<0.000000e+00> : vector<16x32xf32>
      %220 = tpu.matmul %219, %207, %cst_92 {dimension_numbers = #tpu.dot_dimension_numbers<[1], [0], [0], [1], [0, 0, 1, 1], [], []>} : vector<16x16xf32>, vector<16x32xf32>, vector<16x32xf32> -> vector<16x32xf32>
      %221 = vector.extract_strided_slice %193 {offsets = [0, 32], sizes = [16, 32], strides = [1, 1]} : vector<16x256xf32> to vector<16x32xf32>
      %222 = vector.extract_strided_slice %200 {offsets = [0, 32], sizes = [16, 32], strides = [1, 1]} : vector<16x256xf32> to vector<16x32xf32>
      %223 = vector.extract_strided_slice %200 {offsets = [0, 32], sizes = [16, 32], strides = [1, 1]} : vector<16x256xf32> to vector<16x32xf32>
      %cst_93 = arith.constant dense<0.000000e+00> : vector<16x16xf32>
      %224 = tpu.matmul %221, %222, %cst_93 {dimension_numbers = #tpu.dot_dimension_numbers<[1], [1], [0], [0], [0, 0, 1, 0], [], []>} : vector<16x32xf32>, vector<16x32xf32>, vector<16x16xf32> -> vector<16x16xf32>
      %225 = arith.addf %224, %18 : vector<16x16xf32>
      %cst_94 = arith.constant dense<0xFF800000> : vector<16xf32>
      %226 = vector.multi_reduction <maximumf>, %225, %cst_94 [1] : vector<16x16xf32> to vector<16xf32>
      %227 = vector.shape_cast %226 : vector<16xf32> to vector<16x1xf32>
      %228 = vector.broadcast %227 : vector<16x1xf32> to vector<16x16xf32>
      %229 = arith.subf %225, %228 : vector<16x16xf32>
      %230 = math.exp %229 : vector<16x16xf32>
      %cst_95 = arith.constant dense<0.000000e+00> : vector<16xf32>
      %231 = vector.multi_reduction <add>, %230, %cst_95 [1] : vector<16x16xf32> to vector<16xf32>
      %232 = vector.shape_cast %231 : vector<16xf32> to vector<16x1xf32>
      %233 = tpu.reciprocal %232 {approx = true} : vector<16x1xf32> -> vector<16x1xf32>
      %234 = vector.broadcast %233 : vector<16x1xf32> to vector<16x16xf32>
      %235 = arith.mulf %230, %234 : vector<16x16xf32>
      %cst_96 = arith.constant dense<0.000000e+00> : vector<16x32xf32>
      %236 = tpu.matmul %235, %223, %cst_96 {dimension_numbers = #tpu.dot_dimension_numbers<[1], [0], [0], [1], [0, 0, 1, 1], [], []>} : vector<16x16xf32>, vector<16x32xf32>, vector<16x32xf32> -> vector<16x32xf32>
      %237 = vector.extract_strided_slice %193 {offsets = [0, 64], sizes = [16, 32], strides = [1, 1]} : vector<16x256xf32> to vector<16x32xf32>
      %238 = vector.extract_strided_slice %200 {offsets = [0, 64], sizes = [16, 32], strides = [1, 1]} : vector<16x256xf32> to vector<16x32xf32>
      %239 = vector.extract_strided_slice %200 {offsets = [0, 64], sizes = [16, 32], strides = [1, 1]} : vector<16x256xf32> to vector<16x32xf32>
      %cst_97 = arith.constant dense<0.000000e+00> : vector<16x16xf32>
      %240 = tpu.matmul %237, %238, %cst_97 {dimension_numbers = #tpu.dot_dimension_numbers<[1], [1], [0], [0], [0, 0, 1, 0], [], []>} : vector<16x32xf32>, vector<16x32xf32>, vector<16x16xf32> -> vector<16x16xf32>
      %241 = arith.addf %240, %18 : vector<16x16xf32>
      %cst_98 = arith.constant dense<0xFF800000> : vector<16xf32>
      %242 = vector.multi_reduction <maximumf>, %241, %cst_98 [1] : vector<16x16xf32> to vector<16xf32>
      %243 = vector.shape_cast %242 : vector<16xf32> to vector<16x1xf32>
      %244 = vector.broadcast %243 : vector<16x1xf32> to vector<16x16xf32>
      %245 = arith.subf %241, %244 : vector<16x16xf32>
      %246 = math.exp %245 : vector<16x16xf32>
      %cst_99 = arith.constant dense<0.000000e+00> : vector<16xf32>
      %247 = vector.multi_reduction <add>, %246, %cst_99 [1] : vector<16x16xf32> to vector<16xf32>
      %248 = vector.shape_cast %247 : vector<16xf32> to vector<16x1xf32>
      %249 = tpu.reciprocal %248 {approx = true} : vector<16x1xf32> -> vector<16x1xf32>
      %250 = vector.broadcast %249 : vector<16x1xf32> to vector<16x16xf32>
      %251 = arith.mulf %246, %250 : vector<16x16xf32>
      %cst_100 = arith.constant dense<0.000000e+00> : vector<16x32xf32>
      %252 = tpu.matmul %251, %239, %cst_100 {dimension_numbers = #tpu.dot_dimension_numbers<[1], [0], [0], [1], [0, 0, 1, 1], [], []>} : vector<16x16xf32>, vector<16x32xf32>, vector<16x32xf32> -> vector<16x32xf32>
      %253 = vector.extract_strided_slice %193 {offsets = [0, 96], sizes = [16, 32], strides = [1, 1]} : vector<16x256xf32> to vector<16x32xf32>
      %254 = vector.extract_strided_slice %200 {offsets = [0, 96], sizes = [16, 32], strides = [1, 1]} : vector<16x256xf32> to vector<16x32xf32>
      %255 = vector.extract_strided_slice %200 {offsets = [0, 96], sizes = [16, 32], strides = [1, 1]} : vector<16x256xf32> to vector<16x32xf32>
      %cst_101 = arith.constant dense<0.000000e+00> : vector<16x16xf32>
      %256 = tpu.matmul %253, %254, %cst_101 {dimension_numbers = #tpu.dot_dimension_numbers<[1], [1], [0], [0], [0, 0, 1, 0], [], []>} : vector<16x32xf32>, vector<16x32xf32>, vector<16x16xf32> -> vector<16x16xf32>
      %257 = arith.addf %256, %18 : vector<16x16xf32>
      %cst_102 = arith.constant dense<0xFF800000> : vector<16xf32>
      %258 = vector.multi_reduction <maximumf>, %257, %cst_102 [1] : vector<16x16xf32> to vector<16xf32>
      %259 = vector.shape_cast %258 : vector<16xf32> to vector<16x1xf32>
      %260 = vector.broadcast %259 : vector<16x1xf32> to vector<16x16xf32>
      %261 = arith.subf %257, %260 : vector<16x16xf32>
      %262 = math.exp %261 : vector<16x16xf32>
      %cst_103 = arith.constant dense<0.000000e+00> : vector<16xf32>
      %263 = vector.multi_reduction <add>, %262, %cst_103 [1] : vector<16x16xf32> to vector<16xf32>
      %264 = vector.shape_cast %263 : vector<16xf32> to vector<16x1xf32>
      %265 = tpu.reciprocal %264 {approx = true} : vector<16x1xf32> -> vector<16x1xf32>
      %266 = vector.broadcast %265 : vector<16x1xf32> to vector<16x16xf32>
      %267 = arith.mulf %262, %266 : vector<16x16xf32>
      %cst_104 = arith.constant dense<0.000000e+00> : vector<16x32xf32>
      %268 = tpu.matmul %267, %255, %cst_104 {dimension_numbers = #tpu.dot_dimension_numbers<[1], [0], [0], [1], [0, 0, 1, 1], [], []>} : vector<16x16xf32>, vector<16x32xf32>, vector<16x32xf32> -> vector<16x32xf32>
      %269 = vector.extract_strided_slice %193 {offsets = [0, 128], sizes = [16, 32], strides = [1, 1]} : vector<16x256xf32> to vector<16x32xf32>
      %270 = vector.extract_strided_slice %200 {offsets = [0, 128], sizes = [16, 32], strides = [1, 1]} : vector<16x256xf32> to vector<16x32xf32>
      %271 = vector.extract_strided_slice %200 {offsets = [0, 128], sizes = [16, 32], strides = [1, 1]} : vector<16x256xf32> to vector<16x32xf32>
      %cst_105 = arith.constant dense<0.000000e+00> : vector<16x16xf32>
      %272 = tpu.matmul %269, %270, %cst_105 {dimension_numbers = #tpu.dot_dimension_numbers<[1], [1], [0], [0], [0, 0, 1, 0], [], []>} : vector<16x32xf32>, vector<16x32xf32>, vector<16x16xf32> -> vector<16x16xf32>
      %273 = arith.addf %272, %18 : vector<16x16xf32>
      %cst_106 = arith.constant dense<0xFF800000> : vector<16xf32>
      %274 = vector.multi_reduction <maximumf>, %273, %cst_106 [1] : vector<16x16xf32> to vector<16xf32>
      %275 = vector.shape_cast %274 : vector<16xf32> to vector<16x1xf32>
      %276 = vector.broadcast %275 : vector<16x1xf32> to vector<16x16xf32>
      %277 = arith.subf %273, %276 : vector<16x16xf32>
      %278 = math.exp %277 : vector<16x16xf32>
      %cst_107 = arith.constant dense<0.000000e+00> : vector<16xf32>
      %279 = vector.multi_reduction <add>, %278, %cst_107 [1] : vector<16x16xf32> to vector<16xf32>
      %280 = vector.shape_cast %279 : vector<16xf32> to vector<16x1xf32>
      %281 = tpu.reciprocal %280 {approx = true} : vector<16x1xf32> -> vector<16x1xf32>
      %282 = vector.broadcast %281 : vector<16x1xf32> to vector<16x16xf32>
      %283 = arith.mulf %278, %282 : vector<16x16xf32>
      %cst_108 = arith.constant dense<0.000000e+00> : vector<16x32xf32>
      %284 = tpu.matmul %283, %271, %cst_108 {dimension_numbers = #tpu.dot_dimension_numbers<[1], [0], [0], [1], [0, 0, 1, 1], [], []>} : vector<16x16xf32>, vector<16x32xf32>, vector<16x32xf32> -> vector<16x32xf32>
      %285 = vector.extract_strided_slice %193 {offsets = [0, 160], sizes = [16, 32], strides = [1, 1]} : vector<16x256xf32> to vector<16x32xf32>
      %286 = vector.extract_strided_slice %200 {offsets = [0, 160], sizes = [16, 32], strides = [1, 1]} : vector<16x256xf32> to vector<16x32xf32>
      %287 = vector.extract_strided_slice %200 {offsets = [0, 160], sizes = [16, 32], strides = [1, 1]} : vector<16x256xf32> to vector<16x32xf32>
      %cst_109 = arith.constant dense<0.000000e+00> : vector<16x16xf32>
      %288 = tpu.matmul %285, %286, %cst_109 {dimension_numbers = #tpu.dot_dimension_numbers<[1], [1], [0], [0], [0, 0, 1, 0], [], []>} : vector<16x32xf32>, vector<16x32xf32>, vector<16x16xf32> -> vector<16x16xf32>
      %289 = arith.addf %288, %18 : vector<16x16xf32>
      %cst_110 = arith.constant dense<0xFF800000> : vector<16xf32>
      %290 = vector.multi_reduction <maximumf>, %289, %cst_110 [1] : vector<16x16xf32> to vector<16xf32>
      %291 = vector.shape_cast %290 : vector<16xf32> to vector<16x1xf32>
      %292 = vector.broadcast %291 : vector<16x1xf32> to vector<16x16xf32>
      %293 = arith.subf %289, %292 : vector<16x16xf32>
      %294 = math.exp %293 : vector<16x16xf32>
      %cst_111 = arith.constant dense<0.000000e+00> : vector<16xf32>
      %295 = vector.multi_reduction <add>, %294, %cst_111 [1] : vector<16x16xf32> to vector<16xf32>
      %296 = vector.shape_cast %295 : vector<16xf32> to vector<16x1xf32>
      %297 = tpu.reciprocal %296 {approx = true} : vector<16x1xf32> -> vector<16x1xf32>
      %298 = vector.broadcast %297 : vector<16x1xf32> to vector<16x16xf32>
      %299 = arith.mulf %294, %298 : vector<16x16xf32>
      %cst_112 = arith.constant dense<0.000000e+00> : vector<16x32xf32>
      %300 = tpu.matmul %299, %287, %cst_112 {dimension_numbers = #tpu.dot_dimension_numbers<[1], [0], [0], [1], [0, 0, 1, 1], [], []>} : vector<16x16xf32>, vector<16x32xf32>, vector<16x32xf32> -> vector<16x32xf32>
      %301 = vector.extract_strided_slice %193 {offsets = [0, 192], sizes = [16, 32], strides = [1, 1]} : vector<16x256xf32> to vector<16x32xf32>
      %302 = vector.extract_strided_slice %200 {offsets = [0, 192], sizes = [16, 32], strides = [1, 1]} : vector<16x256xf32> to vector<16x32xf32>
      %303 = vector.extract_strided_slice %200 {offsets = [0, 192], sizes = [16, 32], strides = [1, 1]} : vector<16x256xf32> to vector<16x32xf32>
      %cst_113 = arith.constant dense<0.000000e+00> : vector<16x16xf32>
      %304 = tpu.matmul %301, %302, %cst_113 {dimension_numbers = #tpu.dot_dimension_numbers<[1], [1], [0], [0], [0, 0, 1, 0], [], []>} : vector<16x32xf32>, vector<16x32xf32>, vector<16x16xf32> -> vector<16x16xf32>
      %305 = arith.addf %304, %18 : vector<16x16xf32>
      %cst_114 = arith.constant dense<0xFF800000> : vector<16xf32>
      %306 = vector.multi_reduction <maximumf>, %305, %cst_114 [1] : vector<16x16xf32> to vector<16xf32>
      %307 = vector.shape_cast %306 : vector<16xf32> to vector<16x1xf32>
      %308 = vector.broadcast %307 : vector<16x1xf32> to vector<16x16xf32>
      %309 = arith.subf %305, %308 : vector<16x16xf32>
      %310 = math.exp %309 : vector<16x16xf32>
      %cst_115 = arith.constant dense<0.000000e+00> : vector<16xf32>
      %311 = vector.multi_reduction <add>, %310, %cst_115 [1] : vector<16x16xf32> to vector<16xf32>
      %312 = vector.shape_cast %311 : vector<16xf32> to vector<16x1xf32>
      %313 = tpu.reciprocal %312 {approx = true} : vector<16x1xf32> -> vector<16x1xf32>
      %314 = vector.broadcast %313 : vector<16x1xf32> to vector<16x16xf32>
      %315 = arith.mulf %310, %314 : vector<16x16xf32>
      %cst_116 = arith.constant dense<0.000000e+00> : vector<16x32xf32>
      %316 = tpu.matmul %315, %303, %cst_116 {dimension_numbers = #tpu.dot_dimension_numbers<[1], [0], [0], [1], [0, 0, 1, 1], [], []>} : vector<16x16xf32>, vector<16x32xf32>, vector<16x32xf32> -> vector<16x32xf32>
      %317 = vector.extract_strided_slice %193 {offsets = [0, 224], sizes = [16, 32], strides = [1, 1]} : vector<16x256xf32> to vector<16x32xf32>
      %318 = vector.extract_strided_slice %200 {offsets = [0, 224], sizes = [16, 32], strides = [1, 1]} : vector<16x256xf32> to vector<16x32xf32>
      %319 = vector.extract_strided_slice %200 {offsets = [0, 224], sizes = [16, 32], strides = [1, 1]} : vector<16x256xf32> to vector<16x32xf32>
      %cst_117 = arith.constant dense<0.000000e+00> : vector<16x16xf32>
      %320 = tpu.matmul %317, %318, %cst_117 {dimension_numbers = #tpu.dot_dimension_numbers<[1], [1], [0], [0], [0, 0, 1, 0], [], []>} : vector<16x32xf32>, vector<16x32xf32>, vector<16x16xf32> -> vector<16x16xf32>
      %321 = arith.addf %320, %18 : vector<16x16xf32>
      %cst_118 = arith.constant dense<0xFF800000> : vector<16xf32>
      %322 = vector.multi_reduction <maximumf>, %321, %cst_118 [1] : vector<16x16xf32> to vector<16xf32>
      %323 = vector.shape_cast %322 : vector<16xf32> to vector<16x1xf32>
      %324 = vector.broadcast %323 : vector<16x1xf32> to vector<16x16xf32>
      %325 = arith.subf %321, %324 : vector<16x16xf32>
      %326 = math.exp %325 : vector<16x16xf32>
      %cst_119 = arith.constant dense<0.000000e+00> : vector<16xf32>
      %327 = vector.multi_reduction <add>, %326, %cst_119 [1] : vector<16x16xf32> to vector<16xf32>
      %328 = vector.shape_cast %327 : vector<16xf32> to vector<16x1xf32>
      %329 = tpu.reciprocal %328 {approx = true} : vector<16x1xf32> -> vector<16x1xf32>
      %330 = vector.broadcast %329 : vector<16x1xf32> to vector<16x16xf32>
      %331 = arith.mulf %326, %330 : vector<16x16xf32>
      %cst_120 = arith.constant dense<0.000000e+00> : vector<16x32xf32>
      %332 = tpu.matmul %331, %319, %cst_120 {dimension_numbers = #tpu.dot_dimension_numbers<[1], [0], [0], [1], [0, 0, 1, 1], [], []>} : vector<16x16xf32>, vector<16x32xf32>, vector<16x32xf32> -> vector<16x32xf32>
      %333 = tpu.concatenate %220, %236, %252, %268, %284, %300, %316, %332 in 1 : vector<16x32xf32>, vector<16x32xf32>, vector<16x32xf32>, vector<16x32xf32>, vector<16x32xf32>, vector<16x32xf32>, vector<16x32xf32>, vector<16x32xf32> -> vector<16x256xf32>
      %334 = arith.truncf %333 : vector<16x256xf32> to vector<16x256xbf16>
      %cst_121 = arith.constant dense<0.000000e+00> : vector<16x256xf32>
      %335 = tpu.matmul %334, %202, %cst_121 {dimension_numbers = #tpu.dot_dimension_numbers<[1], [0], [0], [1], [0, 0, 1, 1], [], []>} : vector<16x256xbf16>, vector<256x256xbf16>, vector<16x256xf32> -> vector<16x256xf32>
      %336 = vector.broadcast %204 : vector<1x256xf32> to vector<16x256xf32>
      %337 = arith.addf %335, %336 : vector<16x256xf32>
      %338 = arith.index_cast %arg0 : i32 to index
      %c0_122 = arith.constant 0 : index
      %c0_123 = arith.constant 0 : index
      %339 = vector.load %arg26[%338, %c0_122, %c0_123] : memref<4x16x256xf32, #tpu.memory_space<vmem>>, vector<1x16x256xf32>
      %340 = vector.shape_cast %339 : vector<1x16x256xf32> to vector<16x256xf32>
      %341 = vector.shape_cast %337 : vector<16x256xf32> to vector<1x16x256xf32>
      tpu.vector_store %arg26[%338, %c0_122, %c0_123], %341 {strides = array<i32>} : memref<4x16x256xf32, #tpu.memory_space<vmem>>, vector<1x16x256xf32>,
      %c0_124 = arith.constant 0 : index
      %c0_125 = arith.constant 0 : index
      %342 = vector.load %arg25[%c0_124, %c0_125] : memref<16x256xf32, #tpu.memory_space<vmem>>, vector<16x256xf32>
      tpu.vector_store %arg25[%c0_124, %c0_125], %337 {strides = array<i32>} : memref<16x256xf32, #tpu.memory_space<vmem>>, vector<16x256xf32>,
    } else {
    }
    %c4_i32_3 = arith.constant 4 : i32
    %7 = arith.cmpi eq, %arg0, %c4_i32_3 : i32
    %8 = arith.extui %7 : i1 to i32
    %c0_i32_4 = arith.constant 0 : i32
    %9 = arith.cmpi ne, %8, %c0_i32_4 : i32
    scf.if %9 {
      %c0_8 = arith.constant 0 : index
      %c0_9 = arith.constant 0 : index
      %16 = vector.load %arg25[%c0_8, %c0_9] : memref<16x256xf32, #tpu.memory_space<vmem>>, vector<16x256xf32>
      %17 = arith.truncf %16 : vector<16x256xf32> to vector<16x256xbf16>
      %c0_10 = arith.constant 0 : index
      %c0_11 = arith.constant 0 : index
      %c0_12 = arith.constant 0 : index
      %18 = vector.load %arg12[%c0_10, %c0_11, %c0_12] : memref<1x256x256xbf16, #tpu.memory_space<vmem>>, vector<1x256x256xbf16>
      %19 = vector.shape_cast %18 : vector<1x256x256xbf16> to vector<256x256xbf16>
      %cst = arith.constant dense<0.000000e+00> : vector<16x256xf32>
      %20 = tpu.matmul %17, %19, %cst {dimension_numbers = #tpu.dot_dimension_numbers<[1], [0], [0], [1], [0, 0, 1, 1], [], []>} : vector<16x256xbf16>, vector<256x256xbf16>, vector<16x256xf32> -> vector<16x256xf32>
      %c0_13 = arith.constant 0 : index
      %c0_14 = arith.constant 0 : index
      %c0_15 = arith.constant 0 : index
      %21 = vector.load %arg13[%c0_13, %c0_14, %c0_15] : memref<1x1x256xf32, #tpu.memory_space<vmem>>, vector<1x1x256xf32>
      %22 = vector.shape_cast %21 : vector<1x1x256xf32> to vector<1x256xf32>
      %23 = vector.broadcast %22 : vector<1x256xf32> to vector<16x256xf32>
      %24 = arith.addf %20, %23 : vector<16x256xf32>
      %c0_16 = arith.constant 0 : index
      %c0_17 = arith.constant 0 : index
      %c0_18 = arith.constant 0 : index
      %25 = vector.load %arg14[%c0_16, %c0_17, %c0_18] : memref<1x1x256xf32, #tpu.memory_space<vmem>>, vector<1x1x256xf32>
      %26 = vector.shape_cast %25 : vector<1x1x256xf32> to vector<1x256xf32>
      %27 = vector.broadcast %0 : vector<16x1xf32> to vector<16x256xf32>
      %28 = vector.broadcast %26 : vector<1x256xf32> to vector<16x256xf32>
      %29 = arith.mulf %27, %28 : vector<16x256xf32>
      %30 = arith.addf %24, %29 : vector<16x256xf32>
      %31 = arith.negf %30 : vector<16x256xf32>
      %32 = math.exp %31 : vector<16x256xf32>
      %cst_19 = arith.constant 1.000000e+00 : f32
      %33 = vector.broadcast %cst_19 : f32 to vector<16x256xf32>
      %34 = arith.addf %33, %32 : vector<16x256xf32>
      %35 = arith.divf %33, %34 : vector<16x256xf32>
      %36 = arith.mulf %30, %35 : vector<16x256xf32>
      %37 = arith.addf %16, %36 : vector<16x256xf32>
      %c0_20 = arith.constant 0 : index
      %c0_21 = arith.constant 0 : index
      %38 = vector.load %arg25[%c0_20, %c0_21] : memref<16x256xf32, #tpu.memory_space<vmem>>, vector<16x256xf32>
      tpu.vector_store %arg25[%c0_20, %c0_21], %37 {strides = array<i32>} : memref<16x256xf32, #tpu.memory_space<vmem>>, vector<16x256xf32>,
    } else {
    }
    %c4_i32_5 = arith.constant 4 : i32
    %10 = arith.cmpi sgt, %arg0, %c4_i32_5 : i32
    %11 = arith.extui %10 : i1 to i32
    %c0_i32_6 = arith.constant 0 : i32
    %12 = arith.cmpi ne, %11, %c0_i32_6 : i32
    scf.if %12 {
      %c0_8 = arith.constant 0 : index
      %c0_9 = arith.constant 0 : index
      %16 = vector.load %arg25[%c0_8, %c0_9] : memref<16x256xf32, #tpu.memory_space<vmem>>, vector<16x256xf32>
      %c8_i32_10 = arith.constant 8 : i32
      %17 = arith.subi %c8_i32_10, %arg0 : i32
      %18 = arith.index_cast %17 : i32 to index
      %c0_11 = arith.constant 0 : index
      %c0_12 = arith.constant 0 : index
      %19 = vector.load %arg26[%18, %c0_11, %c0_12] : memref<4x16x256xf32, #tpu.memory_space<vmem>>, vector<1x16x256xf32>
      %20 = vector.shape_cast %19 : vector<1x16x256xf32> to vector<16x256xf32>
      %21 = tpu.concatenate %16, %20 in 1 : vector<16x256xf32>, vector<16x256xf32> -> vector<16x512xf32>
      %22 = arith.truncf %21 : vector<16x512xf32> to vector<16x512xbf16>
      %c0_13 = arith.constant 0 : index
      %c0_14 = arith.constant 0 : index
      %c0_15 = arith.constant 0 : index
      %23 = vector.load %arg9[%c0_13, %c0_14, %c0_15] : memref<1x512x256xbf16, #tpu.memory_space<vmem>>, vector<1x512x256xbf16>
      %24 = vector.shape_cast %23 : vector<1x512x256xbf16> to vector<512x256xbf16>
      %cst = arith.constant dense<0.000000e+00> : vector<16x256xf32>
      %25 = tpu.matmul %22, %24, %cst {dimension_numbers = #tpu.dot_dimension_numbers<[1], [0], [0], [1], [0, 0, 1, 1], [], []>} : vector<16x512xbf16>, vector<512x256xbf16>, vector<16x256xf32> -> vector<16x256xf32>
      %c0_16 = arith.constant 0 : index
      %c0_17 = arith.constant 0 : index
      %c0_18 = arith.constant 0 : index
      %26 = vector.load %arg10[%c0_16, %c0_17, %c0_18] : memref<1x1x256xf32, #tpu.memory_space<vmem>>, vector<1x1x256xf32>
      %27 = vector.shape_cast %26 : vector<1x1x256xf32> to vector<1x256xf32>
      %28 = vector.broadcast %27 : vector<1x256xf32> to vector<16x256xf32>
      %29 = arith.addf %25, %28 : vector<16x256xf32>
      %c0_19 = arith.constant 0 : index
      %c0_20 = arith.constant 0 : index
      %c0_21 = arith.constant 0 : index
      %30 = vector.load %arg11[%c0_19, %c0_20, %c0_21] : memref<1x1x256xf32, #tpu.memory_space<vmem>>, vector<1x1x256xf32>
      %31 = vector.shape_cast %30 : vector<1x1x256xf32> to vector<1x256xf32>
      %32 = vector.broadcast %0 : vector<16x1xf32> to vector<16x256xf32>
      %33 = vector.broadcast %31 : vector<1x256xf32> to vector<16x256xf32>
      %34 = arith.mulf %32, %33 : vector<16x256xf32>
      %35 = arith.addf %29, %34 : vector<16x256xf32>
      %36 = arith.negf %35 : vector<16x256xf32>
      %37 = math.exp %36 : vector<16x256xf32>
      %cst_22 = arith.constant 1.000000e+00 : f32
      %38 = vector.broadcast %cst_22 : f32 to vector<16x256xf32>
      %39 = arith.addf %38, %37 : vector<16x256xf32>
      %40 = arith.divf %38, %39 : vector<16x256xf32>
      %41 = arith.mulf %35, %40 : vector<16x256xf32>
      %42 = arith.addf %16, %41 : vector<16x256xf32>
      %c0_23 = arith.constant 0 : index
      %c0_24 = arith.constant 0 : index
      %43 = vector.load %arg25[%c0_23, %c0_24] : memref<16x256xf32, #tpu.memory_space<vmem>>, vector<16x256xf32>
      tpu.vector_store %arg25[%c0_23, %c0_24], %42 {strides = array<i32>} : memref<16x256xf32, #tpu.memory_space<vmem>>, vector<16x256xf32>,
    } else {
    }
    %c8_i32 = arith.constant 8 : i32
    %13 = arith.cmpi eq, %arg0, %c8_i32 : i32
    %14 = arith.extui %13 : i1 to i32
    %c0_i32_7 = arith.constant 0 : i32
    %15 = arith.cmpi ne, %14, %c0_i32_7 : i32
    scf.if %15 {
      %c0_8 = arith.constant 0 : index
      %c0_9 = arith.constant 0 : index
      %16 = vector.load %arg25[%c0_8, %c0_9] : memref<16x256xf32, #tpu.memory_space<vmem>>, vector<16x256xf32>
      %c0_10 = arith.constant 0 : index
      %c0_11 = arith.constant 0 : index
      %17 = vector.load %arg24[%c0_10, %c0_11] : memref<16x256xf32, #tpu.memory_space<vmem>>, vector<16x256xf32>
      tpu.vector_store %arg24[%c0_10, %c0_11], %16 {strides = array<i32>} : memref<16x256xf32, #tpu.memory_space<vmem>>, vector<16x256xf32>,
    } else {
    }
    return
  }
  func.func @transform_0(%arg0: i32) -> (i32, i32) {
    %c0_i32 = arith.constant 0 : i32
    %c0_i32_0 = arith.constant 0 : i32
    %c0_i32_1 = arith.constant 0 : i32
    return %c0_i32, %c0_i32_0 : i32, i32
  }
  func.func @transform_1(%arg0: i32) -> (i32, i32) {
    %c0_i32 = arith.constant 0 : i32
    %c0_i32_0 = arith.constant 0 : i32
    %c0_i32_1 = arith.constant 0 : i32
    return %c0_i32, %c0_i32_0 : i32, i32
  }
  func.func @transform_2(%arg0: i32) -> (i32, i32) {
    %c0_i32 = arith.constant 0 : i32
    %c0_i32_0 = arith.constant 0 : i32
    %c0_i32_1 = arith.constant 0 : i32
    return %c0_i32, %c0_i32_0 : i32, i32
  }
  func.func @transform_3(%arg0: i32) -> (i32, i32) {
    %c0_i32 = arith.constant 0 : i32
    %c0_i32_0 = arith.constant 0 : i32
    %c0_i32_1 = arith.constant 0 : i32
    return %c0_i32, %c0_i32_0 : i32, i32
  }
  func.func @transform_4(%arg0: i32) -> (i32, i32) {
    %c0_i32 = arith.constant 0 : i32
    %c0_i32_0 = arith.constant 0 : i32
    %c0_i32_1 = arith.constant 0 : i32
    return %c0_i32, %c0_i32_0 : i32, i32
  }
  func.func @transform_5(%arg0: i32) -> (i32, i32, i32) {
    %c3_i32 = arith.constant 3 : i32
    %0 = arith.minsi %arg0, %c3_i32 : i32
    %c0_i32 = arith.constant 0 : i32
    %c0_i32_0 = arith.constant 0 : i32
    %c0_i32_1 = arith.constant 0 : i32
    return %0, %c0_i32, %c0_i32_0 : i32, i32, i32
  }
  func.func @transform_6(%arg0: i32) -> (i32, i32, i32) {
    %c3_i32 = arith.constant 3 : i32
    %0 = arith.minsi %arg0, %c3_i32 : i32
    %c0_i32 = arith.constant 0 : i32
    %c0_i32_0 = arith.constant 0 : i32
    %c0_i32_1 = arith.constant 0 : i32
    return %0, %c0_i32, %c0_i32_0 : i32, i32, i32
  }
  func.func @transform_7(%arg0: i32) -> (i32, i32, i32) {
    %c3_i32 = arith.constant 3 : i32
    %0 = arith.minsi %arg0, %c3_i32 : i32
    %c0_i32 = arith.constant 0 : i32
    %c0_i32_0 = arith.constant 0 : i32
    %c0_i32_1 = arith.constant 0 : i32
    return %0, %c0_i32, %c0_i32_0 : i32, i32, i32
  }
  func.func @transform_8(%arg0: i32) -> (i32, i32, i32) {
    %c4_i32 = arith.constant 4 : i32
    %0 = arith.subi %arg0, %c4_i32 : i32
    %c1_i32 = arith.constant 1 : i32
    %1 = arith.subi %0, %c1_i32 : i32
    %c0_i32 = arith.constant 0 : i32
    %2 = arith.maxsi %1, %c0_i32 : i32
    %c0_i32_0 = arith.constant 0 : i32
    %c0_i32_1 = arith.constant 0 : i32
    %c0_i32_2 = arith.constant 0 : i32
    return %2, %c0_i32_0, %c0_i32_1 : i32, i32, i32
  }
  func.func @transform_9(%arg0: i32) -> (i32, i32, i32) {
    %c4_i32 = arith.constant 4 : i32
    %0 = arith.subi %arg0, %c4_i32 : i32
    %c1_i32 = arith.constant 1 : i32
    %1 = arith.subi %0, %c1_i32 : i32
    %c0_i32 = arith.constant 0 : i32
    %2 = arith.maxsi %1, %c0_i32 : i32
    %c0_i32_0 = arith.constant 0 : i32
    %c0_i32_1 = arith.constant 0 : i32
    %c0_i32_2 = arith.constant 0 : i32
    return %2, %c0_i32_0, %c0_i32_1 : i32, i32, i32
  }
  func.func @transform_10(%arg0: i32) -> (i32, i32, i32) {
    %c4_i32 = arith.constant 4 : i32
    %0 = arith.subi %arg0, %c4_i32 : i32
    %c1_i32 = arith.constant 1 : i32
    %1 = arith.subi %0, %c1_i32 : i32
    %c0_i32 = arith.constant 0 : i32
    %2 = arith.maxsi %1, %c0_i32 : i32
    %c0_i32_0 = arith.constant 0 : i32
    %c0_i32_1 = arith.constant 0 : i32
    %c0_i32_2 = arith.constant 0 : i32
    return %2, %c0_i32_0, %c0_i32_1 : i32, i32, i32
  }
  func.func @transform_11(%arg0: i32) -> (i32, i32, i32) {
    %c0_i32 = arith.constant 0 : i32
    %c0_i32_0 = arith.constant 0 : i32
    %c0_i32_1 = arith.constant 0 : i32
    %c0_i32_2 = arith.constant 0 : i32
    return %c0_i32, %c0_i32_0, %c0_i32_1 : i32, i32, i32
  }
  func.func @transform_12(%arg0: i32) -> (i32, i32, i32) {
    %c0_i32 = arith.constant 0 : i32
    %c0_i32_0 = arith.constant 0 : i32
    %c0_i32_1 = arith.constant 0 : i32
    %c0_i32_2 = arith.constant 0 : i32
    return %c0_i32, %c0_i32_0, %c0_i32_1 : i32, i32, i32
  }
  func.func @transform_13(%arg0: i32) -> (i32, i32, i32) {
    %c0_i32 = arith.constant 0 : i32
    %c0_i32_0 = arith.constant 0 : i32
    %c0_i32_1 = arith.constant 0 : i32
    %c0_i32_2 = arith.constant 0 : i32
    return %c0_i32, %c0_i32_0, %c0_i32_1 : i32, i32, i32
  }
  func.func @transform_14(%arg0: i32) -> (i32, i32, i32) {
    %c3_i32 = arith.constant 3 : i32
    %0 = arith.minsi %arg0, %c3_i32 : i32
    %c0_i32 = arith.constant 0 : i32
    %c0_i32_0 = arith.constant 0 : i32
    %c0_i32_1 = arith.constant 0 : i32
    return %0, %c0_i32, %c0_i32_0 : i32, i32, i32
  }
  func.func @transform_15(%arg0: i32) -> (i32, i32, i32) {
    %c3_i32 = arith.constant 3 : i32
    %0 = arith.minsi %arg0, %c3_i32 : i32
    %c0_i32 = arith.constant 0 : i32
    %c0_i32_0 = arith.constant 0 : i32
    %c0_i32_1 = arith.constant 0 : i32
    return %0, %c0_i32, %c0_i32_0 : i32, i32, i32
  }
  func.func @transform_16(%arg0: i32) -> (i32, i32, i32) {
    %c3_i32 = arith.constant 3 : i32
    %0 = arith.minsi %arg0, %c3_i32 : i32
    %c0_i32 = arith.constant 0 : i32
    %c0_i32_0 = arith.constant 0 : i32
    %c0_i32_1 = arith.constant 0 : i32
    return %0, %c0_i32, %c0_i32_0 : i32, i32, i32
  }
  func.func @transform_17(%arg0: i32) -> (i32, i32, i32) {
    %c3_i32 = arith.constant 3 : i32
    %0 = arith.minsi %arg0, %c3_i32 : i32
    %c0_i32 = arith.constant 0 : i32
    %c0_i32_0 = arith.constant 0 : i32
    %c0_i32_1 = arith.constant 0 : i32
    return %0, %c0_i32, %c0_i32_0 : i32, i32, i32
  }
  func.func @transform_18(%arg0: i32) -> (i32, i32, i32) {
    %c3_i32 = arith.constant 3 : i32
    %0 = arith.minsi %arg0, %c3_i32 : i32
    %c0_i32 = arith.constant 0 : i32
    %c0_i32_0 = arith.constant 0 : i32
    %c0_i32_1 = arith.constant 0 : i32
    return %0, %c0_i32, %c0_i32_0 : i32, i32, i32
  }
  func.func @transform_19(%arg0: i32) -> (i32, i32, i32) {
    %c3_i32 = arith.constant 3 : i32
    %0 = arith.minsi %arg0, %c3_i32 : i32
    %c0_i32 = arith.constant 0 : i32
    %c0_i32_0 = arith.constant 0 : i32
    %c0_i32_1 = arith.constant 0 : i32
    return %0, %c0_i32, %c0_i32_0 : i32, i32, i32
  }
  func.func @transform_20(%arg0: i32) -> (i32, i32, i32) {
    %c3_i32 = arith.constant 3 : i32
    %0 = arith.minsi %arg0, %c3_i32 : i32
    %c0_i32 = arith.constant 0 : i32
    %c0_i32_0 = arith.constant 0 : i32
    %c0_i32_1 = arith.constant 0 : i32
    return %0, %c0_i32, %c0_i32_0 : i32, i32, i32
  }
  func.func @transform_21(%arg0: i32) -> (i32, i32, i32) {
    %c3_i32 = arith.constant 3 : i32
    %0 = arith.minsi %arg0, %c3_i32 : i32
    %c0_i32 = arith.constant 0 : i32
    %c0_i32_0 = arith.constant 0 : i32
    %c0_i32_1 = arith.constant 0 : i32
    return %0, %c0_i32, %c0_i32_0 : i32, i32, i32
  }
  func.func @transform_22(%arg0: i32) -> (i32, i32, i32) {
    %c3_i32 = arith.constant 3 : i32
    %0 = arith.minsi %arg0, %c3_i32 : i32
    %c0_i32 = arith.constant 0 : i32
    %c0_i32_0 = arith.constant 0 : i32
    %c0_i32_1 = arith.constant 0 : i32
    return %0, %c0_i32, %c0_i32_0 : i32, i32, i32
  }
  func.func @transform_23(%arg0: i32) -> (i32, i32) {
    %c0_i32 = arith.constant 0 : i32
    %c0_i32_0 = arith.constant 0 : i32
    %c0_i32_1 = arith.constant 0 : i32
    return %c0_i32, %c0_i32_0 : i32, i32
  }
}

</mosaic_0001>

<bundles_post_ra>
// kernel: _lambda_.1
= control target key start
LH: loop header
LB: loop body
LE: loop exit
PB: predicated region body
PF: predicated region fallthrough
CT: control target
= control target key end

     0   :  { %s12075_s0 = inlined_call_operand.vmem [shape: f32[16,256], index: 0, kind: input, shape index: {}]   ;;  %s12076_s1 = inlined_call_operand.vmem [shape: f32[16,1], index: 1, kind: input, shape index: {}]   ;;  %s12077_s2 = inlined_call_operand.vmem [shape: f32[16,64], index: 2, kind: input, shape index: {}]   ;;  %s12078_s3 = inlined_call_operand.vmem [shape: f32[16,16], index: 3, kind: input, shape index: {}]   ;;  %s12079_s4 = inlined_call_operand.vmem [shape: f32[16,16], index: 4, kind: input, shape index: {}]   ;;  %s12080_s5 = inlined_call_operand.hbm [shape: bf16[4,256,256], index: 5, kind: input, shape index: {}]   ;;  %s12081_s6 = inlined_call_operand.hbm [shape: f32[4,1,256], index: 6, kind: input, shape index: {}]   ;;  %s12082_s7 = inlined_call_operand.hbm [shape: f32[4,1,256], index: 7, kind: input, shape index: {}]   ;;  %s12083_s8 = inlined_call_operand.hbm [shape: bf16[4,512,256], index: 8, kind: input, shape index: {}]   ;;  %s12084_s9 = inlined_call_operand.hbm [shape: f32[4,1,256], index: 9, kind: input, shape index: {}]   ;;  %s12085_s10 = inlined_call_operand.hbm [shape: f32[4,1,256], index: 10, kind: input, shape index: {}]   ;;  %s12086_s11 = inlined_call_operand.hbm [shape: bf16[1,256,256], index: 11, kind: input, shape index: {}]   ;;  %s12087_s12 = inlined_call_operand.hbm [shape: f32[1,1,256], index: 12, kind: input, shape index: {}]   ;;  %s12088_s13 = inlined_call_operand.hbm [shape: f32[1,1,256], index: 13, kind: input, shape index: {}]   ;;  %s12089_s14 = inlined_call_operand.hbm [shape: bf16[4,256,768], index: 14, kind: input, shape index: {}]   ;;  %s12090_s15 = inlined_call_operand.hbm [shape: bf16[4,256,256], index: 15, kind: input, shape index: {}]   ;;  %s12091_s16 = inlined_call_operand.hbm [shape: f32[4,1,256], index: 16, kind: input, shape index: {}]   ;;  %s12092_s17 = inlined_call_operand.hbm [shape: bf16[4,256,256], index: 17, kind: input, shape index: {}]   ;;  %s12093_s18 = inlined_call_operand.hbm [shape: f32[4,1,256], index: 18, kind: input, shape index: {}]   ;;  %s12094_s19 = inlined_call_operand.hbm [shape: bf16[4,64,256], index: 19, kind: input, shape index: {}]   ;;  %s12095_s20 = inlined_call_operand.hbm [shape: f32[4,1,256], index: 20, kind: input, shape index: {}]   ;;  %s12096_s21 = inlined_call_operand.hbm [shape: bf16[4,256,256], index: 21, kind: input, shape index: {}]   ;;  %s12097_s22 = inlined_call_operand.hbm [shape: f32[4,1,256], index: 22, kind: input, shape index: {}]   ;;  %s12098_s23 = inlined_call_operand.vmem [shape: f32[16,256], index: 23, kind: output, shape index: {}]  }
   0x1   :  { %12143 = sst [smem:[#allocation53_spill]] %s12075_s0 }
   0x2   :  { %12144 = sst [smem:[#allocation54_spill]] %s12076_s1 }
   0x3   :  { %12145 = sst [smem:[#allocation55_spill]] %s12077_s2 }
   0x4   :  { %12146 = sst [smem:[#allocation56_spill]] %s12078_s3 }
   0x5   :  { %12147 = sst [smem:[#allocation57_spill]] %s12079_s4 }
   0x6   :  { %12148 = sst [smem:[#allocation58_spill]] %s12080_s5 }
   0x7   :  { %12149 = sst [smem:[#allocation59_spill]] %s12081_s6 }
   0x8   :  { %12150 = sst [smem:[#allocation60_spill]] %s12082_s7 }
   0x9   :  { %12151 = sst [smem:[#allocation61_spill]] %s12083_s8 }
   0xa   :  { %12152 = sst [smem:[#allocation62_spill]] %s12086_s11 }
   0xb   :  { %12153 = sst [smem:[#allocation63_spill]] %s12087_s12 }
   0xc   :  { %12154 = sst [smem:[#allocation64_spill]] %s12088_s13 }
   0xd   :  { %12155 = sst [smem:[#allocation65_spill]] %s12089_s14 }
   0xe   :  { %12156 = sst [smem:[#allocation66_spill]] %s12091_s16 }
   0xf   :  { %12157 = sst [smem:[#allocation67_spill]] %s12092_s17 }
  0x10   :  { %12158 = sst [smem:[#allocation68_spill]] %s12093_s18 }
  0x11   :  { %12159 = sst [smem:[#allocation69_spill]] %s12094_s19 }
  0x12   :  { %12160 = sst [smem:[#allocation70_spill]] %s12095_s20 }
  0x13   :  { %12161 = sst [smem:[#allocation71_spill]] %s12096_s21 }
  0x14   :  { %12162 = sst [smem:[#allocation72_spill]] %s12097_s22 }
  0x15   :  { %12163 = sst [smem:[#allocation73_spill]] %s12098_s23 }
  0x16   :  { %28 = vsyncpa [#allocation5], 0 }
  0x17   :  { %30 = vsyncpa [#allocation5 + $0x1], 0 }
  0x18   :  { %31 = vsyncpa [#allocation7], 0 }
  0x19   :  { %33 = vsyncpa [#allocation7 + $0x1], 0 }
  0x1a   :  { %34 = vsyncpa [#allocation10], 0 }
  0x1b   :  { %36 = vsyncpa [#allocation10 + $0x1], 0 }
  0x1c   :  { %37 = vsyncpa [#allocation13], 0 }
  0x1d   :  { %39 = vsyncpa [#allocation13 + $0x1], 0 }
  0x1e   :  { %40 = vsyncpa [#allocation16], 0 }
  0x1f   :  { %41 = vsyncpa [#allocation19], 0 }
  0x20   :  { %43 = vsyncpa [#allocation19 + $0x1], 0 }
  0x21   :  { %44 = vsyncpa [#allocation22], 0 }
  0x22   :  { %46 = vsyncpa [#allocation22 + $0x1], 0 }
  0x23   :  { %47 = vsyncpa [#allocation25], 0 }
  0x24   :  { %49 = vsyncpa [#allocation25 + $0x1], 0 }
  0x25   :  { %50 = vsyncpa [#allocation28], 0 }
  0x26   :  { %52 = vsyncpa [#allocation28 + $0x1], 0 }
  0x27   :  { %53 = vsyncpa [#allocation31], 0 }
  0x28   :  { %55 = vsyncpa [#allocation31 + $0x1], 0  ;;  %s10340_s4 = smov 0   ;;  %s10342_s30 = smov 0  }
  0x29   :  { %s10344_s24 = smov 0   ;;  %s10346_s25 = smov 0  }
  0x2a   :  { %s10348_s5 = smov 0   ;;  %s10350_s1 = smov 0  }
  0x2b   :  { %s10352_s26 = smov 0  }
  0x2c LB: > { %12164 = sst [smem:[#allocation43_spill]] %s10168_s30  ;;  %s10374_s2 = sadd.s32 4294967295, %s10188_s26   ;;  %s10188_s26 = sphi %s10352_s26, %s12243_s26   ;;  %s10184_s1 = sphi %s10350_s1, %s12248_s1   ;;  %s10180_s5 = sphi %s10348_s5, %s12247_s5   ;;  %s10176_s25 = sphi %s10346_s25, %s12251_s25   ;;  %s10172_s24 = sphi %s10344_s24, %s12250_s24   ;;  %s10168_s30 = sphi %s10342_s30, %s12249_s30   ;;  %s10164_s4 = sphi %s10340_s4, %s12244_s4  }
  0x2d   : > { %12165 = sst [smem:[#allocation44_spill]] %s10180_s5  ;;  %s10377_s6 = sadd.s32 1, %s10188_s26  }
  0x2e   : > { %12166 = sst [smem:[#allocation45_spill]] %s10184_s1  ;;  %p170_p0 = scmp.lt.s32.totalorder %s10188_s26, 3 }
  0x2f   : > { %12167 = sst [smem:[#allocation46_spill]] %s10374_s2  ;;  %p172_p1 = scmp.lt.s32.totalorder %s10377_s6, 3 }
  0x30   : > { %12168 = sst [smem:[#allocation47_spill]] %s10377_s6  ;;  %s177_s27 = sadd.s32 1, %s10184_s1 }
  0x31   : > { %p184_p2 = scmp.ne.s32.totalorder %s10184_s1, %s10180_s5  ;;  %p185_p3 = scmp.eq.s32.totalorder %s10188_s26, 0 }
  0x32   : > { %s10385_s7 = scalar_select %p170_p0, %s10188_s26, 3 }
  0x33   : > { %s173_s28 = scalar_select %p172_p1, %s10377_s6, 3 }
  0x34   : > { %p190_p4 = scmp.ne.s32.totalorder %s10180_s5, %s10176_s25  ;;  %p12117_p5 = scmp.eq.s32.totalorder %s10374_s2, 0 }
  0x35   : > { %s174_s29 = ssub.s32 %s10385_s7, %s173_s28  ;;  %p10394_p7 = por %p185_p3, %p184_p2 }
  0x36   : > { %p175_p6 = scmp.eq.s32.totalorder %s174_s29, 0  ;;  %p10400_p8 = por %p12117_p5, %p190_p4 }
  0x37   : > { %s12169_s3 = scalar_select %p10394_p7, 1, 0 }
  0x38   : > { %s12170_s0 = scalar_select %p10400_p8, 1, 0 }
  0x39   : > { %s7868_s23 = sadd.s32 4294967291, %s10188_s26  ;;  %s7869_s28 = sadd.s32 4294967291, %s10377_s6 }
  0x3a   : > { %12171 = sst [smem:[#allocation48_spill]] %s12170_s0  ;;  %p261_p9 = scmp.gt.s32.totalorder %s7868_s23, 0 }
  0x3b   : > { %s10406_s25 = scalar_select %p175_p6, %s10184_s1, %s177_s27  }
  0x3c   : > { %p264_p10 = scmp.gt.s32.totalorder %s7869_s28, 0  ;;  %s269_s29 = sadd.s32 1, %s10172_s24 }
  0x3d   : > { %12172 = sst [smem:[#allocation49_spill]] %s10406_s25  ;;  %s12253_s23 = smov (!%p261_p9, %s7868_s23), 0 }
  0x3e   : > { %s12255_s28 = smov (!%p264_p10, %s7869_s28), 0  ;;  %p276_p11 = scmp.ne.s32.totalorder %s10172_s24, %s10168_s30 }
  0x3f   : > { %p282_p12 = scmp.ne.s32.totalorder %s10168_s30, %s10164_s4  ;;  %s266_s5 = ssub.s32 %s12253_s23, %s12255_s28 }
  0x40   : > { %p7874_p13 = scmp.ge.s32.totalorder %s10188_s26, 1  ;;  %p267_p0 = scmp.eq.s32.totalorder %s266_s5, 0 }
  0x41   : > { %p10420_p1 = por %p276_p11, %p185_p3  ;;  %p10426_p2 = por %p282_p12, %p12117_p5 }
  0x42   : > { %p711_p4 = scmp.lt.s32.totalorder %s10188_s26, 10  ;;  %s10190_s4 = smov [#allocation15]  }
  0x43   : > { %s12173_s0 = scalar_select %p10420_p1, 1, 0 }
  0x44   : > { %s12174_s27 = scalar_select %p10426_p2, 1, 0 }
  0x45   : > { %s10432_s25 = scalar_select %p267_p0, %s10172_s24, %s269_s29  }
  0x46   : > { %12175 = sst [smem:[#allocation50_spill]] %s12174_s27  ;;  %p10434_p6 = pnand %p7874_p13, %p711_p4 }
  0x47   : > { %12176 = sst [smem:[#allocation51_spill]] %s10432_s25  ;;  %s752_s5 = sshll.u32 %s10190_s4, 4  ;;  %s753_s5 = int_to_ptr.vmem [resolvable:$true] %s752_s5 }
  0x48   : > { %s12177_s6 = scalar_select %p10434_p6, 1, 0 }
  0x49   : > { %p8804_p10 = pneg %p10434_p6  ;;  %s10191_s28 = smov [#allocation14]  }
  0x4a   : > { %12178 = sst [smem:[#allocation52_spill]] %s12177_s6  ;;  %s738_s30 = sshll.u32 %s10191_s28, 4  ;;  %s739_s30 = int_to_ptr.vmem [resolvable:$true] %s738_s30 }
  0x4b   : > { %p10443_p3 = pnand %p8804_p10, %p12117_p5  ;;  %s9633_s29 = scalar_lea.vmem %s753_s5, 32 }
  0x4c   : > { %p9634_p12 = scmp.ne.s32.totalorder %s753_s5, %s9633_s29  ;;  %p9641_p4 = scmp.lt.s32.totalorder %s753_s5, %s753_s5 }
  0x4d   : > { %p9624_p11 = pneg %p10443_p3  ;;  %p9642_p9 = scmp.lt.s32.totalorder %s9633_s29, %s9633_s29 }
  0x4f   : > { %p9636_p13 = pnand %p9634_p12, %p9624_p11  ;;  %p9643_p2 = por %p9642_p9, %p9641_p4 }
  0x51   : > { %p9637_p0 = pneg %p9636_p13 }
  0x53   : > { %p9644_p8 = pnand %p9643_p2, %p9637_p0 }
  0x55   : > { %9647 = shalt.err (!%p9644_p8)
}
  0x56   : > { %s12180_s12 = sld [smem:[#allocation63_spill]]  ;;  %s9659_s25 = scalar_lea.vmem %s739_s30, 4096 }
  0x57   : > { %p9660_p10 = scmp.ne.s32.totalorder %s739_s30, %s9659_s25  ;;  %p9667_p12 = scmp.lt.s32.totalorder %s739_s30, %s739_s30 }
  0x58   : > { %p9668_p13 = scmp.lt.s32.totalorder %s9659_s25, %s9659_s25 }
  0x59   : > { %p9662_p5 = pnand %p9660_p10, %p9624_p11 }
  0x5a   : > { %p9669_p1 = por %p9668_p13, %p9667_p12 }
  0x5b   : > { %p9663_p6 = pneg %p9662_p5 }
  0x5c   : > { %8810 = dma.hbm_to_vmem [thread:$0]  (!%p10443_p3), %s12180_s12, 32, %s753_s5, [#allocation16]  }
  0x5d   : > { %p9670_p7 = pnand %p9669_p1, %p9663_p6 }
  0x5f   : > { %9673 = shalt.err (!%p9670_p7)
}
  0x60   : > { %s10192_s29 = smov 128   ;;  %s10193_s27 = smov 8  }
  0x61   : > { %s12181_s11 = sld [smem:[#allocation62_spill]]  ;;  %s10194_s5 = smov [#allocation17]  }
  0x62   : > { %s763_s28 = sshll.u32 %s10194_s5, 4  ;;  %s764_s28 = int_to_ptr.vmem [resolvable:$true] %s763_s28 }
  0x63   : > { %s9685_s12 = scalar_lea.vmem %s764_s28, 32  ;;  %p9693_p1 = scmp.lt.s32.totalorder %s764_s28, %s764_s28 }
  0x64   : > { %p9686_p8 = scmp.ne.s32.totalorder %s764_s28, %s9685_s12  ;;  %p9694_p7 = scmp.lt.s32.totalorder %s9685_s12, %s9685_s12 }
  0x66   : > { %p9688_p5 = pnand %p9686_p8, %p9624_p11  ;;  %p9695_p6 = por %p9694_p7, %p9693_p1 }
  0x67   : > { %8807 = dma.hbm_to_vmem [thread:$0]  (!%p10443_p3), %s12181_s11, 4096, %s739_s30, [#allocation13], %s10192_s29, %s10192_s29, %s10193_s27  }
  0x68   : > { %p9689_p2 = pneg %p9688_p5 }
  0x6a   : > { %p9696_p9 = pnand %p9695_p6, %p9689_p2 }
  0x6c   : > { %9699 = shalt.err (!%p9696_p9)
}
  0x6d   : > { %s12182_s13 = sld [smem:[#allocation64_spill]]  ;;  %p7878_p0 = scmp.ge.s32.totalorder %s10188_s26, 9 }
  0x6e   : > { %s10475_s30 = sand.u32 (!%p7878_p0), 1, %s10184_s1   ;;  %s10478_s12 = sand.u32 (!%p7878_p0), 1, %s10188_s26  }
  0x6f   : > { %770 = sbr.rel (%p7878_p0) target bundleno = 516 (0x204), region = 48  ;;  %s10481_s2 = sshll.u32 (!%p7878_p0), %s10475_s30, 1 }
  0x70   : > { %s10484_s22 = sshll.u32 (!%p7878_p0), %s10385_s7, 5  ;;  %s12183_s29 = sld [smem:[#allocation59_spill]] (!%p7878_p0) }
  0x71   : > { %s801_s5 = scalar_lea.vmem (!%p7878_p0), [#allocation6], %s10481_s2  ;;  %p12184_p11 = scmp.ne.s32.totalorder (!%p7878_p0), %s12169_s3, 0 }
  0x73   : > { %8813 = dma.hbm_to_vmem [thread:$0]  (!%p10443_p3), %s12182_s13, 32, %s764_s28, [#allocation16]  }
  0x74   : > { %s811_s28 = sshll.u32 %s801_s5, 4  ;;  %s812_s28 = int_to_ptr.vmem [resolvable:$true] %s811_s28 }
  0x76   : > { %s10490_s4 = scalar_lea.hbm %s12183_s29, %s10484_s22  ;;  %s9704_s1 = scalar_lea.hbm %s12183_s29, 128 }
  0x77   : > { %s9700_s25 = scalar_lea.hbm %s10490_s4, 32  ;;  %p9705_p12 = scmp.lt.s32.totalorder %s10490_s4, %s12183_s29 }
  0x78   : > { %p9701_p3 = scmp.ne.s32.totalorder %s10490_s4, %s9700_s25  ;;  %p9706_p13 = scmp.lt.s32.totalorder %s9704_s1, %s9700_s25 }
  0x7a   : > { %p9702_p4 = pnand %p9701_p3, %p12184_p11  ;;  %p9707_p8 = por %p9706_p13, %p9705_p12 }
  0x7c   : > { %p9703_p10 = pneg %p9702_p4 }
  0x7e   : > { %p9708_p5 = pnand %p9707_p8, %p9703_p10 }
  0x80   : > { %9711 = shalt.err (!%p9708_p5)
}
  0x81   : > { %s9712_s27 = scalar_lea.vmem %s812_s28, 32  ;;  %s10195_s5 = smov [#allocation6]  }
  0x82   : > { %p9713_p2 = scmp.ne.s32.totalorder %s812_s28, %s9712_s27  ;;  %s9716_s26 = sshll.u32 %s10195_s5, 4  ;;  %s9717_s26 = int_to_ptr.vmem [resolvable:$false] %s9716_s26 }
  0x83   : > { %s9718_s19 = scalar_lea.vmem %s9717_s26, 64  ;;  %p9719_p6 = scmp.lt.s32.totalorder %s812_s28, %s9717_s26 }
  0x84   : > { %p9714_p1 = pnand %p9713_p2, %p12184_p11  ;;  %p9720_p9 = scmp.lt.s32.totalorder %s9718_s19, %s9712_s27 }
  0x86   : > { %p9715_p7 = pneg %p9714_p1  ;;  %p9721_p0 = por %p9720_p9, %p9719_p6 }
  0x88   : > { %p9722_p3 = pnand %p9721_p0, %p9715_p7 }
  0x8a   : > { %9725 = shalt.err (!%p9722_p3)
}
  0x8b   : > { %s12185_s11 = scalar_lea.sflag [#allocation7], %s10478_s12  ;;  %s12131_s13 = sand.u32 1, %s10172_s24  }
  0x8c   : > { %8769 = dma.hbm_to_vmem [thread:$0]  (%p12184_p11), %s10490_s4, 32, %s812_s28, %s12185_s11  }
  0x8d   : > { %s8394_s21 = sshll.u32 %s12253_s23, 13  ;;  %s7888_s19 = sshll.u32 %s12131_s13, 9 }
  0x8e   : > { %s12186_s8 = sld [smem:[#allocation61_spill]]  ;;  %s843_s6 = scalar_lea.vmem [#allocation9], %s7888_s19 }
  0x8f   : > { %s853_s27 = sshll.u32 %s843_s6, 4  ;;  %s8759_s5 = smul.u32 768, %s10475_s30  ;;  %s10522_s27 = int_to_ptr.vmem [resolvable:$true] %s853_s27 }
  0x90   : > { %s8760_s29 = smul.u32 12288, %s10385_s7  ;;  %s12132_s17 = scalar_lea.sflag [#allocation10], %s10478_s12 }
  0x91   : > { %p12187_p10 = scmp.ne.s32.totalorder %s12173_s0, 0 }
  0x94   : > { %s10519_s25 = scalar_lea.hbm %s12186_s8, %s8394_s21  ;;  %s9730_s21 = scalar_lea.hbm %s12186_s8, 32768 }
  0x95   : > { %s9726_s4 = scalar_lea.hbm %s10519_s25, 8192  ;;  %p9731_p8 = scmp.lt.s32.totalorder %s10519_s25, %s12186_s8 }
  0x96   : > { %p9727_p4 = scmp.ne.s32.totalorder %s10519_s25, %s9726_s4  ;;  %p9732_p5 = scmp.lt.s32.totalorder %s9730_s21, %s9726_s4 }
  0x98   : > { %p9728_p12 = pnand %p9727_p4, %p12187_p10  ;;  %p9733_p2 = por %p9732_p5, %p9731_p8 }
  0x9a   : > { %p9729_p13 = pneg %p9728_p12 }
  0x9c   : > { %p9734_p1 = pnand %p9733_p2, %p9729_p13 }
  0x9e   : > { %9737 = shalt.err (!%p9734_p1)
}
  0x9f   : > { %s9738_s19 = scalar_lea.vmem %s10522_s27, 8192  ;;  %s10196_s6 = smov [#allocation9]  }
  0xa0   : > { %p9739_p7 = scmp.ne.s32.totalorder %s10522_s27, %s9738_s19  ;;  %s9742_s28 = sshll.u32 %s10196_s6, 4  ;;  %s9743_s28 = int_to_ptr.vmem [resolvable:$false] %s9742_s28 }
  0xa1   : > { %s9744_s11 = scalar_lea.vmem %s9743_s28, 16384  ;;  %p9745_p0 = scmp.lt.s32.totalorder %s10522_s27, %s9743_s28 }
  0xa2   : > { %p9740_p6 = pnand %p9739_p7, %p12187_p10  ;;  %p9746_p3 = scmp.lt.s32.totalorder %s9744_s11, %s9738_s19 }
  0xa4   : > { %p9741_p9 = pneg %p9740_p6  ;;  %p9747_p4 = por %p9746_p3, %p9745_p0 }
  0xa6   : > { %p9748_p12 = pnand %p9747_p4, %p9741_p9 }
  0xa8   : > { %9751 = shalt.err (!%p9748_p12)
}
  0xa9   : > { %s12133_s4 = smov 128   ;;  %s12135_s21 = smov 8  }
  0xaa   : > { %8771 = dma.hbm_to_vmem [thread:$0]  (%p12187_p10), %s10519_s25, 8192, %s10522_s27, %s12132_s17, %s12133_s4, %s12133_s4, %s12135_s21  }
  0xab   : > { %s12188_s14 = sld [smem:[#allocation65_spill]]  ;;  %s911_s6 = scalar_lea.vmem [#allocation18], %s8759_s5 }
  0xac   : > { %s920_s28 = sshll.u32 %s911_s6, 4  ;;  %s12140_s11 = scalar_lea.sflag [#allocation19], %s10478_s12  ;;  %s10560_s28 = int_to_ptr.vmem [resolvable:$true] %s920_s28 }
  0xb1   : > { %s10556_s19 = scalar_lea.hbm %s12188_s14, %s8760_s29  ;;  %s9756_s1 = scalar_lea.hbm %s12188_s14, 49152 }
  0xb2   : > { %s9752_s13 = scalar_lea.hbm %s10556_s19, 12288  ;;  %p9757_p2 = scmp.lt.s32.totalorder %s10556_s19, %s12188_s14 }
  0xb3   : > { %p9753_p13 = scmp.ne.s32.totalorder %s10556_s19, %s9752_s13  ;;  %p9758_p1 = scmp.lt.s32.totalorder %s9756_s1, %s9752_s13 }
  0xb5   : > { %p9754_p8 = pnand %p9753_p13, %p12184_p11  ;;  %p9759_p7 = por %p9758_p1, %p9757_p2 }
  0xb7   : > { %p9755_p5 = pneg %p9754_p8 }
  0xb9   : > { %p9760_p6 = pnand %p9759_p7, %p9755_p5 }
  0xbb   : > { %9763 = shalt.err (!%p9760_p6)
}
  0xbc   : > { %s9764_s5 = scalar_lea.vmem %s10560_s28, 12288  ;;  %s10199_s6 = smov [#allocation18]  }
  0xbd   : > { %p9765_p9 = scmp.ne.s32.totalorder %s10560_s28, %s9764_s5  ;;  %s9768_s25 = sshll.u32 %s10199_s6, 4  ;;  %s9769_s25 = int_to_ptr.vmem [resolvable:$false] %s9768_s25 }
  0xbe   : > { %s9770_s27 = scalar_lea.vmem %s9769_s25, 24576  ;;  %p9771_p4 = scmp.lt.s32.totalorder %s10560_s28, %s9769_s25 }
  0xbf   : > { %p9766_p0 = pnand %p9765_p9, %p12184_p11  ;;  %p9772_p12 = scmp.lt.s32.totalorder %s9770_s27, %s9764_s5 }
  0xc1   : > { %p9767_p3 = pneg %p9766_p0  ;;  %p9773_p13 = por %p9772_p12, %p9771_p4 }
  0xc3   : > { %p9774_p8 = pnand %p9773_p13, %p9767_p3 }
  0xc5   : > { %9777 = shalt.err (!%p9774_p8)
}
  0xc6   : > { %s10200_s13 = smov 384   ;;  %s10201_s1 = smov 24  }
  0xc7   : > { %8774 = dma.hbm_to_vmem [thread:$0]  (%p12184_p11), %s10556_s19, 12288, %s10560_s28, %s12140_s11, %s10200_s13, %s10200_s13, %s10201_s1  }
  0xc8   : > { %s12189_s16 = sld [smem:[#allocation66_spill]]  ;;  %s957_s6 = scalar_lea.vmem [#allocation21], %s10481_s2 }
  0xc9   : > { %s967_s25 = sshll.u32 %s957_s6, 4  ;;  %s12137_s27 = scalar_lea.sflag [#allocation22], %s10478_s12  ;;  %s968_s25 = int_to_ptr.vmem [resolvable:$true] %s967_s25 }
  0xce   : > { %s10589_s5 = scalar_lea.hbm %s12189_s16, %s10484_s22  ;;  %s9782_s19 = scalar_lea.hbm %s12189_s16, 128 }
  0xcf   : > { %s9778_s17 = scalar_lea.hbm %s10589_s5, 32  ;;  %p9783_p7 = scmp.lt.s32.totalorder %s10589_s5, %s12189_s16 }
  0xd0   : > { %p9779_p5 = scmp.ne.s32.totalorder %s10589_s5, %s9778_s17  ;;  %p9784_p6 = scmp.lt.s32.totalorder %s9782_s19, %s9778_s17 }
  0xd2   : > { %p9780_p2 = pnand %p9779_p5, %p12184_p11  ;;  %p9785_p9 = por %p9784_p6, %p9783_p7 }
  0xd4   : > { %p9781_p1 = pneg %p9780_p2 }
  0xd6   : > { %p9786_p0 = pnand %p9785_p9, %p9781_p1 }
  0xd8   : > { %9789 = shalt.err (!%p9786_p0)
}
  0xd9   : > { %s9790_s1 = scalar_lea.vmem %s968_s25, 32  ;;  %s10202_s29 = smov [#allocation21]  }
  0xda   : > { %p9791_p3 = scmp.ne.s32.totalorder %s968_s25, %s9790_s1  ;;  %s9794_s26 = sshll.u32 %s10202_s29, 4  ;;  %s9795_s26 = int_to_ptr.vmem [resolvable:$false] %s9794_s26 }
  0xdb   : > { %s9796_s6 = scalar_lea.vmem %s9795_s26, 64  ;;  %p9797_p13 = scmp.lt.s32.totalorder %s968_s25, %s9795_s26 }
  0xdc   : > { %p9792_p4 = pnand %p9791_p3, %p12184_p11  ;;  %p9798_p8 = scmp.lt.s32.totalorder %s9796_s6, %s9790_s1 }
  0xde   : > { %p9793_p12 = pneg %p9792_p4  ;;  %p9799_p5 = por %p9798_p8, %p9797_p13 }
  0xe0   : > { %p9800_p2 = pnand %p9799_p5, %p9793_p12 }
  0xe2   : > { %9803 = shalt.err (!%p9800_p2)
}
  0xe3   : > { %8776 = dma.hbm_to_vmem [thread:$0]  (%p12184_p11), %s10589_s5, 32, %s968_s25, %s12137_s27  }
  0xe4   : > { %s12190_s18 = sld [smem:[#allocation68_spill]]  ;;  %s1001_s19 = scalar_lea.vmem [#allocation24], %s10481_s2 }
  0xe5   : > { %s1011_s28 = sshll.u32 %s1001_s19, 4  ;;  %s12138_s13 = scalar_lea.sflag [#allocation25], %s10478_s12  ;;  %s1012_s28 = int_to_ptr.vmem [resolvable:$true] %s1011_s28 }
  0xea   : > { %s10615_s21 = scalar_lea.hbm %s12190_s18, %s10484_s22  ;;  %s9808_s5 = scalar_lea.hbm %s12190_s18, 128 }
  0xeb   : > { %s9804_s1 = scalar_lea.hbm %s10615_s21, 32  ;;  %p9809_p9 = scmp.lt.s32.totalorder %s10615_s21, %s12190_s18 }
  0xec   : > { %p9805_p1 = scmp.ne.s32.totalorder %s10615_s21, %s9804_s1  ;;  %p9810_p0 = scmp.lt.s32.totalorder %s9808_s5, %s9804_s1 }
  0xee   : > { %p9806_p7 = pnand %p9805_p1, %p12184_p11  ;;  %p9811_p3 = por %p9810_p0, %p9809_p9 }
  0xf0   : > { %p9807_p6 = pneg %p9806_p7 }
  0xf2   : > { %p9812_p4 = pnand %p9811_p3, %p9807_p6 }
  0xf4   : > { %9815 = shalt.err (!%p9812_p4)
}
  0xf5   : > { %s9816_s17 = scalar_lea.vmem %s1012_s28, 32  ;;  %s10203_s4 = smov [#allocation24]  }
  0xf6   : > { %p9817_p12 = scmp.ne.s32.totalorder %s1012_s28, %s9816_s17  ;;  %s9820_s19 = sshll.u32 %s10203_s4, 4  ;;  %s9821_s19 = int_to_ptr.vmem [resolvable:$false] %s9820_s19 }
  0xf7   : > { %s9822_s27 = scalar_lea.vmem %s9821_s19, 64  ;;  %p9823_p5 = scmp.lt.s32.totalorder %s1012_s28, %s9821_s19 }
  0xf8   : > { %p9818_p13 = pnand %p9817_p12, %p12184_p11  ;;  %p9824_p2 = scmp.lt.s32.totalorder %s9822_s27, %s9816_s17 }
  0xfa   : > { %p9819_p8 = pneg %p9818_p13  ;;  %p9825_p1 = por %p9824_p2, %p9823_p5 }
  0xfc   : > { %p9826_p7 = pnand %p9825_p1, %p9819_p8 }
  0xfe   : > { %9829 = shalt.err (!%p9826_p7)
}
  0xff   : > { %8778 = dma.hbm_to_vmem [thread:$0]  (%p12184_p11), %s10615_s21, 32, %s1012_s28, %s12138_s13  }
 0x100   : > { %s12191_s20 = sld [smem:[#allocation70_spill]]  ;;  %s1045_s27 = scalar_lea.vmem [#allocation27], %s10481_s2 }
 0x101   : > { %s1055_s5 = sshll.u32 %s1045_s27, 4  ;;  %s12139_s25 = scalar_lea.sflag [#allocation28], %s10478_s12  ;;  %s1056_s5 = int_to_ptr.vmem [resolvable:$true] %s1055_s5 }
 0x106   : > { %s10641_s26 = scalar_lea.hbm %s12191_s20, %s10484_s22  ;;  %s9834_s21 = scalar_lea.hbm %s12191_s20, 128 }
 0x107   : > { %s9830_s6 = scalar_lea.hbm %s10641_s26, 32  ;;  %p9835_p3 = scmp.lt.s32.totalorder %s10641_s26, %s12191_s20 }
 0x108   : > { %p9831_p6 = scmp.ne.s32.totalorder %s10641_s26, %s9830_s6  ;;  %p9836_p4 = scmp.lt.s32.totalorder %s9834_s21, %s9830_s6 }
 0x10a   : > { %p9832_p9 = pnand %p9831_p6, %p12184_p11  ;;  %p9837_p12 = por %p9836_p4, %p9835_p3 }
 0x10c   : > { %p9833_p0 = pneg %p9832_p9 }
 0x10e   : > { %p9838_p13 = pnand %p9837_p12, %p9833_p0 }
 0x110   : > { %9841 = shalt.err (!%p9838_p13)
}
 0x111   : > { %s9842_s1 = scalar_lea.vmem %s1056_s5, 32  ;;  %s10204_s29 = smov [#allocation27]  }
 0x112   : > { %p9843_p8 = scmp.ne.s32.totalorder %s1056_s5, %s9842_s1  ;;  %s9846_s27 = sshll.u32 %s10204_s29, 4  ;;  %s9847_s27 = int_to_ptr.vmem [resolvable:$false] %s9846_s27 }
 0x113   : > { %s9848_s13 = scalar_lea.vmem %s9847_s27, 64  ;;  %p9849_p1 = scmp.lt.s32.totalorder %s1056_s5, %s9847_s27 }
 0x114   : > { %p9844_p5 = pnand %p9843_p8, %p12184_p11  ;;  %p9850_p7 = scmp.lt.s32.totalorder %s9848_s13, %s9842_s1 }
 0x116   : > { %p9845_p2 = pneg %p9844_p5  ;;  %p9851_p6 = por %p9850_p7, %p9849_p1 }
 0x118   : > { %p9852_p9 = pnand %p9851_p6, %p9845_p2 }
 0x11a   : > { %9855 = shalt.err (!%p9852_p9)
}
 0x11b   : > { %8780 = dma.hbm_to_vmem [thread:$0]  (%p12184_p11), %s10641_s26, 32, %s1056_s5, %s12139_s25  }
 0x11c   : > { %s10664_s6 = sshll.u32 %s10475_s30, 8  ;;  %s10667_s17 = sshll.u32 %s10385_s7, 12 }
 0x11d   : > { %s12192_s21 = sld [smem:[#allocation58_spill]]  ;;  %s778_s19 = scalar_lea.vmem [#allocation4], %s10664_s6 }
 0x11e   : > { %s787_s1 = sshll.u32 %s778_s19, 4  ;;  %s12193_s5 = sld [smem:[#allocation60_spill]]  ;;  %s10676_s1 = int_to_ptr.vmem [resolvable:$true] %s787_s1 }
 0x11f   : > { %s775_s11 = scalar_lea.sflag [#allocation5], %s10475_s30 }
 0x123   : > { %s10673_s28 = scalar_lea.hbm %s12192_s21, %s10667_s17  ;;  %s9860_s14 = scalar_lea.hbm %s12192_s21, 16384 }
 0x124   : > { %s12194_s27 = smov %s12193_s5  ;;  %s10682_s25 = scalar_lea.hbm %s12193_s5, %s10484_s22 }
 0x125   : > { %s9856_s8 = scalar_lea.hbm %s10673_s28, 4096  ;;  %p9861_p12 = scmp.lt.s32.totalorder %s10673_s28, %s12192_s21 }
 0x126   : > { %p9857_p0 = scmp.ne.s32.totalorder %s10673_s28, %s9856_s8  ;;  %p9862_p13 = scmp.lt.s32.totalorder %s9860_s14, %s9856_s8 }
 0x128   : > { %p9858_p3 = pnand %p9857_p0, %p12184_p11  ;;  %p9863_p8 = por %p9862_p13, %p9861_p12 }
 0x12a   : > { %p9859_p4 = pneg %p9858_p3 }
 0x12c   : > { %p9864_p5 = pnand %p9863_p8, %p9859_p4 }
 0x12e   : > { %9867 = shalt.err (!%p9864_p5)
}
 0x12f   : > { %s9868_s19 = scalar_lea.vmem %s10676_s1, 4096  ;;  %s10205_s29 = smov [#allocation4]  }
 0x130   : > { %p9869_p2 = scmp.ne.s32.totalorder %s10676_s1, %s9868_s19  ;;  %s9872_s26 = sshll.u32 %s10205_s29, 4  ;;  %s9873_s26 = int_to_ptr.vmem [resolvable:$false] %s9872_s26 }
 0x131   : > { %s9874_s5 = scalar_lea.vmem %s9873_s26, 8192  ;;  %p9875_p6 = scmp.lt.s32.totalorder %s10676_s1, %s9873_s26 }
 0x132   : > { %p9870_p1 = pnand %p9869_p2, %p12184_p11  ;;  %p9876_p9 = scmp.lt.s32.totalorder %s9874_s5, %s9868_s19 }
 0x134   : > { %p9871_p7 = pneg %p9870_p1  ;;  %p9877_p0 = por %p9876_p9, %p9875_p6 }
 0x136   : > { %p9878_p3 = pnand %p9877_p0, %p9871_p7 }
 0x138   : > { %9881 = shalt.err (!%p9878_p3)
}
 0x139   : > { %s12195_s8 = smov 8   ;;  %s12196_s14 = smov 128  }
 0x13a   : > { %8768 = dma.hbm_to_vmem [thread:$0]  (%p12184_p11), %s10673_s28, 4096, %s10676_s1, %s775_s11, %s12196_s14, %s12196_s14, %s12195_s8  }
 0x13b   : > { %s822_s16 = scalar_lea.vmem [#allocation8], %s10481_s2  ;;  %s12197_s13 = sand.u32 1, %s10172_s24  }
 0x13c   : > { %s832_s18 = sshll.u32 %s822_s16, 4  ;;  %s10711_s4 = sshll.u32 %s12197_s13, 1  ;;  %s833_s18 = int_to_ptr.vmem [resolvable:$true] %s832_s18 }
 0x13d   : > { %s9882_s19 = scalar_lea.hbm %s10682_s25, 32  ;;  %s9886_s5 = scalar_lea.hbm %s12194_s27, 128 }
 0x13e   : > { %p9883_p4 = scmp.ne.s32.totalorder %s10682_s25, %s9882_s19  ;;  %p9887_p8 = scmp.lt.s32.totalorder %s10682_s25, %s12194_s27 }
 0x13f   : > { %p9888_p5 = scmp.lt.s32.totalorder %s9886_s5, %s9882_s19 }
 0x140   : > { %p9884_p12 = pnand %p9883_p4, %p12184_p11 }
 0x141   : > { %p9889_p2 = por %p9888_p5, %p9887_p8 }
 0x142   : > { %p9885_p13 = pneg %p9884_p12 }
 0x144   : > { %p9890_p1 = pnand %p9889_p2, %p9885_p13 }
 0x146   : > { %9893 = shalt.err (!%p9890_p1)
}
 0x147   : > { %s9894_s11 = scalar_lea.vmem %s833_s18, 32  ;;  %s10206_s28 = smov [#allocation8]  }
 0x148   : > { %p9895_p7 = scmp.ne.s32.totalorder %s833_s18, %s9894_s11  ;;  %s9898_s1 = sshll.u32 %s10206_s28, 4  ;;  %s9899_s1 = int_to_ptr.vmem [resolvable:$false] %s9898_s1 }
 0x149   : > { %s9900_s16 = scalar_lea.vmem %s9899_s1, 64  ;;  %p9901_p0 = scmp.lt.s32.totalorder %s833_s18, %s9899_s1 }
 0x14a   : > { %p9896_p6 = pnand %p9895_p7, %p12184_p11  ;;  %p9902_p3 = scmp.lt.s32.totalorder %s9900_s16, %s9894_s11 }
 0x14c   : > { %p9897_p9 = pneg %p9896_p6  ;;  %p9903_p4 = por %p9902_p3, %p9901_p0 }
 0x14e   : > { %p9904_p12 = pnand %p9903_p4, %p9897_p9 }
 0x150   : > { %9907 = shalt.err (!%p9904_p12)
}
 0x151   : > { %s12198_s20 = scalar_lea.sflag [#allocation7], %s10478_s12  ;;  %s8395_s21 = sshll.u32 %s12253_s23, 5 }
 0x152   : > { %8770 = dma.hbm_to_vmem [thread:$0]  (%p12184_p11), %s10682_s25, 32, %s833_s18, %s12198_s20  }
 0x153   : > { %s867_s13 = scalar_lea.vmem [#allocation11], %s10711_s4  ;;  %s876_s5 = scalar_lea.hbm %s12084_s9, %s8395_s21 }
 0x154   : > { %s878_s19 = sshll.u32 %s867_s13, 4  ;;  %s9908_s11 = scalar_lea.hbm %s876_s5, 32  ;;  %s879_s19 = int_to_ptr.vmem [resolvable:$true] %s878_s19 }
 0x155   : > { %p9909_p13 = scmp.ne.s32.totalorder %s876_s5, %s9908_s11  ;;  %s9912_s16 = scalar_lea.hbm %s12084_s9, 128 }
 0x156   : > { %p9913_p2 = scmp.lt.s32.totalorder %s876_s5, %s12084_s9  ;;  %p9914_p1 = scmp.lt.s32.totalorder %s9912_s16, %s9908_s11 }
 0x157   : > { %p9910_p8 = pnand %p9909_p13, %p12187_p10 }
 0x158   : > { %p9915_p7 = por %p9914_p1, %p9913_p2 }
 0x159   : > { %p9911_p5 = pneg %p9910_p8 }
 0x15b   : > { %p9916_p6 = pnand %p9915_p7, %p9911_p5 }
 0x15d   : > { %9919 = shalt.err (!%p9916_p6)
}
 0x15e   : > { %s9920_s18 = scalar_lea.vmem %s879_s19, 32  ;;  %s10207_s20 = smov [#allocation11]  }
 0x15f   : > { %p9921_p9 = scmp.ne.s32.totalorder %s879_s19, %s9920_s18  ;;  %s9924_s13 = sshll.u32 %s10207_s20, 4  ;;  %s9925_s13 = int_to_ptr.vmem [resolvable:$false] %s9924_s13 }
 0x160   : > { %s9926_s29 = scalar_lea.vmem %s9925_s13, 64  ;;  %p9927_p4 = scmp.lt.s32.totalorder %s879_s19, %s9925_s13 }
 0x161   : > { %p9922_p0 = pnand %p9921_p9, %p12187_p10  ;;  %p9928_p12 = scmp.lt.s32.totalorder %s9926_s29, %s9920_s18 }
 0x163   : > { %p9923_p3 = pneg %p9922_p0  ;;  %p9929_p13 = por %p9928_p12, %p9927_p4 }
 0x165   : > { %p9930_p8 = pnand %p9929_p13, %p9923_p3 }
 0x167   : > { %9933 = shalt.err (!%p9930_p8)
}
 0x168   : > { %s12199_s27 = scalar_lea.sflag [#allocation10], %s10478_s12  ;;  %s10757_s28 = scalar_lea.hbm %s12085_s10, %s8395_s21 }
 0x169   : > { %8772 = dma.hbm_to_vmem [thread:$0]  (%p12187_p10), %s876_s5, 32, %s879_s19, %s12199_s27  }
 0x16a   : > { %s889_s1 = scalar_lea.vmem [#allocation12], %s10711_s4  ;;  %s886_s25 = scalar_lea.sflag [#allocation13], %s10478_s12 }
 0x16b   : > { %s900_s16 = sshll.u32 %s889_s1, 4  ;;  %s9934_s18 = scalar_lea.hbm %s10757_s28, 32  ;;  %s901_s16 = int_to_ptr.vmem [resolvable:$true] %s900_s16 }
 0x16c   : > { %p9935_p5 = scmp.ne.s32.totalorder %s10757_s28, %s9934_s18  ;;  %s9938_s23 = scalar_lea.hbm %s12085_s10, 128 }
 0x16d   : > { %p9939_p7 = scmp.lt.s32.totalorder %s10757_s28, %s12085_s10  ;;  %p9940_p6 = scmp.lt.s32.totalorder %s9938_s23, %s9934_s18 }
 0x16e   : > { %p9936_p2 = pnand %p9935_p5, %p12187_p10 }
 0x16f   : > { %p9941_p9 = por %p9940_p6, %p9939_p7 }
 0x170   : > { %p9937_p1 = pneg %p9936_p2 }
 0x172   : > { %p9942_p0 = pnand %p9941_p9, %p9937_p1 }
 0x174   : > { %9945 = shalt.err (!%p9942_p0)
}
 0x175   : > { %s9946_s4 = scalar_lea.vmem %s901_s16, 32  ;;  %s10208_s21 = smov [#allocation12]  }
 0x176   : > { %p9947_p3 = scmp.ne.s32.totalorder %s901_s16, %s9946_s4  ;;  %s9950_s29 = sshll.u32 %s10208_s21, 4  ;;  %s9951_s29 = int_to_ptr.vmem [resolvable:$false] %s9950_s29 }
 0x177   : > { %s9952_s27 = scalar_lea.vmem %s9951_s29, 64  ;;  %p9953_p13 = scmp.lt.s32.totalorder %s901_s16, %s9951_s29 }
 0x178   : > { %p9948_p4 = pnand %p9947_p3, %p12187_p10  ;;  %p9954_p8 = scmp.lt.s32.totalorder %s9952_s27, %s9946_s4 }
 0x17a   : > { %p9949_p12 = pneg %p9948_p4  ;;  %p9955_p5 = por %p9954_p8, %p9953_p13 }
 0x17c   : > { %p9956_p2 = pnand %p9955_p5, %p9949_p12 }
 0x17e   : > { %9959 = shalt.err (!%p9956_p2)
}
 0x17f   : > { %8773 = dma.hbm_to_vmem [thread:$0]  (%p12187_p10), %s10757_s28, 32, %s901_s16, %s886_s25  }
 0x180   : > { %s10781_s1 = scalar_lea.hbm %s12090_s15, %s10667_s17  ;;  %s934_s18 = scalar_lea.vmem [#allocation20], %s10664_s6 }
 0x181   : > { %s943_s20 = sshll.u32 %s934_s18, 4  ;;  %s9960_s19 = scalar_lea.hbm %s10781_s1, 4096  ;;  %s944_s20 = int_to_ptr.vmem [resolvable:$true] %s943_s20 }
 0x182   : > { %p9961_p1 = scmp.ne.s32.totalorder %s10781_s1, %s9960_s19  ;;  %s9964_s28 = scalar_lea.hbm %s12090_s15, 16384 }
 0x183   : > { %p9965_p10 = scmp.lt.s32.totalorder %s10781_s1, %s12090_s15  ;;  %p9966_p9 = scmp.lt.s32.totalorder %s9964_s28, %s9960_s19 }
 0x184   : > { %p9962_p7 = pnand %p9961_p1, %p12184_p11 }
 0x185   : > { %p9967_p0 = por %p9966_p9, %p9965_p10 }
 0x186   : > { %p9963_p6 = pneg %p9962_p7 }
 0x188   : > { %p9968_p3 = pnand %p9967_p0, %p9963_p6 }
 0x18a   : > { %9971 = shalt.err (!%p9968_p3)
}
 0x18b   : > { %s9972_s5 = scalar_lea.vmem %s944_s20, 4096  ;;  %s10209_s13 = smov [#allocation20]  }
 0x18c   : > { %p9973_p4 = scmp.ne.s32.totalorder %s944_s20, %s9972_s5  ;;  %s9976_s4 = sshll.u32 %s10209_s13, 4  ;;  %s9977_s4 = int_to_ptr.vmem [resolvable:$false] %s9976_s4 }
 0x18d   : > { %s9978_s21 = scalar_lea.vmem %s9977_s4, 8192  ;;  %p9979_p8 = scmp.lt.s32.totalorder %s944_s20, %s9977_s4 }
 0x18e   : > { %p9974_p12 = pnand %p9973_p4, %p12184_p11  ;;  %p9980_p5 = scmp.lt.s32.totalorder %s9978_s21, %s9972_s5 }
 0x190   : > { %p9975_p13 = pneg %p9974_p12  ;;  %p9981_p2 = por %p9980_p5, %p9979_p8 }
 0x192   : > { %p9982_p1 = pnand %p9981_p2, %p9975_p13 }
 0x194   : > { %9985 = shalt.err (!%p9982_p1)
}
 0x195   : > { %s12200_s29 = scalar_lea.sflag [#allocation19], %s10478_s12  ;;  %s12201_s11 = sld [smem:[#allocation67_spill]] }
 0x196   : > { %8775 = dma.hbm_to_vmem [thread:$0]  (%p12184_p11), %s10781_s1, 4096, %s944_s20, %s12200_s29, %s12196_s14, %s12196_s14, %s12195_s8  }
 0x197   : > { %s978_s19 = scalar_lea.vmem [#allocation23], %s10664_s6  ;;  %s7913_s23 = sshll.u32 %s10475_s30, 6 }
 0x198   : > { %s987_s0 = sshll.u32 %s978_s19, 4  ;;  %s10812_s0 = int_to_ptr.vmem [resolvable:$true] %s987_s0 }
 0x19b   : > { %s10809_s18 = scalar_lea.hbm %s12201_s11, %s10667_s17  ;;  %s9990_s20 = scalar_lea.hbm %s12201_s11, 16384 }
 0x19c   : > { %s9986_s28 = scalar_lea.hbm %s10809_s18, 4096  ;;  %p9991_p9 = scmp.lt.s32.totalorder %s10809_s18, %s12201_s11 }
 0x19d   : > { %p9987_p7 = scmp.ne.s32.totalorder %s10809_s18, %s9986_s28  ;;  %p9992_p0 = scmp.lt.s32.totalorder %s9990_s20, %s9986_s28 }
 0x19f   : > { %p9988_p6 = pnand %p9987_p7, %p12184_p11  ;;  %p9993_p3 = por %p9992_p0, %p9991_p9 }
 0x1a1   : > { %p9989_p10 = pneg %p9988_p6 }
 0x1a3   : > { %p9994_p4 = pnand %p9993_p3, %p9989_p10 }
 0x1a5   : > { %9997 = shalt.err (!%p9994_p4)
}
 0x1a6   : > { %s9998_s13 = scalar_lea.vmem %s10812_s0, 4096  ;;  %s10210_s4 = smov [#allocation23]  }
 0x1a7   : > { %p9999_p12 = scmp.ne.s32.totalorder %s10812_s0, %s9998_s13  ;;  %s10002_s21 = sshll.u32 %s10210_s4, 4  ;;  %s10003_s21 = int_to_ptr.vmem [resolvable:$false] %s10002_s21 }
 0x1a8   : > { %s10004_s29 = scalar_lea.vmem %s10003_s21, 8192  ;;  %p10005_p5 = scmp.lt.s32.totalorder %s10812_s0, %s10003_s21 }
 0x1a9   : > { %p10000_p13 = pnand %p9999_p12, %p12184_p11  ;;  %p10006_p2 = scmp.lt.s32.totalorder %s10004_s29, %s9998_s13 }
 0x1ab   : > { %p10001_p8 = pneg %p10000_p13  ;;  %p10007_p1 = por %p10006_p2, %p10005_p5 }
 0x1ad   : > { %p10008_p7 = pnand %p10007_p1, %p10001_p8 }
 0x1af   : > { %10011 = shalt.err (!%p10008_p7)
}
 0x1b0   : > { %s12202_s27 = scalar_lea.sflag [#allocation22], %s10478_s12  ;;  %s8401_s26 = sshll.u32 %s10385_s7, 10 }
 0x1b1   : > { %8777 = dma.hbm_to_vmem [thread:$0]  (%p12184_p11), %s10809_s18, 4096, %s10812_s0, %s12202_s27, %s12196_s14, %s12196_s14, %s12195_s8  }
 0x1b2   : > { %s12203_s16 = sld [smem:[#allocation69_spill]]  ;;  %s1022_s20 = scalar_lea.vmem [#allocation26], %s7913_s23 }
 0x1b3   : > { %s1031_s25 = sshll.u32 %s1022_s20, 4  ;;  %s1032_s25 = int_to_ptr.vmem [resolvable:$true] %s1031_s25 }
 0x1b8   : > { %s10844_s1 = scalar_lea.hbm %s12203_s16, %s8401_s26  ;;  %s10016_s7 = scalar_lea.hbm %s12203_s16, 4096 }
 0x1b9   : > { %s10012_s5 = scalar_lea.hbm %s10844_s1, 1024  ;;  %p10017_p0 = scmp.lt.s32.totalorder %s10844_s1, %s12203_s16 }
 0x1ba   : > { %p10013_p6 = scmp.ne.s32.totalorder %s10844_s1, %s10012_s5  ;;  %p10018_p3 = scmp.lt.s32.totalorder %s10016_s7, %s10012_s5 }
 0x1bc   : > { %p10014_p10 = pnand %p10013_p6, %p12184_p11  ;;  %p10019_p4 = por %p10018_p3, %p10017_p0 }
 0x1be   : > { %p10015_p9 = pneg %p10014_p10 }
 0x1c0   : > { %p10020_p12 = pnand %p10019_p4, %p10015_p9 }
 0x1c2   : > { %10023 = shalt.err (!%p10020_p12)
}
 0x1c3   : > { %s10024_s23 = scalar_lea.vmem %s1032_s25, 1024  ;;  %s10211_s21 = smov [#allocation26]  }
 0x1c4   : > { %p10025_p13 = scmp.ne.s32.totalorder %s1032_s25, %s10024_s23  ;;  %s10028_s29 = sshll.u32 %s10211_s21, 4  ;;  %s10029_s29 = int_to_ptr.vmem [resolvable:$false] %s10028_s29 }
 0x1c5   : > { %s10030_s27 = scalar_lea.vmem %s10029_s29, 2048  ;;  %p10031_p2 = scmp.lt.s32.totalorder %s1032_s25, %s10029_s29 }
 0x1c6   : > { %p10026_p8 = pnand %p10025_p13, %p12184_p11  ;;  %p10032_p1 = scmp.lt.s32.totalorder %s10030_s27, %s10024_s23 }
 0x1c8   : > { %p10027_p5 = pneg %p10026_p8  ;;  %p10033_p7 = por %p10032_p1, %p10031_p2 }
 0x1ca   : > { %p10034_p6 = pnand %p10033_p7, %p10027_p5 }
 0x1cc   : > { %10037 = shalt.err (!%p10034_p6)
}
 0x1cd   : > { %s12204_s26 = scalar_lea.sflag [#allocation25], %s10478_s12  ;;  %s12205_s20 = sld [smem:[#allocation71_spill]] }
 0x1ce   : > { %8779 = dma.hbm_to_vmem [thread:$0]  (%p12184_p11), %s10844_s1, 1024, %s1032_s25, %s12204_s26, %s12196_s14, %s12196_s14, %s12195_s8  }
 0x1cf   : > { %s1066_s13 = scalar_lea.vmem [#allocation29], %s10664_s6 }
 0x1d0   : > { %s1075_s18 = sshll.u32 %s1066_s13, 4  ;;  %s1076_s18 = int_to_ptr.vmem [resolvable:$true] %s1075_s18 }
 0x1d3   : > { %s10873_s5 = scalar_lea.hbm %s12205_s20, %s10667_s17  ;;  %s10042_s1 = scalar_lea.hbm %s12205_s20, 16384 }
 0x1d4   : > { %s10038_s7 = scalar_lea.hbm %s10873_s5, 4096  ;;  %p10043_p3 = scmp.lt.s32.totalorder %s10873_s5, %s12205_s20 }
 0x1d5   : > { %p10039_p10 = scmp.ne.s32.totalorder %s10873_s5, %s10038_s7  ;;  %p10044_p4 = scmp.lt.s32.totalorder %s10042_s1, %s10038_s7 }
 0x1d7   : > { %p10040_p9 = pnand %p10039_p10, %p12184_p11  ;;  %p10045_p12 = por %p10044_p4, %p10043_p3 }
 0x1d9   : > { %p10041_p0 = pneg %p10040_p9 }
 0x1db   : > { %p10046_p13 = pnand %p10045_p12, %p10041_p0 }
 0x1dd   : > { %10049 = shalt.err (!%p10046_p13)
}
 0x1de   : > { %s10050_s6 = scalar_lea.vmem %s1076_s18, 4096  ;;  %s10212_s17 = smov [#allocation29]  }
 0x1df   : > { %p10051_p8 = scmp.ne.s32.totalorder %s1076_s18, %s10050_s6  ;;  %s10054_s21 = sshll.u32 %s10212_s17, 4  ;;  %s10055_s21 = int_to_ptr.vmem [resolvable:$false] %s10054_s21 }
 0x1e0   : > { %s10056_s29 = scalar_lea.vmem %s10055_s21, 8192  ;;  %p10057_p1 = scmp.lt.s32.totalorder %s1076_s18, %s10055_s21 }
 0x1e1   : > { %p10052_p5 = pnand %p10051_p8, %p12184_p11  ;;  %p10058_p7 = scmp.lt.s32.totalorder %s10056_s29, %s10050_s6 }
 0x1e3   : > { %p10053_p2 = pneg %p10052_p5  ;;  %p10059_p6 = por %p10058_p7, %p10057_p1 }
 0x1e5   : > { %p10060_p10 = pnand %p10059_p6, %p10053_p2 }
 0x1e7   : > { %10063 = shalt.err (!%p10060_p10)
}
 0x1e8   : > { %s12206_s27 = scalar_lea.sflag [#allocation28], %s10478_s12  ;;  %s12207_s28 = sld [smem:[#allocation72_spill]] }
 0x1e9   : > { %8781 = dma.hbm_to_vmem [thread:$0]  (%p12184_p11), %s10873_s5, 4096, %s1076_s18, %s12206_s27, %s12196_s14, %s12196_s14, %s12195_s8  }
 0x1ea   : > { %s1089_s7 = scalar_lea.vmem [#allocation30], %s10481_s2  ;;  %s1086_s4 = scalar_lea.sflag [#allocation31], %s10475_s30 }
 0x1eb   : > { %s1099_s0 = sshll.u32 %s1089_s7, 4  ;;  %s1100_s0 = int_to_ptr.vmem [resolvable:$true] %s1099_s0 }
 0x1ee   : > { %s10901_s13 = scalar_lea.hbm %s12207_s28, %s10484_s22  ;;  %s10068_s8 = scalar_lea.hbm %s12207_s28, 128 }
 0x1ef   : > { %s10064_s1 = scalar_lea.hbm %s10901_s13, 32  ;;  %p10069_p4 = scmp.lt.s32.totalorder %s10901_s13, %s12207_s28 }
 0x1f0   : > { %p10065_p9 = scmp.ne.s32.totalorder %s10901_s13, %s10064_s1  ;;  %p10070_p12 = scmp.lt.s32.totalorder %s10068_s8, %s10064_s1 }
 0x1f2   : > { %p10066_p0 = pnand %p10065_p9, %p12184_p11  ;;  %p10071_p13 = por %p10070_p12, %p10069_p4 }
 0x1f4   : > { %p10067_p3 = pneg %p10066_p0 }
 0x1f6   : > { %p10072_p8 = pnand %p10071_p13, %p10067_p3 }
 0x1f8   : > { %10075 = shalt.err (!%p10072_p8)
}
 0x1f9   : > { %s10076_s2 = scalar_lea.vmem %s1100_s0, 32  ;;  %s10213_s30 = smov [#allocation30]  }
 0x1fa   : > { %p10077_p5 = scmp.ne.s32.totalorder %s1100_s0, %s10076_s2  ;;  %s10080_s22 = sshll.u32 %s10213_s30, 4  ;;  %s10081_s22 = int_to_ptr.vmem [resolvable:$false] %s10080_s22 }
 0x1fb   : > { %s10082_s18 = scalar_lea.vmem %s10081_s22, 64  ;;  %p10083_p7 = scmp.lt.s32.totalorder %s1100_s0, %s10081_s22 }
 0x1fc   : > { %p10078_p2 = pnand %p10077_p5, %p12184_p11  ;;  %p10084_p6 = scmp.lt.s32.totalorder %s10082_s18, %s10076_s2 }
 0x1fe   : > { %p10079_p1 = pneg %p10078_p2  ;;  %p10085_p10 = por %p10084_p6, %p10083_p7 }
 0x200   : > { %p10086_p9 = pnand %p10085_p10, %p10079_p1 }
 0x202   : > { %10089 = shalt.err (!%p10086_p9)
}
 0x203   : > { %8782 = dma.hbm_to_vmem [thread:$0]  (%p12184_p11), %s10901_s13, 32, %s1100_s0, %s1086_s4  }
 0x204 PF: > { %s12208_s23 = sld [smem:[#allocation52_spill]] }
 0x20a   : > { %p12209_p0 = scmp.ne.s32.totalorder %s12208_s23, 0 }
 0x20b   : > { %s12210_s6 = sld [smem:[#allocation44_spill]] (!%p12209_p0) }
 0x20c   : > { %1108 = sbr.rel (%p12209_p0) target bundleno = 9461 (0x24f5), region = 112  ;;  %s12211_s17 = sld [smem:[#allocation48_spill]] (!%p12209_p0) }
 0x211   : > { %s10924_s21 = sand.u32 1, %s12210_s6  }
 0x212   : > { %s10927_s29 = sshll.u32 %s10924_s21, 8  ;;  %s1111_s27 = scalar_lea.sflag [#allocation5], %s10924_s21 }
 0x213   : > { %s10931_s26 = scalar_lea.vmem [#allocation4], %s10927_s29  ;;  %p12212_p3 = scmp.ne.s32.totalorder %s12211_s17, 0 }
 0x215   : > { %10119 = dma.done.wait (%p12212_p3), %s1111_s27, 4096  }
 0x216   : > { %10121 = vsyncadd (%p12212_p3), %s1111_s27, 4294963200  ;;  %s12213_s3 = sld [smem:[#allocation46_spill]]  ;;  %s10941_s13 = sshll.u32 %s10924_s21, 1 }
 0x217   : > { %s1123_s0 = scalar_lea.vmem [#allocation6], %s10941_s13 }
 0x21c   : > { %s10938_s19 = sand.u32 1, %s12213_s3  }
 0x21d   : > { %s1120_s7 = scalar_lea.sflag [#allocation7], %s10938_s19 }
 0x21e   : > { %10123 = dma.done.wait (%p12212_p3), %s1120_s7, 64  }
 0x21f   : > { %10125 = vsyncadd (%p12212_p3), %s1120_s7, 4294967232  ;;  %s12214_s4 = sld [smem:[#allocation43_spill]]  ;;  %s1132_s8 = scalar_lea.vmem [#allocation8], %s10941_s13 }
 0x220   : > { %s12215_s1 = sld [smem:[#allocation50_spill]]  ;;  %s1138_s14 = scalar_lea.sflag [#allocation10], %s10938_s19 }
 0x225   : > { %s1139_s12 = sand.u32 1, %s12214_s4  }
 0x226   : > { %s7929_s25 = sshll.u32 %s1139_s12, 9  ;;  %p12216_p11 = scmp.ne.s32.totalorder %s12215_s1, 0 }
 0x227   : > { %s10952_s5 = scalar_lea.vmem [#allocation9], %s7929_s25 }
 0x228   : > { %10127 = dma.done.wait (%p12216_p11), %s1138_s14, 8224  }
 0x229   : > { %10129 = vsyncadd (%p12216_p11), %s1138_s14, 4294959072  ;;  %s10958_s2 = sshll.u32 %s1139_s12, 1  ;;  %s1156_s22 = scalar_lea.sflag [#allocation13], %s10938_s19 }
 0x22a   : > { %10131 = dma.done.wait (%p12216_p11), %s1156_s22, 32  }
 0x22b   : > { %10133 = vsyncadd (%p12216_p11), %s1156_s22, 4294967264  ;;  %p12217_p4 = scmp.eq.s32.totalorder %s12213_s3, 0 }
 0x22d   : > { %10135 = dma.done.wait (%p12217_p4), [#allocation13], 4096   ;;  %p12218_p12 = pmov %p12217_p4 }
 0x22e   : > { %p12219_p13 = pmov %p12217_p4 }
 0x22f   : > { %10137 = vsyncadd (%p12218_p12), [#allocation13], 4294963200 }
 0x230   : > { %10139 = dma.done.wait (%p12219_p13), [#allocation16], 64   ;;  %p12220_p8 = pmov %p12217_p4 }
 0x231   : > { %s8761_s23 = smul.u32 768, %s10924_s21  ;;  %s1177_s6 = scalar_lea.sflag [#allocation19], %s10938_s19 }
 0x232   : > { %10141 = vsyncadd (%p12220_p8), [#allocation16], 4294967232 }
 0x233   : > { %s10977_s27 = scalar_lea.vmem [#allocation18], %s8761_s23 }
 0x234   : > { %10143 = dma.done.wait (%p12212_p3), %s1177_s6, 16384  }
 0x235   : > { %10145 = vsyncadd (%p12212_p3), %s1177_s6, 4294950912  ;;  %s10984_s7 = scalar_lea.vmem [#allocation20], %s10927_s29  ;;  %s1195_s4 = scalar_lea.sflag [#allocation22], %s10938_s19 }
 0x236   : > { %10147 = dma.done.wait (%p12212_p3), %s1195_s4, 4128  }
 0x237   : > { %10149 = vsyncadd (%p12212_p3), %s1195_s4, 4294963168  ;;  %s10993_s12 = scalar_lea.vmem [#allocation23], %s10927_s29  ;;  %s1213_s25 = scalar_lea.sflag [#allocation25], %s10938_s19 }
 0x238   : > { %10151 = dma.done.wait (%p12212_p3), %s1213_s25, 1056  }
 0x239   : > { %10153 = vsyncadd (%p12212_p3), %s1213_s25, 4294966240  ;;  %s7939_s22 = sshll.u32 %s10924_s21, 6  ;;  %s1231_s6 = scalar_lea.sflag [#allocation28], %s10938_s19 }
 0x23a   : > { %s11002_s23 = scalar_lea.vmem [#allocation26], %s7939_s22 }
 0x23b   : > { %10155 = dma.done.wait (%p12212_p3), %s1231_s6, 4128  }
 0x23c   : > { %10157 = vsyncadd (%p12212_p3), %s1231_s6, 4294963168  ;;  %s11011_s30 = scalar_lea.vmem [#allocation29], %s10927_s29  ;;  %s1249_s25 = scalar_lea.sflag [#allocation31], %s10924_s21 }
 0x23d   : > { %10159 = dma.done.wait (%p12212_p3), %s1249_s25, 32  }
 0x23e   : > { %10161 = vsyncadd (%p12212_p3), %s1249_s25, 4294967264  ;;  %s12221_s14 = sld [smem:[#allocation54_spill]]  ;;  %p12222_p5 = scmp.ne.s32.totalorder %s12213_s3, 0 }
 0x23f   : > { %s12223_s18 = sld [smem:[#allocation53_spill]] (!%p12222_p5) }
 0x240   : > { %1419 = sbr.rel (%p12222_p5) target bundleno = 584 (0x248), region = 188 }
 0x244   : > { %v11022_v0 = vld [vmem:[%s12221_s14] sm:$0xff]  ;;  %v11027_v1 = vld [vmem:[%s12221_s14 + $0x8] sm:$0xff] }
 0x245   : > { %v1420_v2 = vld [vmem:[%s12223_s18] sm:$0xff]  ;;  %v1421_v3 = vld [vmem:[%s12223_s18 + $0x8] sm:$0xff]  ;;  %v1422_v4 = vld [vmem:[%s12223_s18 + $0x10] sm:$0xff] }
 0x246   : > { %1424 = vst [vmem:[#allocation2 + $0x10] sm:$0xff] %v1420_v2  ;;  %1425 = vst [vmem:[#allocation2] sm:$0xff] %v1421_v3  ;;  %v1423_v5 = vld [vmem:[%s12223_s18 + $0x18] sm:$0xff] }
 0x247   : > { %1426 = vst [vmem:[#allocation2 + $0x18] sm:$0xff] %v1422_v4  ;;  %1427 = vst [vmem:[#allocation2 + $0x8] sm:$0xff] %v1423_v5 }
 0x248 PF: > { %s12224_s3 = sld [smem:[#allocation46_spill]] }
 0x24e   : > { %p7944_p2 = scmp.ge.s32.totalorder %s12224_s3, 4 }
 0x24f   : > { %s10216_s21 = smov (!%p7944_p2), 64   ;;  %s10217_s29 = smov (!%p7944_p2), 32  }
 0x250   : > { %1431 = sbr.rel (%p7944_p2) target bundleno = 8805 (0x2265), region = 192  ;;  %s12226_s25 = sld [smem:[#allocation55_spill]] (!%p7944_p2) }
 0x251   : > { %s12230_s3 = scalar_lea.vmem (!%p7944_p2), [#allocation24], %s10941_s13  ;;  %s12231_s1 = sld [smem:[#allocation57_spill]] (!%p7944_p2) }
 0x255   : > { %v8952_v6 = vld [vmem:[%s10931_s26 + $0x74] ss:$8 sps:$4 sm:$0xff]   ;;  %v8954_v7 = vld [vmem:[%s10931_s26 + $0x70] ss:$8 sps:$4 sm:$0xff]   ;;  %v10214_v8 = vmov 0   ;;  %v11060_v20 = vld [vmem:[#allocation2] sm:$0xff] }
 0x256   : > { %8891 = vset.pattern.permute.xlu0 %v10214_v8  ;;  %1649 = vmatprep.subr.bf16.mxu0 %v8952_v6  ;;  %v8955_v9 = vld [vmem:[%s10931_s26 + $0x64] ss:$8 sps:$4 sm:$0xff]   ;;  %v8957_v10 = vld [vmem:[%s10931_s26 + $0x60] ss:$8 sps:$4 sm:$0xff]   ;;  %v8958_v11 = vld [vmem:[%s10931_s26 + $0x54] ss:$8 sps:$4 sm:$0xff]   ;;  %s12227_s19 = smov %s12226_s25 }
 0x257   : > { %1695 = vperm.xlu0 %8891, %v11022_v0   ;;  %1650 = vmatpush1.bf16.msra.mxu0 %v8954_v7  ;;  %v8960_v12 = vld [vmem:[%s10931_s26 + $0x50] ss:$8 sps:$4 sm:$0xff]   ;;  %v8961_v13 = vld [vmem:[%s10931_s26 + $0x44] ss:$8 sps:$4 sm:$0xff]   ;;  %v8963_v14 = vld [vmem:[%s10931_s26 + $0x40] ss:$8 sps:$4 sm:$0xff]   ;;  %s12232_s6 = smov %s12231_s1 }
 0x258   : > { %1651 = vmatprep.subr.bf16.mxu0 %v8955_v9  ;;  %v8964_v15 = vld [vmem:[%s10931_s26 + $0x34] ss:$8 sps:$4 sm:$0xff]   ;;  %v8966_v16 = vld [vmem:[%s10931_s26 + $0x30] ss:$8 sps:$4 sm:$0xff]   ;;  %v8967_v17 = vld [vmem:[%s10931_s26 + $0x24] ss:$8 sps:$4 sm:$0xff]  }
 0x259   : > { %v8969_v18 = vld [vmem:[%s10931_s26 + $0x20] ss:$8 sps:$4 sm:$0xff]   ;;  %v8970_v19 = vld [vmem:[%s10931_s26 + $0x14] ss:$8 sps:$4 sm:$0xff]   ;;  %v8972_v22 = vld [vmem:[%s10931_s26 + $0x10] ss:$8 sps:$4 sm:$0xff]  }
 0x25a   : > { %v11062_v21 = vld [vmem:[#allocation2 + $0x8] sm:$0xff]  ;;  %v9002_v25 = vld [vmem:[%s10977_s27 + $0x150] ss:$24 sps:$4 sm:$0xff]   ;;  %v9006_v27 = vld [vmem:[%s10977_s27 + $0x124] ss:$24 sps:$4 sm:$0xff]   ;;  %vm2494_vm0 = vcmask 261120  }
 0x25b   : > { %1700 = vperm.xlu0 %8891, %v11027_v1   ;;  %1652 = vmatpush1.bf16.msra.mxu0 %v8957_v10  ;;  %v1444_v23 = vpack.c.bf16 %v11062_v21, %v11060_v20  ;;  %v9000_v24 = vld [vmem:[%s10977_s27 + $0x154] ss:$24 sps:$4 sm:$0xff]   ;;  %v8973_v26 = vld [vmem:[%s10931_s26 + $0x4] ss:$8 sps:$4 sm:$0xff]   ;;  %v8976_v30 = vld [vmem:[%s10931_s26 + $0xf4] ss:$8 sps:$4 sm:$0xff]  }
 0x25c   : > { %1653 = vmatprep.subr.bf16.mxu0 %v8958_v11  ;;  %2332 = vmatprep.subr.bf16.mxu1 %v9000_v24  ;;  %v9008_v28 = vld [vmem:[%s10977_s27 + $0x120] ss:$24 sps:$4 sm:$0xff]   ;;  %v8975_v29 = vld [vmem:[%s10931_s26] ss:$8 sps:$4 sm:$0xff]   ;;  %v9014_v32 = vld [vmem:[%s10977_s27 + $0xf0] ss:$24 sps:$4 sm:$0xff]  }
 0x25d   : > { %1681 = vmatprep.mubr.bf16.mxu0 %v1444_v23  ;;  %2333 = vmatpush1.bf16.msra.mxu1 %v9002_v25  ;;  %v9012_v31 = vld [vmem:[%s10977_s27 + $0xf4] ss:$24 sps:$4 sm:$0xff]   ;;  %v8978_v33 = vld [vmem:[%s10931_s26 + $0xf0] ss:$8 sps:$4 sm:$0xff]   ;;  %v8979_v35 = vld [vmem:[%s10931_s26 + $0xe4] ss:$8 sps:$4 sm:$0xff]  }
 0x25e   : > { %2334 = vmatprep.subr.bf16.mxu1 %v9006_v27  ;;  %v9018_v34 = vld [vmem:[%s10977_s27 + $0xc4] ss:$24 sps:$4 sm:$0xff]   ;;  %v8981_v36 = vld [vmem:[%s10931_s26 + $0xe0] ss:$8 sps:$4 sm:$0xff]   ;;  %v9020_v37 = vld [vmem:[%s10977_s27 + $0xc0] ss:$24 sps:$4 sm:$0xff]  }
 0x25f   : > { %1654 = vmatpush1.bf16.msra.mxu0 %v8960_v12  ;;  %v8982_v38 = vld [vmem:[%s10931_s26 + $0xd4] ss:$8 sps:$4 sm:$0xff]   ;;  %v8984_v39 = vld [vmem:[%s10931_s26 + $0xd0] ss:$8 sps:$4 sm:$0xff]   ;;  %v8985_v40 = vld [vmem:[%s10931_s26 + $0xc4] ss:$8 sps:$4 sm:$0xff]  }
 0x260   : > { %1655 = vmatprep.subr.bf16.mxu0 %v8961_v13  ;;  %v8987_v41 = vld [vmem:[%s10931_s26 + $0xc0] ss:$8 sps:$4 sm:$0xff]   ;;  %v8988_v42 = vld [vmem:[%s10931_s26 + $0xb4] ss:$8 sps:$4 sm:$0xff]   ;;  %v8990_v43 = vld [vmem:[%s10931_s26 + $0xb0] ss:$8 sps:$4 sm:$0xff]  }
 0x261   : > { %2335 = vmatpush1.bf16.msra.mxu1 %v9008_v28  ;;  %v8991_v44 = vld [vmem:[%s10931_s26 + $0xa4] ss:$8 sps:$4 sm:$0xff]   ;;  %v8993_v45 = vld [vmem:[%s10931_s26 + $0xa0] ss:$8 sps:$4 sm:$0xff]   ;;  %v8994_v46 = vld [vmem:[%s10931_s26 + $0x94] ss:$8 sps:$4 sm:$0xff]  }
 0x262   : > { %2336 = vmatprep.subr.bf16.mxu1 %v9012_v31  ;;  %v8996_v47 = vld [vmem:[%s10931_s26 + $0x90] ss:$8 sps:$4 sm:$0xff]   ;;  %v8997_v48 = vld [vmem:[%s10931_s26 + $0x84] ss:$8 sps:$4 sm:$0xff]   ;;  %v8999_v49 = vld [vmem:[%s10931_s26 + $0x80] ss:$8 sps:$4 sm:$0xff]  }
 0x263   : > { %1656 = vmatpush1.bf16.msra.mxu0 %v8963_v14  ;;  %v11093_v50 = vld [vmem:[#allocation2 + $0x10] sm:$0xff]  ;;  %v11095_v51 = vld [vmem:[#allocation2 + $0x18] sm:$0xff]  ;;  %v9003_v53 = vld [vmem:[%s10977_s27 + $0x158] ss:$24 sps:$4 sm:$0xff]   ;;  %s10215_s26 = smov 96   ;;  %vm2582_vm1 = vcmask 130048  }
 0x264   : > { %1657 = vmatprep.subr.bf16.mxu0 %v8964_v15  ;;  %v9005_v52 = vld [vmem:[%s10977_s27 + $0x15c] ss:$24 sps:$4 sm:$0xff]   ;;  %v1443_v54 = vpack.c.bf16 %v11095_v51, %v11093_v50  ;;  %v9011_v55 = vld [vmem:[%s10977_s27 + $0x12c] ss:$24 sps:$4 sm:$0xff]   ;;  %v9009_v56 = vld [vmem:[%s10977_s27 + $0x128] ss:$24 sps:$4 sm:$0xff]  }
 0x265   : > { %2337 = vmatpush1.bf16.msra.mxu1 %v9014_v32  ;;  %v9017_v57 = vld [vmem:[%s10977_s27 + $0xfc] ss:$24 sps:$4 sm:$0xff]   ;;  %v9015_v58 = vld [vmem:[%s10977_s27 + $0xf8] ss:$24 sps:$4 sm:$0xff]   ;;  %v9023_v59 = vld [vmem:[%s10977_s27 + $0xcc] ss:$24 sps:$4 sm:$0xff]  }
 0x266   : > { %2338 = vmatprep.subr.bf16.mxu1 %v9018_v34  ;;  %v9021_v60 = vld [vmem:[%s10977_s27 + $0xc8] ss:$24 sps:$4 sm:$0xff]   ;;  %v9024_v61 = vld [vmem:[%s10977_s27 + $0x94] ss:$24 sps:$4 sm:$0xff]   ;;  %v9027_v2 = vld [vmem:[%s10977_s27 + $0x98] ss:$24 sps:$4 sm:$0xff]  }
 0x267   : > { %1658 = vmatpush1.bf16.msra.mxu0 %v8966_v16  ;;  %v9026_v62 = vld [vmem:[%s10977_s27 + $0x90] ss:$24 sps:$4 sm:$0xff]   ;;  %v9029_v63 = vld [vmem:[%s10977_s27 + $0x9c] ss:$24 sps:$4 sm:$0xff]   ;;  %v9032_v4 = vld [vmem:[%s10977_s27 + $0x60] ss:$24 sps:$4 sm:$0xff]  }
 0x268   : > { %1659 = vmatprep.subr.bf16.mxu0 %v8967_v17  ;;  %v9030_v3 = vld [vmem:[%s10977_s27 + $0x64] ss:$24 sps:$4 sm:$0xff]   ;;  %v9033_v6 = vld [vmem:[%s10977_s27 + $0x68] ss:$24 sps:$4 sm:$0xff]   ;;  %v9036_v7 = vld [vmem:[%s10977_s27 + $0x34] ss:$24 sps:$4 sm:$0xff]  }
 0x269   : > { %2339 = vmatpush1.bf16.msra.mxu1 %v9020_v37  ;;  %v9035_v5 = vld [vmem:[%s10977_s27 + $0x6c] ss:$24 sps:$4 sm:$0xff]   ;;  %v9038_v9 = vld [vmem:[%s10977_s27 + $0x30] ss:$24 sps:$4 sm:$0xff]   ;;  %v9041_v10 = vld [vmem:[%s10977_s27 + $0x3c] ss:$24 sps:$4 sm:$0xff]  }
 0x26a   : > { %2340 = vmatprep.subr.bf16.mxu1 %v9024_v61  ;;  %v9039_v11 = vld [vmem:[%s10977_s27 + $0x38] ss:$24 sps:$4 sm:$0xff]   ;;  %v9042_v12 = vld [vmem:[%s10977_s27 + $0x4] ss:$24 sps:$4 sm:$0xff]   ;;  %v9045_v15 = vld [vmem:[%s10977_s27 + $0x8] ss:$24 sps:$4 sm:$0xff]  }
 0x26b   : > { %1660 = vmatpush1.bf16.msra.mxu0 %v8969_v18  ;;  %v9044_v13 = vld [vmem:[%s10977_s27] ss:$24 sps:$4 sm:$0xff]   ;;  %v9047_v14 = vld [vmem:[%s10977_s27 + $0xc] ss:$24 sps:$4 sm:$0xff]   ;;  %v9050_v17 = vld [vmem:[%s10977_s27 + $0x2d0] ss:$24 sps:$4 sm:$0xff]  }
 0x26c   : > { %1661 = vmatprep.subr.bf16.mxu0 %v8970_v19  ;;  %v9048_v16 = vld [vmem:[%s10977_s27 + $0x2d4] ss:$24 sps:$4 sm:$0xff]   ;;  %v9051_v19 = vld [vmem:[%s10977_s27 + $0x2d8] ss:$24 sps:$4 sm:$0xff]   ;;  %v9057_v25 = vld [vmem:[%s10977_s27 + $0x2a8] ss:$24 sps:$4 sm:$0xff]  }
 0x26d   : > { %2341 = vmatpush1.bf16.msra.mxu1 %v9026_v62  ;;  %v9053_v18 = vld [vmem:[%s10977_s27 + $0x2dc] ss:$24 sps:$4 sm:$0xff]   ;;  %v9056_v23 = vld [vmem:[%s10977_s27 + $0x2a0] ss:$24 sps:$4 sm:$0xff]   ;;  %v9059_v24 = vld [vmem:[%s10977_s27 + $0x2ac] ss:$24 sps:$4 sm:$0xff]  }
 0x26e   : > { %2342 = vmatprep.subr.bf16.mxu1 %v9030_v3  ;;  %v9062_v27 = vld [vmem:[%s10977_s27 + $0x270] ss:$24 sps:$4 sm:$0xff]   ;;  %v9065_v28 = vld [vmem:[%s10977_s27 + $0x27c] ss:$24 sps:$4 sm:$0xff]   ;;  %v9068_v31 = vld [vmem:[%s10977_s27 + $0x240] ss:$24 sps:$4 sm:$0xff]  }
 0x26f   : > { %1662 = vmatpush1.bf16.msra.mxu0 %v8972_v22  ;;  %v9054_v22 = vld [vmem:[%s10977_s27 + $0x2a4] ss:$24 sps:$4 sm:$0xff]   ;;  %v9072_v34 = vld [vmem:[%s10977_s27 + $0x214] ss:$24 sps:$4 sm:$0xff]   ;;  %v9075_v37 = vld [vmem:[%s10977_s27 + $0x218] ss:$24 sps:$4 sm:$0xff]  }
 0x270   : > { %1663 = vmatprep.subr.bf16.mxu0 %v8973_v26  ;;  %v9060_v26 = vld [vmem:[%s10977_s27 + $0x274] ss:$24 sps:$4 sm:$0xff]   ;;  %vm4130_vm2 = vcmask 523264   ;;  %vm4133_vm3 = vcmask 785408  }
 0x271   : > { %2343 = vmatpush1.bf16.msra.mxu1 %v9032_v4  ;;  %v9071_v32 = vld [vmem:[%s10977_s27 + $0x24c] ss:$24 sps:$4 sm:$0xff]  }
 0x272   : > { %2344 = vmatprep.subr.bf16.mxu1 %v9036_v7 }
 0x273   : > { %1664 = vmatpush1.bf16.msra.mxu0 %v8975_v29  ;;  %v9063_v29 = vld [vmem:[%s10977_s27 + $0x278] ss:$24 sps:$4 sm:$0xff]  }
 0x274   : > { %1665 = vmatprep.subr.bf16.mxu0 %v8976_v30  ;;  %v9066_v30 = vld [vmem:[%s10977_s27 + $0x244] ss:$24 sps:$4 sm:$0xff]  }
 0x275   : > { %2345 = vmatpush1.bf16.msra.mxu1 %v9038_v9 }
 0x276   : > { %2346 = vmatprep.subr.bf16.mxu1 %v9042_v12 }
 0x277   : > { %1666 = vmatpush2.bf16.msra.mxu0 %v8978_v33  ;;  %v9069_v33 = vld [vmem:[%s10977_s27 + $0x248] ss:$24 sps:$4 sm:$0xff]  }
 0x278   : > { %1667 = vmatprep.subr.bf16.mxu0 %v8979_v35  ;;  %v9074_v35 = vld [vmem:[%s10977_s27 + $0x210] ss:$24 sps:$4 sm:$0xff]  }
 0x279   : > { %2347 = vmatpush1.bf16.msra.mxu1 %v9044_v13 }
 0x27a   : > { %2348 = vmatprep.subr.bf16.mxu1 %v9048_v16 }
 0x27b   : > { %1668 = vmatpush2.bf16.msra.mxu0 %v8981_v36  ;;  %v9077_v36 = vld [vmem:[%s10977_s27 + $0x21c] ss:$24 sps:$4 sm:$0xff]  }
 0x27c   : > { %1669 = vmatprep.subr.bf16.mxu0 %v8982_v38  ;;  %v9078_v38 = vld [vmem:[%s10977_s27 + $0x1e4] ss:$24 sps:$4 sm:$0xff]  }
 0x27d   : > { %2349 = vmatpush2.bf16.msra.mxu1 %v9050_v17 }
 0x27e   : > { %2350 = vmatprep.subr.bf16.mxu1 %v9054_v22 }
 0x27f   : > { %1670 = vmatpush2.bf16.msra.mxu0 %v8984_v39  ;;  %v9080_v39 = vld [vmem:[%s10977_s27 + $0x1e0] ss:$24 sps:$4 sm:$0xff]  }
 0x280   : > { %1671 = vmatprep.subr.bf16.mxu0 %v8985_v40  ;;  %v9083_v40 = vld [vmem:[%s10977_s27 + $0x1ec] ss:$24 sps:$4 sm:$0xff]  }
 0x281   : > { %2351 = vmatpush2.bf16.msra.mxu1 %v9056_v23 }
 0x282   : > { %2352 = vmatprep.subr.bf16.mxu1 %v9060_v26 }
 0x283   : > { %1672 = vmatpush2.bf16.msra.mxu0 %v8987_v41  ;;  %v9081_v41 = vld [vmem:[%s10977_s27 + $0x1e8] ss:$24 sps:$4 sm:$0xff]  }
 0x284   : > { %1673 = vmatprep.subr.bf16.mxu0 %v8988_v42  ;;  %v9084_v42 = vld [vmem:[%s10977_s27 + $0x1b4] ss:$24 sps:$4 sm:$0xff]  }
 0x285   : > { %2353 = vmatpush2.bf16.msra.mxu1 %v9062_v27 }
 0x286   : > { %2354 = vmatprep.subr.bf16.mxu1 %v9066_v30 }
 0x287   : > { %1674 = vmatpush2.bf16.msra.mxu0 %v8990_v43  ;;  %v9086_v43 = vld [vmem:[%s10977_s27 + $0x1b0] ss:$24 sps:$4 sm:$0xff]  }
 0x288   : > { %1675 = vmatprep.subr.bf16.mxu0 %v8991_v44  ;;  %v9089_v44 = vld [vmem:[%s10977_s27 + $0x1bc] ss:$24 sps:$4 sm:$0xff]  }
 0x289   : > { %2355 = vmatpush2.bf16.msra.mxu1 %v9068_v31 }
 0x28a   : > { %2356 = vmatprep.subr.bf16.mxu1 %v9072_v34 }
 0x28b   : > { %1676 = vmatpush2.bf16.msra.mxu0 %v8993_v45  ;;  %v9087_v45 = vld [vmem:[%s10977_s27 + $0x1b8] ss:$24 sps:$4 sm:$0xff]  }
 0x28c   : > { %1677 = vmatprep.subr.bf16.mxu0 %v8994_v46  ;;  %v9090_v46 = vld [vmem:[%s10977_s27 + $0x184] ss:$24 sps:$4 sm:$0xff]  }
 0x28d   : > { %2357 = vmatpush2.bf16.msra.mxu1 %v9074_v35 }
 0x28e   : > { %2358 = vmatprep.subr.bf16.mxu1 %v9078_v38 }
 0x28f   : > { %1678 = vmatpush2.bf16.msra.mxu0 %v8996_v47  ;;  %v9092_v47 = vld [vmem:[%s10977_s27 + $0x180] ss:$24 sps:$4 sm:$0xff]  }
 0x290   : > { %1679 = vmatprep.subr.bf16.mxu0 %v8997_v48  ;;  %v9093_v48 = vld [vmem:[%s10977_s27 + $0x188] ss:$24 sps:$4 sm:$0xff]  }
 0x291   : > { %2359 = vmatpush2.bf16.msra.mxu1 %v9080_v39 }
 0x292   : > { %2360 = vmatprep.subr.bf16.mxu1 %v9084_v42 }
 0x293   : > { %1680 = vmatpush2.bf16.msra.mxu0 %v8999_v49  ;;  %v9095_v49 = vld [vmem:[%s10977_s27 + $0x18c] ss:$24 sps:$4 sm:$0xff]  }
 0x294   : > { %2375 = vmatprep.subr.bf16.mxu0 %v9005_v52  ;;  %v9098_v52 = vld [vmem:[%s10977_s27 + $0x164] ss:$24 sps:$4 sm:$0xff]  }
 0x295   : > { %2361 = vmatpush2.bf16.msra.mxu1 %v9086_v43 }
 0x296   : > { %1682 = vmatmul.mubr.bf16.vlgmr.msra.gmra.mxu0 %v1443_v54  ;;  %2362 = vmatprep.subr.bf16.mxu1 %v9090_v46 }
 0x297   : > { %2376 = vmatpush1.bf16.msra.mxu0 %v9003_v53  ;;  %v1479_v53 = vlaneseq }
 0x298   : > { %2377 = vmatprep.subr.bf16.mxu0 %v9011_v55 }
 0x299   : > { %2363 = vmatpush2.bf16.msra.mxu1 %v9092_v47  ;;  %v1480_v54 = vshrl.u32 %v1479_v53, 7  ;;  %v9096_v47 = vld [vmem:[%s10977_s27 + $0x160] ss:$24 sps:$4 sm:$0xff]   ;;  %v9110_v53 = vld [vmem:[%s10977_s27 + $0xa4] ss:$24 sps:$4 sm:$0xff]  }
 0x29a   : > { %2418 = vmatprep.subr.bf16.mxu1 %v9098_v52  ;;  %v9105_v52 = vld [vmem:[%s10977_s27 + $0xd0] ss:$24 sps:$4 sm:$0xff]  }
 0x29b   : > { %2378 = vmatpush1.bf16.msra.mxu0 %v9009_v56  ;;  %v11156_v55 = vsub.s32 0, %v1480_v54  ;;  %v1692_v56 = vld [vmem:[%s1132_s8] sm:$0x3] }
 0x29c   : > { %2379 = vmatprep.subr.bf16.mxu0 %v9017_v57  ;;  %v11160_v57 = vsub.s32 1, %v1480_v54  ;;  %v9108_v54 = vld [vmem:[%s10977_s27 + $0xa0] ss:$24 sps:$4 sm:$0xff]  }
 0x29e   : > { %v1711_v61 = vrot.slane %v1692_v56, %v11160_v57 }
 0x29f   : > { %2380 = vmatpush1.bf16.msra.mxu0 %v9015_v58  ;;  %v1477_v58 = vld [vmem:[%s1123_s0] sm:$0x3] }
 0x2a0   : > { %2381 = vmatprep.subr.bf16.mxu0 %v9023_v59  ;;  %v1707_v59 = vrot.slane %v1692_v56, %v11156_v55  ;;  %v1482_v62 = vrot.slane %v1477_v58, %v11156_v55  ;;  %v9113_v56 = vld [vmem:[%s10977_s27 + $0x74] ss:$24 sps:$4 sm:$0xff]  }
 0x2a3   : > { %2382 = vmatpush1.bf16.msra.mxu0 %v9021_v60 }
 0x2a4   : > { %2383 = vmatprep.subr.bf16.mxu0 %v9029_v63 }
 0x2a7   : > { %2384 = vmatpush1.bf16.msra.mxu0 %v9027_v2  ;;  %v1486_v2 = vrot.slane %v1477_v58, %v11160_v57  ;;  %v9111_v58 = vld [vmem:[%s10977_s27 + $0x70] ss:$24 sps:$4 sm:$0xff]  }
 0x2a8   : > { %2385 = vmatprep.subr.bf16.mxu0 %v9035_v5 }
 0x2ab   : > { %2386 = vmatpush1.bf16.msra.mxu0 %v9033_v6 }
 0x2ac   : > { %2387 = vmatprep.subr.bf16.mxu0 %v9041_v10 }
 0x2af   : > { %2388 = vmatpush1.bf16.msra.mxu0 %v9039_v11 }
 0x2b0   : > { %2389 = vmatprep.subr.bf16.mxu0 %v9047_v14 }
 0x2b3   : > { %2390 = vmatpush1.bf16.msra.mxu0 %v9045_v15 }
 0x2b4   : > { %2391 = vmatprep.subr.bf16.mxu0 %v9053_v18 }
 0x2b7   : > { %2392 = vmatpush2.bf16.msra.mxu0 %v9051_v19 }
 0x2b8   : > { %2393 = vmatprep.subr.bf16.mxu0 %v9059_v24 }
 0x2bb   : > { %2394 = vmatpush2.bf16.msra.mxu0 %v9057_v25 }
 0x2bc   : > { %2395 = vmatprep.subr.bf16.mxu0 %v9065_v28 }
 0x2bf   : > { %2396 = vmatpush2.bf16.msra.mxu0 %v9063_v29 }
 0x2c0   : > { %2397 = vmatprep.subr.bf16.mxu0 %v9071_v32 }
 0x2c3   : > { %2398 = vmatpush2.bf16.msra.mxu0 %v9069_v33 }
 0x2c4   : > { %2399 = vmatprep.subr.bf16.mxu0 %v9077_v36 }
 0x2c7   : > { %2400 = vmatpush2.bf16.msra.mxu0 %v9075_v37 }
 0x2c8   : > { %2401 = vmatprep.subr.bf16.mxu0 %v9083_v40 }
 0x2cb   : > { %2402 = vmatpush2.bf16.msra.mxu0 %v9081_v41 }
 0x2cc   : > { %2403 = vmatprep.subr.bf16.mxu0 %v9089_v44 }
 0x2cf   : > { %2404 = vmatpush2.bf16.msra.mxu0 %v9087_v45 }
 0x2d0   : > { %2405 = vmatprep.subr.bf16.mxu0 %v9095_v49  ;;  %v9101_v49 = vld [vmem:[%s10977_s27 + $0x134] ss:$24 sps:$4 sm:$0xff]  }
 0x2d2   : > { %v1696_v60 = vpop.permute.xlu0 %1695 }
 0x2d3   : > { %2406 = vmatpush2.bf16.msra.mxu0 %v9093_v48  ;;  %v1714_v63 = vmul.f32 %v1707_v59, %v1696_v60  ;;  %v1715_v4 = vmul.f32 %v1711_v61, %v1696_v60  ;;  %v9114_v60 = vld [vmem:[%s10977_s27 + $0x40] ss:$24 sps:$4 sm:$0xff]  }
 0x2d6   : > { %v1701_v6 = vpop.permute.xlu0 %1700 }
 0x2d7   : > { %v1716_v13 = vmul.f32 %v1707_v59, %v1701_v6  ;;  %v1717_v16 = vmul.f32 %v1711_v61, %v1701_v6  ;;  %v9116_v59 = vld [vmem:[%s10977_s27 + $0x44] ss:$24 sps:$4 sm:$0xff]   ;;  %v9119_v61 = vld [vmem:[%s10977_s27 + $0x14] ss:$24 sps:$4 sm:$0xff]   ;;  %v9126_v6 = vld [vmem:[%s10977_s27 + $0x280] ss:$24 sps:$4 sm:$0xff]  }
 0x356   : > { %v1683_v3 = vpop.f32.mrf.mxu0 }
 0x357   : > { %v1684_v5 = vadd.f32 %v1683_v3, %v1482_v62  ;;  %v9125_v3 = vld [vmem:[%s10977_s27 + $0x2b4] ss:$24 sps:$4 sm:$0xff]  }
 0x358   : > { %v1685_v7 = vpop.f32.mrf.mxu0 }
 0x359   : > { %v1718_v9 = vadd.f32 %v1714_v63, %v1684_v5  ;;  %v1686_v10 = vadd.f32 %v1685_v7, %v1486_v2  ;;  %v9122_v63 = vld [vmem:[%s10977_s27 + $0x2e4] ss:$24 sps:$4 sm:$0xff]   ;;  %v9131_v7 = vld [vmem:[%s10977_s27 + $0x254] ss:$24 sps:$4 sm:$0xff]  }
 0x35a   : > { %v1687_v11 = vpop.f32.mrf.mxu0  ;;  %v9128_v5 = vld [vmem:[%s10977_s27 + $0x284] ss:$24 sps:$4 sm:$0xff]  }
 0x35b   : > { %v7977_v12 = vmul.f32 -1.442695, %v1718_v9  ;;  %v1719_v14 = vadd.f32 %v1715_v4, %v1686_v10  ;;  %v1688_v15 = vadd.f32 %v1687_v11, %v1482_v62  ;;  %v9117_v62 = vld [vmem:[%s10977_s27 + $0x10] ss:$24 sps:$4 sm:$0xff]   ;;  %v9134_v10 = vld [vmem:[%s10977_s27 + $0x224] ss:$24 sps:$4 sm:$0xff]  }
 0x35c   : > { %v1689_v17 = vpop.f32.mrf.mxu0  ;;  %v9123_v4 = vld [vmem:[%s10977_s27 + $0x2b0] ss:$24 sps:$4 sm:$0xff]   ;;  %v9132_v11 = vld [vmem:[%s10977_s27 + $0x220] ss:$24 sps:$4 sm:$0xff]  }
 0x35d   : > { %9300 = vpow2.f32 %v7977_v12  ;;  %v7978_v18 = vmul.f32 -1.442695, %v1719_v14  ;;  %v1720_v19 = vadd.f32 %v1716_v13, %v1688_v15  ;;  %v1690_v22 = vadd.f32 %v1689_v17, %v1486_v2  ;;  %v9120_v2 = vld [vmem:[%s10977_s27 + $0x2e0] ss:$24 sps:$4 sm:$0xff]   ;;  %v9137_v12 = vld [vmem:[%s10977_s27 + $0x1f4] ss:$24 sps:$4 sm:$0xff]  }
 0x35e   : > { %v9135_v13 = vld [vmem:[%s10977_s27 + $0x1f0] ss:$24 sps:$4 sm:$0xff]   ;;  %v9138_v15 = vld [vmem:[%s10977_s27 + $0x1c0] ss:$24 sps:$4 sm:$0xff]  }
 0x35f   : > { %9302 = vpow2.f32 %v7978_v18  ;;  %v7979_v23 = vmul.f32 -1.442695, %v1720_v19  ;;  %v1721_v24 = vadd.f32 %v1717_v16, %v1690_v22  ;;  %v9143_v16 = vld [vmem:[%s10977_s27 + $0x194] ss:$24 sps:$4 sm:$0xff]   ;;  %v9141_v17 = vld [vmem:[%s10977_s27 + $0x190] ss:$24 sps:$4 sm:$0xff]  }
 0x361   : > { %9304 = vpow2.f32 %v7979_v23  ;;  %v7980_v25 = vmul.f32 -1.442695, %v1721_v24 }
 0x363   : > { %9306 = vpow2.f32 %v7980_v25 }
 0x36a   : > { %v9301_v26 = vpop.eup %9300 }
 0x36b   : > { %v1734_v28 = vadd.f32 1.0, %v9301_v26 }
 0x36c   : > { %v9303_v27 = vpop.eup %9302 }
 0x36d   : > { %v1735_v29 = vadd.f32 1.0, %v9303_v27 }
 0x36e   : > { %v9305_v30 = vpop.eup %9304 }
 0x36f   : > { %9308 = vrcp.f32 %v1735_v29  ;;  %v1736_v31 = vadd.f32 1.0, %v9305_v30 }
 0x370   : > { %v9307_v32 = vpop.eup %9306  ;;  %9310 = vrcp.f32 %v1734_v28 }
 0x371   : > { %9312 = vrcp.f32 %v1736_v31  ;;  %v1737_v33 = vadd.f32 1.0, %v9307_v32 }
 0x373   : > { %9314 = vrcp.f32 %v1737_v33 }
 0x37c   : > { %v9309_v34 = vpop.eup %9308 }
 0x37d   : > { %v9311_v35 = vpop.eup %9310  ;;  %v1747_v37 = vmul.f32 %v9309_v34, %v1719_v14  ;;  %v9140_v14 = vld [vmem:[%s10977_s27 + $0x1c4] ss:$24 sps:$4 sm:$0xff]  }
 0x37e   : > { %v9313_v36 = vpop.eup %9312  ;;  %v1746_v40 = vmul.f32 %v9311_v35, %v1718_v9  ;;  %v9129_v9 = vld [vmem:[%s10977_s27 + $0x250] ss:$24 sps:$4 sm:$0xff]  }
 0x37f   : > { %v1748_v38 = vmul.f32 %v9313_v36, %v1720_v19  ;;  %v1751_v43 = vadd.f32 %v1747_v37, %v11060_v20  ;;  %v9099_v20 = vld [vmem:[%s10977_s27 + $0x130] ss:$24 sps:$4 sm:$0xff]  }
 0x380   : > { %v9315_v39 = vpop.eup %9314  ;;  %v1750_v45 = vadd.f32 %v1746_v40, %v11093_v50  ;;  %v9102_v50 = vld [vmem:[%s10977_s27 + $0x100] ss:$24 sps:$4 sm:$0xff]  }
 0x381   : > { %v1749_v41 = vmul.f32 %v9315_v39, %v1721_v24  ;;  %v1752_v42 = vadd.f32 %v1748_v38, %v11095_v51  ;;  %v9107_v51 = vld [vmem:[%s10977_s27 + $0xd4] ss:$24 sps:$4 sm:$0xff]  }
 0x383   : > { %v1753_v44 = vadd.f32 %v1749_v41, %v11062_v21  ;;  %v11173_v48 = vpack.c.bf16 %v1752_v42, %v1750_v45  ;;  %v9104_v21 = vld [vmem:[%s10977_s27 + $0x104] ss:$24 sps:$4 sm:$0xff]   ;;  %s12225_s27 = sld [smem:[#allocation56_spill]] }
 0x385   : > { %v1755_v46 = vpack.c.bf16 %v1753_v44, %v1751_v43 }
 0x387   : > { %2364 = vmatprep.mubr.bf16.mxu1 %v1755_v46  ;;  %2407 = vmatprep.mubr.bf16.mxu0 %v1755_v46 }
 0x388   : > { %2365 = vmatmul.mubr.bf16.vlgmr.msra.gmra.mxu1 %v11173_v48  ;;  %2408 = vmatmul.mubr.bf16.vlgmr.msra.gmra.mxu0 %v11173_v48 }
 0x389   : > { %2419 = vmatpush1.bf16.msra.mxu1 %v9096_v47  ;;  %2450 = vmatprep.mubr.bf16.mxu1 %v1755_v46  ;;  %v11267_v35 = vld [vmem:[%s12225_s27 + $0x8] sm:$0xff]  ;;  %v11272_v37 = vld [vmem:[%s12225_s27] sm:$0xff] }
 0x38a   : > { %2420 = vmatprep.subr.bf16.mxu1 %v9101_v49 }
 0x38d   : > { %2421 = vmatpush1.bf16.msra.mxu1 %v9099_v20 }
 0x38e   : > { %2422 = vmatprep.subr.bf16.mxu1 %v9104_v21 }
 0x391   : > { %2423 = vmatpush1.bf16.msra.mxu1 %v9102_v50 }
 0x392   : > { %2424 = vmatprep.subr.bf16.mxu1 %v9107_v51 }
 0x395   : > { %2425 = vmatpush1.bf16.msra.mxu1 %v9105_v52 }
 0x396   : > { %2426 = vmatprep.subr.bf16.mxu1 %v9110_v53 }
 0x399   : > { %2427 = vmatpush1.bf16.msra.mxu1 %v9108_v54 }
 0x39a   : > { %2428 = vmatprep.subr.bf16.mxu1 %v9113_v56 }
 0x39d   : > { %2429 = vmatpush1.bf16.msra.mxu1 %v9111_v58 }
 0x39e   : > { %2430 = vmatprep.subr.bf16.mxu1 %v9116_v59 }
 0x3a1   : > { %2431 = vmatpush1.bf16.msra.mxu1 %v9114_v60 }
 0x3a2   : > { %2432 = vmatprep.subr.bf16.mxu1 %v9119_v61 }
 0x3a5   : > { %2433 = vmatpush1.bf16.msra.mxu1 %v9117_v62 }
 0x3a6   : > { %2434 = vmatprep.subr.bf16.mxu1 %v9122_v63 }
 0x3a9   : > { %2435 = vmatpush2.bf16.msra.mxu1 %v9120_v2 }
 0x3aa   : > { %2436 = vmatprep.subr.bf16.mxu1 %v9125_v3 }
 0x3ad   : > { %2437 = vmatpush2.bf16.msra.mxu1 %v9123_v4 }
 0x3ae   : > { %2438 = vmatprep.subr.bf16.mxu1 %v9128_v5 }
 0x3b1   : > { %2439 = vmatpush2.bf16.msra.mxu1 %v9126_v6 }
 0x3b2   : > { %2440 = vmatprep.subr.bf16.mxu1 %v9131_v7 }
 0x3b5   : > { %2441 = vmatpush2.bf16.msra.mxu1 %v9129_v9 }
 0x3b6   : > { %2442 = vmatprep.subr.bf16.mxu1 %v9134_v10 }
 0x3b9   : > { %2443 = vmatpush2.bf16.msra.mxu1 %v9132_v11 }
 0x3ba   : > { %2444 = vmatprep.subr.bf16.mxu1 %v9137_v12 }
 0x3bd   : > { %2445 = vmatpush2.bf16.msra.mxu1 %v9135_v13 }
 0x3be   : > { %2446 = vmatprep.subr.bf16.mxu1 %v9140_v14 }
 0x3c1   : > { %2447 = vmatpush2.bf16.msra.mxu1 %v9138_v15 }
 0x3c2   : > { %2448 = vmatprep.subr.bf16.mxu1 %v9143_v16 }
 0x3c5   : > { %2449 = vmatpush2.bf16.msra.mxu1 %v9141_v17 }
 0x3c8   : > { %2451 = vmatmul.mubr.bf16.vlgmr.msra.gmra.mxu1 %v11173_v48 }
 0x448   : > { %v11208_v18 = vpop.f32.mrf.mxu1  ;;  %v11210_v19 = vpop.f32.mrf.mxu0 }
 0x449   : > { %2686 = vrot.lane.b32.xlu0 %v11208_v18, %s10215_s26  ;;  %8539 = vmatprep.mubr.msk.f32.mxu1 %vm2494_vm0, %v11208_v18 }
 0x44a   : > { %v11216_v22 = vpop.f32.mrf.mxu0  ;;  %v11228_v24 = vpop.f32.mrf.mxu1 }
 0x44c   : > { %v11218_v23 = vpop.f32.mrf.mxu0  ;;  %v11234_v25 = vpop.f32.mrf.mxu1 }
 0x44d   : > { %2692 = vrot.lane.b32.xlu1 %v11218_v23, %s10215_s26  ;;  %8535 = vmatprep.subr.msk.mxu1 %vm2494_vm0, %v11218_v23 }
 0x44e   : > { %8536 = vmatpush3.xpose.msk.msra.mxu1 %vm2494_vm0, %v11218_v23  ;;  %v11240_v26 = vpop.f32.mrf.mxu1  ;;  %v11280_v43 = vpop.f32.mrf.mxu0 }
 0x44f   : > { %8537 = vmatprep.subr.msk.mxu1 %vm2494_vm0, %v11210_v19 }
 0x451   : > { %2690 = vrot.lane.b32.xlu1 %v11210_v19, %s10215_s26 }
 0x452   : > { %8538 = vmatpush3.xpose.msk.msra.mxu1 %vm2494_vm0, %v11210_v19 }
 0x455   : > { %2688 = vrot.lane.b32.xlu1 %v11234_v25, %s10215_s26  ;;  %8540 = vmatmul.mubr.msk.f32.vlgmr.msra.gmra.mxu1 %vm2494_vm0, %v11234_v25 }
 0x488   : > { %v11242_v27 = vpop.f32.mrf.mxu1 }
 0x48a   : > { %v11244_v28 = vpop.f32.mrf.mxu1 }
 0x48c   : > { %v11246_v29 = vpop.f32.mrf.mxu1 }
 0x48d   : > { %8542 = vmatprep.subr.mxu1 %v11246_v29 }
 0x48e   : > { %8543 = vmatpush3.msra.mxu1 %v11246_v29  ;;  %v11256_v33 = vpop.f32.mrf.mxu1 }
 0x48f   : > { %8544 = vmatprep.subr.mxu1 %v11242_v27 }
 0x490   : > { %8545 = vmatpush3.msra.mxu1 %v11242_v27 }
 0x4bb   : > { %v2687_v30 = vpop.permute.xlu0 %2686 }
 0x4bc   : > { %8553 = vmatprep.mubr.msk.f32.mxu0 %vm2494_vm0, %v2687_v30 }
 0x4bf   : > { %v2693_v31 = vpop.permute.xlu1 %2692 }
 0x4c0   : > { %8549 = vmatprep.subr.msk.mxu0 %vm2494_vm0, %v2693_v31 }
 0x4c1   : > { %8550 = vmatpush3.xpose.msk.msra.mxu0 %vm2494_vm0, %v2693_v31 }
 0x4c3   : > { %v2691_v32 = vpop.permute.xlu1 %2690 }
 0x4c4   : > { %8551 = vmatprep.subr.msk.mxu0 %vm2494_vm0, %v2691_v32 }
 0x4c5   : > { %8552 = vmatpush3.xpose.msk.msra.mxu0 %vm2494_vm0, %v2691_v32 }
 0x4c6   : > { %8598 = vmatprep.subr.mxu0 %v11256_v33 }
 0x4c7   : > { %v2689_v34 = vpop.permute.xlu1 %2688 }
 0x4c8   : > { %8554 = vmatmul.mubr.msk.f32.vlgmr.msra.gmra.mxu0 %vm2494_vm0, %v2689_v34 }
 0x4c9   : > { %8599 = vmatpush3.msra.mxu0 %v11256_v33 }
 0x4ca   : > { %8600 = vmatprep.subr.mxu0 %v11244_v28 }
 0x4cb   : > { %8601 = vmatpush3.msra.mxu0 %v11244_v28 }
 0x515   : > { %v8541_v36 = vpop.f32.mrf.mxu1 }
 0x516   : > { %v2579_v38 = vadd.f32 %v8541_v36, %v11267_v35 }
 0x517   : > { %v2573_v39 = vpop.f32.mrf.mxu1 }
 0x518   : > { %v2574_v40 = vadd.f32 %v2573_v39, %v11272_v37  ;;  %v2586_v41 = vsel %vm2582_vm1, %v2579_v38, -inf }
 0x519   : > { %2587 = vmax.xlane.f32.xlu1 %v2586_v41 }
 0x51a   : > { %v2583_v42 = vsel %vm2582_vm1, %v2574_v40, -inf }
 0x51b   : > { %2584 = vmax.xlane.f32.xlu0 %v2583_v42 }
 0x52a   : > { %2803 = vrot.lane.b32.xlu1 %v11246_v29, %s10215_s26 }
 0x588   : > { %v8555_v44 = vpop.f32.mrf.mxu0 }
 0x589   : > { %v2774_v47 = vadd.f32 %v8555_v44, %v11267_v35 }
 0x58a   : > { %v2768_v45 = vpop.f32.mrf.mxu0 }
 0x58b   : > { %v2769_v46 = vadd.f32 %v2768_v45, %v11272_v37  ;;  %v2780_v49 = vsel %vm2582_vm1, %v2774_v47, -inf }
 0x58d   : > { %v2777_v48 = vsel %vm2582_vm1, %v2769_v46, -inf }
 0x58e   : > { %2778 = vmax.xlane.f32.xlu0 %v2777_v48 }
 0x592   : > { %2781 = vmax.xlane.f32.xlu0 %v2780_v49 }
 0x5a2   : > { %v2588_v20 = vpop.xlane.xlu1 %2587 }
 0x5a3   : > { %v2590_v21 = vsub.f32 %v2579_v38, %v2588_v20 }
 0x5a4   : > { %v2585_v50 = vpop.xlane.xlu0 %2584 }
 0x5a5   : > { %v2593_v51 = vmul.f32 1.442695, %v2590_v21  ;;  %v2589_v52 = vsub.f32 %v2574_v40, %v2585_v50 }
 0x5a6   : > { %v2804_v53 = vpop.permute.xlu1 %2803 }
 0x5a7   : > { %9316 = vpow2.f32 %v2593_v51  ;;  %v2591_v54 = vmul.f32 1.442695, %v2589_v52  ;;  %8556 = vmatprep.subr.mxu1 %v2804_v53 }
 0x5a9   : > { %9318 = vpow2.f32 %v2591_v54 }
 0x5b4   : > { %v9317_v56 = vpop.eup %9316 }
 0x5b5   : > { %v2598_v58 = vsel %vm2582_vm1, %v9317_v56, 0.0 }
 0x5b6   : > { %v9319_v59 = vpop.eup %9318  ;;  %2599 = vadd.xlane.f32.xlu0 %v2598_v58 }
 0x5b7   : > { %v2595_v60 = vsel %vm2582_vm1, %v9319_v59, 0.0 }
 0x5b8   : > { %2596 = vadd.xlane.f32.xlu1 %v2595_v60 }
 0x5c9   : > { %2894 = vrot.lane.b32.xlu1 %v11218_v23, %s10216_s21 }
 0x5cd   : > { %2892 = vrot.lane.b32.xlu1 %v11210_v19, %s10216_s21 }
 0x617   : > { %v2779_v61 = vpop.xlane.xlu0 %2778 }
 0x618   : > { %v2783_v62 = vsub.f32 %v2769_v46, %v2779_v61 }
 0x61a   : > { %v2785_v63 = vmul.f32 1.442695, %v2783_v62 }
 0x61b   : > { %v2782_v2 = vpop.xlane.xlu0 %2781 }
 0x61c   : > { %9320 = vpow2.f32 %v2785_v63  ;;  %v2784_v3 = vsub.f32 %v2774_v47, %v2782_v2 }
 0x61e   : > { %v2787_v4 = vmul.f32 1.442695, %v2784_v3 }
 0x620   : > { %9322 = vpow2.f32 %v2787_v4 }
 0x629   : > { %v9321_v5 = vpop.eup %9320 }
 0x62a   : > { %v2789_v6 = vsel %vm2582_vm1, %v9321_v5, 0.0 }
 0x62b   : > { %2790 = vadd.xlane.f32.xlu1 %v2789_v6 }
 0x62d   : > { %v9323_v7 = vpop.eup %9322 }
 0x62e   : > { %v2792_v9 = vsel %vm2582_vm1, %v9323_v7, 0.0 }
 0x62f   : > { %2793 = vadd.xlane.f32.xlu0 %v2792_v9 }
 0x63c   : > { %2890 = vrot.lane.b32.xlu1 %v11234_v25, %s10216_s21 }
 0x63f   : > { %v2600_v10 = vpop.xlane.xlu0 %2599 }
 0x640   : > { %9324 = vrcp.f32 %v2600_v10 }
 0x641   : > { %v2597_v11 = vpop.xlane.xlu1 %2596 }
 0x642   : > { %9326 = vrcp.f32 %v2597_v11 }
 0x645   : > { %2801 = vrot.lane.b32.xlu0 %v11242_v27, %s10215_s26  ;;  %v2895_v16 = vpop.permute.xlu1 %2894 }
 0x649   : > { %2888 = vrot.lane.b32.xlu0 %v11208_v18, %s10216_s21  ;;  %v2893_v17 = vpop.permute.xlu1 %2892 }
 0x64d   : > { %v9325_v12 = vpop.eup %9324 }
 0x64e   : > { %v2604_v15 = vmul.f32 %v9325_v12, %v9317_v56 }
 0x64f   : > { %v9327_v13 = vpop.eup %9326 }
 0x650   : > { %v2603_v14 = vmul.f32 %v9327_v13, %v9319_v59 }
 0x652   : > { %8546 = vmatprep.mubr.msk.f32.mxu1 %vm2582_vm1, %v2603_v14 }
 0x653   : > { %8547 = vmatmul.mubr.msk.f32.vlgmr.msra.gmra.mxu1 %vm2582_vm1, %v2604_v15 }
 0x654   : > { %8557 = vmatpush3.msra.mxu1 %v2804_v53 }
 0x6b4   : > { %v2791_v30 = vpop.xlane.xlu1 %2790 }
 0x6b5   : > { %9328 = vrcp.f32 %v2791_v30 }
 0x6b8   : > { %v2794_v31 = vpop.xlane.xlu0 %2793  ;;  %v2891_v41 = vpop.permute.xlu1 %2890 }
 0x6b9   : > { %9330 = vrcp.f32 %v2794_v31 }
 0x6bc   : > { %v2802_v32 = vpop.permute.xlu0 %2801 }
 0x6bd   : > { %8558 = vmatprep.subr.mxu1 %v2802_v32 }
 0x6be   : > { %8559 = vmatpush3.msra.mxu1 %v2802_v32 }
 0x6bf   : > { %8563 = vmatprep.subr.msk.mxu1 %vm2494_vm0, %v2895_v16 }
 0x6c0   : > { %v2889_v40 = vpop.permute.xlu0 %2888 }
 0x6c2   : > { %v9329_v34 = vpop.eup %9328 }
 0x6c3   : > { %v2797_v36 = vmul.f32 %v9329_v34, %v9321_v5 }
 0x6c5   : > { %8560 = vmatprep.mubr.msk.f32.mxu1 %vm2582_vm1, %v2797_v36 }
 0x6c6   : > { %v9331_v38 = vpop.eup %9330 }
 0x6c7   : > { %v2798_v39 = vmul.f32 %v9331_v38, %v9323_v7 }
 0x6c9   : > { %8561 = vmatmul.mubr.msk.f32.vlgmr.msra.gmra.mxu1 %vm2582_vm1, %v2798_v39 }
 0x6ca   : > { %8564 = vmatpush3.xpose.msk.msra.mxu1 %vm2494_vm0, %v2895_v16  ;;  %8567 = vmatprep.mubr.msk.f32.mxu1 %vm2494_vm0, %v2889_v40 }
 0x6cb   : > { %8565 = vmatprep.subr.msk.mxu1 %vm2494_vm0, %v2893_v17 }
 0x6ce   : > { %8566 = vmatpush3.xpose.msk.msra.mxu1 %vm2494_vm0, %v2893_v17 }
 0x6d1   : > { %8568 = vmatmul.mubr.msk.f32.vlgmr.msra.gmra.mxu1 %vm2494_vm0, %v2891_v41 }
 0x713   : > { %v11310_v42 = vpop.f32.mrf.mxu1 }
 0x715   : > { %v11312_v44 = vpop.f32.mrf.mxu1 }
 0x789   : > { %v11314_v45 = vpop.f32.mrf.mxu1 }
 0x78b   : > { %v11316_v46 = vpop.f32.mrf.mxu1 }
 0x78c   : > { %v8897_v47 = vpack.i.bf16 %v11314_v45, %v11316_v46 }
 0x791   : > { %v8569_v48 = vpop.f32.mrf.mxu1 }
 0x792   : > { %v2976_v49 = vadd.f32 %v8569_v48, %v11267_v35 }
 0x793   : > { %v2970_v20 = vpop.f32.mrf.mxu1 }
 0x794   : > { %v2971_v21 = vadd.f32 %v2970_v20, %v11272_v37  ;;  %v2982_v50 = vsel %vm2582_vm1, %v2976_v49, -inf }
 0x795   : > { %2983 = vmax.xlane.f32.xlu1 %v2982_v50 }
 0x796   : > { %v2979_v51 = vsel %vm2582_vm1, %v2971_v21, -inf }
 0x797   : > { %2980 = vmax.xlane.f32.xlu0 %v2979_v51 }
 0x7a6   : > { %3003 = vrot.lane.b32.xlu1 %v11246_v29, %s10216_s21 }
 0x7aa   : > { %3094 = vrot.lane.b32.xlu1 %v11218_v23, %s10217_s29 }
 0x7ae   : > { %3092 = vrot.lane.b32.xlu1 %v11210_v19, %s10217_s29 }
 0x7b2   : > { %3090 = vrot.lane.b32.xlu1 %v11234_v25, %s10217_s29 }
 0x81e   : > { %v2984_v52 = vpop.xlane.xlu1 %2983 }
 0x81f   : > { %v2986_v53 = vsub.f32 %v2976_v49, %v2984_v52 }
 0x820   : > { %v2981_v54 = vpop.xlane.xlu0 %2980 }
 0x821   : > { %v2989_v56 = vmul.f32 1.442695, %v2986_v53  ;;  %v2985_v58 = vsub.f32 %v2971_v21, %v2981_v54 }
 0x822   : > { %v3004_v59 = vpop.permute.xlu1 %3003 }
 0x823   : > { %9332 = vpow2.f32 %v2989_v56  ;;  %v2987_v60 = vmul.f32 1.442695, %v2985_v58  ;;  %8570 = vmatprep.subr.mxu1 %v3004_v59 }
 0x824   : > { %8571 = vmatpush3.msra.mxu1 %v3004_v59 }
 0x825   : > { %9334 = vpow2.f32 %v2987_v60 }
 0x826   : > { %v3095_v3 = vpop.permute.xlu1 %3094 }
 0x830   : > { %v9333_v61 = vpop.eup %9332 }
 0x831   : > { %v2994_v23 = vsel %vm2582_vm1, %v9333_v61, 0.0 }
 0x832   : > { %v9335_v62 = vpop.eup %9334  ;;  %2995 = vadd.xlane.f32.xlu0 %v2994_v23 }
 0x833   : > { %v2991_v19 = vsel %vm2582_vm1, %v9335_v62, 0.0 }
 0x836   : > { %2992 = vadd.xlane.f32.xlu0 %v2991_v19 }
 0x84c   : > { %3001 = vrot.lane.b32.xlu0 %v11242_v27, %s10216_s21 }
 0x850   : > { %3088 = vrot.lane.b32.xlu0 %v11208_v18, %s10217_s29  ;;  %v3093_v18 = vpop.permute.xlu1 %3092 }
 0x854   : > { %v3091_v10 = vpop.permute.xlu1 %3090 }
 0x8bb   : > { %v2996_v25 = vpop.xlane.xlu0 %2995 }
 0x8bc   : > { %9336 = vrcp.f32 %v2996_v25 }
 0x8bf   : > { %v2993_v63 = vpop.xlane.xlu0 %2992 }
 0x8c0   : > { %9338 = vrcp.f32 %v2993_v63 }
 0x8c3   : > { %v3002_v2 = vpop.permute.xlu0 %3001 }
 0x8c4   : > { %8572 = vmatprep.subr.mxu1 %v3002_v2 }
 0x8c5   : > { %8573 = vmatpush3.msra.mxu1 %v3002_v2 }
 0x8c6   : > { %8577 = vmatprep.subr.msk.mxu1 %vm2494_vm0, %v3095_v3 }
 0x8c7   : > { %v3089_v9 = vpop.permute.xlu0 %3088 }
 0x8c9   : > { %v9337_v4 = vpop.eup %9336 }
 0x8ca   : > { %v3000_v7 = vmul.f32 %v9337_v4, %v9333_v61 }
 0x8cd   : > { %v9339_v5 = vpop.eup %9338 }
 0x8ce   : > { %v2999_v6 = vmul.f32 %v9339_v5, %v9335_v62 }
 0x8d0   : > { %8574 = vmatprep.mubr.msk.f32.mxu1 %vm2582_vm1, %v2999_v6 }
 0x8d1   : > { %8575 = vmatmul.mubr.msk.f32.vlgmr.msra.gmra.mxu1 %vm2582_vm1, %v3000_v7 }
 0x8d2   : > { %8578 = vmatpush3.xpose.msk.msra.mxu1 %vm2494_vm0, %v3095_v3  ;;  %8581 = vmatprep.mubr.msk.f32.mxu1 %vm2494_vm0, %v3089_v9 }
 0x8d3   : > { %8579 = vmatprep.subr.msk.mxu1 %vm2494_vm0, %v3093_v18 }
 0x8d6   : > { %8580 = vmatpush3.xpose.msk.msra.mxu1 %vm2494_vm0, %v3093_v18 }
 0x8d9   : > { %8582 = vmatmul.mubr.msk.f32.vlgmr.msra.gmra.mxu1 %vm2494_vm0, %v3091_v10 }
 0x991   : > { %v11346_v11 = vpop.f32.mrf.mxu1 }
 0x993   : > { %v11348_v12 = vpop.f32.mrf.mxu1 }
 0x994   : > { %v8902_v13 = vpack.i.bf16 %v11346_v11, %v11348_v12 }
 0x999   : > { %v8583_v14 = vpop.f32.mrf.mxu1 }
 0x99a   : > { %v3176_v15 = vadd.f32 %v8583_v14, %v11267_v35 }
 0x99b   : > { %v3170_v16 = vpop.f32.mrf.mxu1 }
 0x99c   : > { %v3171_v17 = vadd.f32 %v3170_v16, %v11272_v37  ;;  %v3182_v30 = vsel %vm2582_vm1, %v3176_v15, -inf }
 0x99d   : > { %3183 = vmax.xlane.f32.xlu1 %v3182_v30 }
 0x99e   : > { %v3179_v31 = vsel %vm2582_vm1, %v3171_v17, -inf }
 0x99f   : > { %3180 = vmax.xlane.f32.xlu0 %v3179_v31 }
 0x9ae   : > { %3203 = vrot.lane.b32.xlu1 %v11246_v29, %s10217_s29 }
 0x9b2   : > { %3484 = vrot.lane.b32.xlu1 %v11280_v43, %s10215_s26 }
 0x9b6   : > { %3482 = vrot.lane.b32.xlu1 %v11216_v22, %s10215_s26 }
 0x9ba   : > { %3480 = vrot.lane.b32.xlu1 %v11240_v26, %s10215_s26 }
 0xa26   : > { %v3184_v32 = vpop.xlane.xlu1 %3183 }
 0xa27   : > { %v3186_v34 = vsub.f32 %v3176_v15, %v3184_v32 }
 0xa28   : > { %v3181_v36 = vpop.xlane.xlu0 %3180 }
 0xa29   : > { %v3189_v38 = vmul.f32 1.442695, %v3186_v34  ;;  %v3185_v39 = vsub.f32 %v3171_v17, %v3181_v36 }
 0xa2a   : > { %v3204_v40 = vpop.permute.xlu1 %3203 }
 0xa2b   : > { %9340 = vpow2.f32 %v3189_v38  ;;  %v3187_v41 = vmul.f32 1.442695, %v3185_v39  ;;  %8584 = vmatprep.subr.mxu1 %v3204_v40 }
 0xa2c   : > { %8585 = vmatpush3.msra.mxu1 %v3204_v40 }
 0xa2d   : > { %9342 = vpow2.f32 %v3187_v41 }
 0xa38   : > { %v9341_v29 = vpop.eup %9340 }
 0xa39   : > { %v3194_v48 = vsel %vm2582_vm1, %v9341_v29, 0.0 }
 0xa3a   : > { %v9343_v49 = vpop.eup %9342  ;;  %3195 = vadd.xlane.f32.xlu0 %v3194_v48 }
 0xa3b   : > { %v3191_v20 = vsel %vm2582_vm1, %v9343_v49, 0.0 }
 0xa3e   : > { %3192 = vadd.xlane.f32.xlu0 %v3191_v20 }
 0xa54   : > { %3201 = vrot.lane.b32.xlu0 %v11242_v27, %s10217_s29  ;;  %v3485_v27 = vpop.permute.xlu1 %3484 }
 0xa58   : > { %3478 = vrot.lane.b32.xlu0 %v11228_v24, %s10215_s26  ;;  %v3483_v59 = vpop.permute.xlu1 %3482 }
 0xa5c   : > { %v3481_v60 = vpop.permute.xlu1 %3480 }
 0xac3   : > { %v3196_v21 = vpop.xlane.xlu0 %3195 }
 0xac4   : > { %9344 = vrcp.f32 %v3196_v21 }
 0xac7   : > { %v3193_v50 = vpop.xlane.xlu0 %3192 }
 0xac8   : > { %9346 = vrcp.f32 %v3193_v50 }
 0xacb   : > { %v3202_v51 = vpop.permute.xlu0 %3201 }
 0xacc   : > { %8586 = vmatprep.subr.mxu1 %v3202_v51 }
 0xacd   : > { %8587 = vmatpush3.msra.mxu1 %v3202_v51 }
 0xace   : > { %8591 = vmatprep.subr.msk.mxu1 %vm2494_vm0, %v11280_v43 }
 0xacf   : > { %v3479_v58 = vpop.permute.xlu0 %3478 }
 0xad1   : > { %v9345_v52 = vpop.eup %9344 }
 0xad2   : > { %v3200_v56 = vmul.f32 %v9345_v52, %v9341_v29 }
 0xad5   : > { %v9347_v53 = vpop.eup %9346 }
 0xad6   : > { %v3199_v54 = vmul.f32 %v9347_v53, %v9343_v49 }
 0xad8   : > { %8588 = vmatprep.mubr.msk.f32.mxu1 %vm2582_vm1, %v3199_v54 }
 0xad9   : > { %8589 = vmatmul.mubr.msk.f32.vlgmr.msra.gmra.mxu1 %vm2582_vm1, %v3200_v56 }
 0xada   : > { %8592 = vmatpush3.xpose.msk.msra.mxu1 %vm2494_vm0, %v11280_v43  ;;  %8595 = vmatprep.mubr.msk.f32.mxu1 %vm2494_vm0, %v11228_v24 }
 0xadb   : > { %8593 = vmatprep.subr.msk.mxu1 %vm2494_vm0, %v11216_v22 }
 0xade   : > { %8594 = vmatpush3.xpose.msk.msra.mxu1 %vm2494_vm0, %v11216_v22 }
 0xadf   : > { %8605 = vmatprep.subr.msk.mxu1 %vm2494_vm0, %v3485_v27 }
 0xae1   : > { %8596 = vmatmul.mubr.msk.f32.vlgmr.msra.gmra.mxu1 %vm2494_vm0, %v11240_v26 }
 0xae2   : > { %8606 = vmatpush3.xpose.msk.msra.mxu1 %vm2494_vm0, %v3485_v27  ;;  %8609 = vmatprep.mubr.msk.f32.mxu1 %vm2494_vm0, %v3479_v58 }
 0xae3   : > { %8607 = vmatprep.subr.msk.mxu1 %vm2494_vm0, %v3483_v59 }
 0xae6   : > { %8608 = vmatpush3.xpose.msk.msra.mxu1 %vm2494_vm0, %v3483_v59 }
 0xae9   : > { %8610 = vmatmul.mubr.msk.f32.vlgmr.msra.gmra.mxu1 %vm2494_vm0, %v3481_v60 }
 0xb99   : > { %v11390_v61 = vpop.f32.mrf.mxu1 }
 0xb9b   : > { %v11392_v23 = vpop.f32.mrf.mxu1 }
 0xb9c   : > { %v8917_v62 = vpack.i.bf16 %v11390_v61, %v11392_v23 }
 0xba1   : > { %v8597_v19 = vpop.f32.mrf.mxu1 }
 0xba2   : > { %v11413_v7 = vadd.f32 %v8597_v19, %v11267_v35 }
 0xba3   : > { %v3366_v25 = vpop.f32.mrf.mxu1 }
 0xba4   : > { %v3378_v9 = vsel %vm2582_vm1, %v11413_v7, -inf  ;;  %v3367_v34 = vadd.f32 %v3366_v25, %v11272_v37 }
 0xba6   : > { %v3375_v36 = vsel %vm2582_vm1, %v3367_v34, -inf }
 0xba9   : > { %v8611_v63 = vpop.f32.mrf.mxu1 }
 0xbaa   : > { %v3566_v2 = vadd.f32 %v8611_v63, %v11267_v35 }
 0xbab   : > { %v3560_v3 = vpop.f32.mrf.mxu1 }
 0xbac   : > { %v3561_v4 = vadd.f32 %v3560_v3, %v11272_v37  ;;  %v3572_v5 = vsel %vm2582_vm1, %v3566_v2, -inf }
 0xbad   : > { %3573 = vmax.xlane.f32.xlu1 %v3572_v5 }
 0xbae   : > { %v3569_v6 = vsel %vm2582_vm1, %v3561_v4, -inf }
 0xbaf   : > { %3570 = vmax.xlane.f32.xlu0 %v3569_v6 }
 0xbbe   : > { %3595 = vrot.lane.b32.xlu1 %v11256_v33, %s10215_s26 }
 0xbc2   : > { %3686 = vrot.lane.b32.xlu1 %v11280_v43, %s10216_s21 }
 0xbc6   : > { %3684 = vrot.lane.b32.xlu1 %v11216_v22, %s10216_s21 }
 0xbca   : > { %3886 = vrot.lane.b32.xlu1 %v11280_v43, %s10217_s29 }
 0xbce   : > { %3884 = vrot.lane.b32.xlu1 %v11216_v22, %s10217_s29 }
 0xbd2   : > { %3882 = vrot.lane.b32.xlu1 %v11240_v26, %s10217_s29 }
 0xbf6   : > { %3379 = vmax.xlane.f32.xlu1 %v3378_v9 }
 0xc36   : > { %v3574_v18 = vpop.xlane.xlu1 %3573 }
 0xc37   : > { %v3576_v10 = vsub.f32 %v3566_v2, %v3574_v18 }
 0xc38   : > { %v3571_v14 = vpop.xlane.xlu0 %3570 }
 0xc39   : > { %v3579_v15 = vmul.f32 1.442695, %v3576_v10  ;;  %v3575_v16 = vsub.f32 %v3561_v4, %v3571_v14 }
 0xc3a   : > { %v3596_v17 = vpop.permute.xlu1 %3595 }
 0xc3b   : > { %9348 = vpow2.f32 %v3579_v15  ;;  %v3577_v43 = vmul.f32 1.442695, %v3575_v16  ;;  %8612 = vmatprep.subr.mxu1 %v3596_v17 }
 0xc3c   : > { %8613 = vmatpush3.msra.mxu1 %v3596_v17 }
 0xc3d   : > { %9350 = vpow2.f32 %v3577_v43 }
 0xc3e   : > { %v3687_v41 = vpop.permute.xlu1 %3686 }
 0xc42   : > { %v3685_v49 = vpop.permute.xlu1 %3684 }
 0xc46   : > { %v3887_v50 = vpop.permute.xlu1 %3886 }
 0xc48   : > { %v9349_v22 = vpop.eup %9348 }
 0xc49   : > { %v3584_v30 = vsel %vm2582_vm1, %v9349_v22, 0.0 }
 0xc4a   : > { %v9351_v31 = vpop.eup %9350  ;;  %3585 = vadd.xlane.f32.xlu0 %v3584_v30  ;;  %v3885_v52 = vpop.permute.xlu1 %3884 }
 0xc4b   : > { %v3581_v32 = vsel %vm2582_vm1, %v9351_v31, 0.0 }
 0xc4e   : > { %3582 = vadd.xlane.f32.xlu0 %v3581_v32  ;;  %v3883_v53 = vpop.permute.xlu1 %3882 }
 0xc64   : > { %3593 = vrot.lane.b32.xlu0 %v11244_v28, %s10215_s26 }
 0xc68   : > { %3680 = vrot.lane.b32.xlu0 %v11228_v24, %s10216_s21 }
 0xc6c   : > { %3682 = vrot.lane.b32.xlu0 %v11240_v26, %s10216_s21 }
 0xc70   : > { %3880 = vrot.lane.b32.xlu0 %v11228_v24, %s10217_s29 }
 0xc7f   : > { %v3380_v60 = vpop.xlane.xlu1 %3379 }
 0xc80   : > { %v3382_v19 = vsub.f32 %v11413_v7, %v3380_v60 }
 0xc82   : > { %v3385_v2 = vmul.f32 1.442695, %v3382_v19 }
 0xc8f   : > { %3376 = vmax.xlane.f32.xlu0 %v3375_v36 }
 0xcd3   : > { %v3586_v38 = vpop.xlane.xlu0 %3585 }
 0xcd4   : > { %9352 = vrcp.f32 %v3586_v38 }
 0xcd7   : > { %v3583_v39 = vpop.xlane.xlu0 %3582 }
 0xcd8   : > { %9354 = vrcp.f32 %v3583_v39 }
 0xcdb   : > { %v3594_v40 = vpop.permute.xlu0 %3593 }
 0xcdc   : > { %8614 = vmatprep.subr.mxu1 %v3594_v40 }
 0xcdd   : > { %8615 = vmatpush3.msra.mxu1 %v3594_v40 }
 0xcde   : > { %8619 = vmatprep.subr.msk.mxu1 %vm2494_vm0, %v3687_v41 }
 0xcdf   : > { %v3681_v48 = vpop.permute.xlu0 %3680 }
 0xce1   : > { %v9353_v29 = vpop.eup %9352 }
 0xce2   : > { %v3590_v20 = vmul.f32 %v9353_v29, %v9349_v22 }
 0xce3   : > { %v3683_v21 = vpop.permute.xlu0 %3682 }
 0xce5   : > { %v9355_v26 = vpop.eup %9354 }
 0xce6   : > { %v3589_v24 = vmul.f32 %v9355_v26, %v9351_v31 }
 0xce7   : > { %v3881_v51 = vpop.permute.xlu0 %3880 }
 0xce8   : > { %8616 = vmatprep.mubr.msk.f32.mxu1 %vm2582_vm1, %v3589_v24 }
 0xce9   : > { %8617 = vmatmul.mubr.msk.f32.vlgmr.msra.gmra.mxu1 %vm2582_vm1, %v3590_v20 }
 0xcea   : > { %8620 = vmatpush3.xpose.msk.msra.mxu1 %vm2494_vm0, %v3687_v41  ;;  %8623 = vmatprep.mubr.msk.f32.mxu1 %vm2494_vm0, %v3681_v48 }
 0xceb   : > { %8621 = vmatprep.subr.msk.mxu1 %vm2494_vm0, %v3685_v49 }
 0xcee   : > { %8622 = vmatpush3.xpose.msk.msra.mxu1 %vm2494_vm0, %v3685_v49 }
 0xcef   : > { %8633 = vmatprep.subr.msk.mxu1 %vm2494_vm0, %v3887_v50 }
 0xcf1   : > { %8624 = vmatmul.mubr.msk.f32.vlgmr.msra.gmra.mxu1 %vm2494_vm0, %v3683_v21 }
 0xcf2   : > { %8634 = vmatpush3.xpose.msk.msra.mxu1 %vm2494_vm0, %v3887_v50  ;;  %8637 = vmatprep.mubr.msk.f32.mxu1 %vm2494_vm0, %v3881_v51 }
 0xcf3   : > { %8635 = vmatprep.subr.msk.mxu1 %vm2494_vm0, %v3885_v52 }
 0xcf6   : > { %8636 = vmatpush3.xpose.msk.msra.mxu1 %vm2494_vm0, %v3885_v52 }
 0xcf9   : > { %8638 = vmatmul.mubr.msk.f32.vlgmr.msra.gmra.mxu1 %vm2494_vm0, %v3883_v53 }
 0xd18   : > { %v3377_v54 = vpop.xlane.xlu0 %3376 }
 0xd19   : > { %v3381_v56 = vsub.f32 %v3367_v34, %v3377_v54 }
 0xd1b   : > { %v3383_v27 = vmul.f32 1.442695, %v3381_v56 }
 0xd1d   : > { %9356 = vpow2.f32 %v3383_v27 }
 0xd1e   : > { %9358 = vpow2.f32 %v3385_v2 }
 0xd2a   : > { %v9357_v58 = vpop.eup %9356 }
 0xd2b   : > { %v3387_v59 = vsel %vm2582_vm1, %v9357_v58, 0.0  ;;  %v9359_v22 = vpop.eup %9358 }
 0xd2c   : > { %3388 = vadd.xlane.f32.xlu1 %v3387_v59  ;;  %v3390_v31 = vsel %vm2582_vm1, %v9359_v22, 0.0 }
 0xda9   : > { %v11445_v25 = vpop.f32.mrf.mxu1 }
 0xdab   : > { %v3671_v63 = vpop.f32.mrf.mxu1 }
 0xdac   : > { %v8892_v3 = vpack.i.bf16 %v11445_v25, %v3671_v63 }
 0xdb1   : > { %v8625_v4 = vpop.f32.mrf.mxu1 }
 0xdb2   : > { %v3768_v5 = vadd.f32 %v8625_v4, %v11267_v35  ;;  %v9146_v4 = vld [vmem:[%s10984_s7 + $0x74] ss:$8 sps:$4 sm:$0xff]  }
 0xdb3   : > { %v3762_v6 = vpop.f32.mrf.mxu1 }
 0xdb4   : > { %v3763_v9 = vadd.f32 %v3762_v6, %v11272_v37  ;;  %v3774_v18 = vsel %vm2582_vm1, %v3768_v5, -inf  ;;  %v9147_v6 = vld [vmem:[%s10984_s7 + $0x60] ss:$8 sps:$4 sm:$0xff]  }
 0xdb5   : > { %3775 = vmax.xlane.f32.xlu0 %v3774_v18  ;;  %v3389_v10 = vpop.xlane.xlu1 %3388  ;;  %v9150_v18 = vld [vmem:[%s10984_s7 + $0x50] ss:$8 sps:$4 sm:$0xff]  }
 0xdb6   : > { %9360 = vrcp.f32 %v3389_v10  ;;  %v3771_v7 = vsel %vm2582_vm1, %v3763_v9, -inf  ;;  %v9152_v10 = vld [vmem:[%s10984_s7 + $0x54] ss:$8 sps:$4 sm:$0xff]  }
 0xdb9   : > { %3772 = vmax.xlane.f32.xlu0 %v3771_v7  ;;  %v8639_v14 = vpop.f32.mrf.mxu1  ;;  %v9155_v7 = vld [vmem:[%s10984_s7 + $0x44] ss:$8 sps:$4 sm:$0xff]  }
 0xdba   : > { %v3968_v15 = vadd.f32 %v8639_v14, %v11267_v35  ;;  %v9153_v14 = vld [vmem:[%s10984_s7 + $0x40] ss:$8 sps:$4 sm:$0xff]  }
 0xdbb   : > { %v3962_v16 = vpop.f32.mrf.mxu1 }
 0xdbc   : > { %v3963_v17 = vadd.f32 %v3962_v16, %v11272_v37  ;;  %v3974_v43 = vsel %vm2582_vm1, %v3968_v15, -inf  ;;  %v9158_v16 = vld [vmem:[%s10984_s7 + $0x34] ss:$8 sps:$4 sm:$0xff]  }
 0xdbd   : > { %3975 = vmax.xlane.f32.xlu0 %v3974_v43  ;;  %v9156_v43 = vld [vmem:[%s10984_s7 + $0x30] ss:$8 sps:$4 sm:$0xff]  }
 0xdbe   : > { %v3971_v30 = vsel %vm2582_vm1, %v3963_v17, -inf }
 0xdbf   : > { %3972 = vmax.xlane.f32.xlu1 %v3971_v30  ;;  %v9161_v30 = vld [vmem:[%s10984_s7 + $0x24] ss:$8 sps:$4 sm:$0xff]  }
 0xdc1   : > { %3391 = vadd.xlane.f32.xlu0 %v3390_v31 }
 0xdc3   : > { %v9361_v32 = vpop.eup %9360 }
 0xdc4   : > { %v3395_v34 = vmul.f32 %v9361_v32, %v9357_v58  ;;  %v9159_v32 = vld [vmem:[%s10984_s7 + $0x20] ss:$8 sps:$4 sm:$0xff]  }
 0xdc6   : > { %8602 = vmatprep.mubr.msk.f32.mxu0 %vm2582_vm1, %v3395_v34  ;;  %v9164_v34 = vld [vmem:[%s10984_s7 + $0x14] ss:$8 sps:$4 sm:$0xff]  }
 0xdd0   : > { %3795 = vrot.lane.b32.xlu1 %v11256_v33, %s10216_s21 }
 0xe3e   : > { %v3776_v35 = vpop.xlane.xlu0 %3775 }
 0xe3f   : > { %v3778_v36 = vsub.f32 %v3768_v5, %v3776_v35  ;;  %v9149_v5 = vld [vmem:[%s10984_s7 + $0x64] ss:$8 sps:$4 sm:$0xff]   ;;  %v9162_v35 = vld [vmem:[%s10984_s7 + $0x10] ss:$8 sps:$4 sm:$0xff]  }
 0xe41   : > { %v3781_v37 = vmul.f32 1.442695, %v3778_v36  ;;  %v9167_v36 = vld [vmem:[%s10984_s7 + $0x4] ss:$8 sps:$4 sm:$0xff]  }
 0xe42   : > { %v3773_v38 = vpop.xlane.xlu0 %3772 }
 0xe43   : > { %9362 = vpow2.f32 %v3781_v37  ;;  %v3777_v39 = vsub.f32 %v3763_v9, %v3773_v38  ;;  %v9165_v37 = vld [vmem:[%s10984_s7] ss:$8 sps:$4 sm:$0xff]   ;;  %v9170_v38 = vld [vmem:[%s10984_s7 + $0xf4] ss:$8 sps:$4 sm:$0xff]  }
 0xe45   : > { %v3779_v40 = vmul.f32 1.442695, %v3777_v39  ;;  %v9168_v39 = vld [vmem:[%s10984_s7 + $0xf0] ss:$8 sps:$4 sm:$0xff]  }
 0xe46   : > { %v3976_v41 = vpop.xlane.xlu0 %3975 }
 0xe47   : > { %9364 = vpow2.f32 %v3779_v40  ;;  %v3978_v29 = vsub.f32 %v3968_v15, %v3976_v41  ;;  %v9173_v40 = vld [vmem:[%s10984_s7 + $0xe4] ss:$8 sps:$4 sm:$0xff]   ;;  %v9171_v41 = vld [vmem:[%s10984_s7 + $0xe0] ss:$8 sps:$4 sm:$0xff]  }
 0xe48   : > { %v3973_v26 = vpop.xlane.xlu1 %3972 }
 0xe49   : > { %v3981_v48 = vmul.f32 1.442695, %v3978_v29  ;;  %v3977_v27 = vsub.f32 %v3963_v17, %v3973_v26  ;;  %v9176_v29 = vld [vmem:[%s10984_s7 + $0xd4] ss:$8 sps:$4 sm:$0xff]   ;;  %v9174_v26 = vld [vmem:[%s10984_s7 + $0xd0] ss:$8 sps:$4 sm:$0xff]  }
 0xe4a   : > { %v3392_v49 = vpop.xlane.xlu0 %3391 }
 0xe4b   : > { %9366 = vpow2.f32 %v3981_v48  ;;  %v3979_v58 = vmul.f32 1.442695, %v3977_v27  ;;  %v9179_v48 = vld [vmem:[%s10984_s7 + $0xc4] ss:$8 sps:$4 sm:$0xff]   ;;  %v9194_v27 = vld [vmem:[%s10993_s12 + $0x74] ss:$8 sps:$4 sm:$0xff]  }
 0xe4c   : > { %9368 = vrcp.f32 %v3392_v49  ;;  %v3796_v24 = vpop.permute.xlu1 %3795  ;;  %v9177_v49 = vld [vmem:[%s10984_s7 + $0xc0] ss:$8 sps:$4 sm:$0xff]  }
 0xe4d   : > { %8626 = vmatprep.subr.mxu0 %v3796_v24  ;;  %9370 = vpow2.f32 %v3979_v58  ;;  %v9197_v58 = vld [vmem:[%s10993_s12 + $0x64] ss:$8 sps:$4 sm:$0xff]  }
 0xe50   : > { %v9363_v20 = vpop.eup %9362 }
 0xe51   : > { %v3786_v21 = vsel %vm2582_vm1, %v9363_v20, 0.0 }
 0xe52   : > { %3787 = vadd.xlane.f32.xlu0 %v3786_v21  ;;  %v9185_v21 = vld [vmem:[%s10984_s7 + $0xa4] ss:$8 sps:$4 sm:$0xff]  }
 0xe54   : > { %v9365_v50 = vpop.eup %9364 }
 0xe55   : > { %v3783_v51 = vsel %vm2582_vm1, %v9365_v50, 0.0 }
 0xe56   : > { %3784 = vadd.xlane.f32.xlu1 %v3783_v51  ;;  %v9188_v51 = vld [vmem:[%s10984_s7 + $0x94] ss:$8 sps:$4 sm:$0xff]  }
 0xe58   : > { %v9367_v52 = vpop.eup %9366 }
 0xe59   : > { %v9369_v53 = vpop.eup %9368  ;;  %v3986_v54 = vsel %vm2582_vm1, %v9367_v52, 0.0 }
 0xe5a   : > { %3987 = vadd.xlane.f32.xlu0 %v3986_v54  ;;  %v3396_v56 = vmul.f32 %v9369_v53, %v9359_v22  ;;  %v9371_v59 = vpop.eup %9370  ;;  %v9189_v53 = vld [vmem:[%s10984_s7 + $0x80] ss:$8 sps:$4 sm:$0xff]   ;;  %v9191_v54 = vld [vmem:[%s10984_s7 + $0x84] ss:$8 sps:$4 sm:$0xff]  }
 0xe5b   : > { %v3983_v60 = vsel %vm2582_vm1, %v9371_v59, 0.0 }
 0xe5c   : > { %8603 = vmatmul.mubr.msk.f32.vlgmr.msra.gmra.mxu0 %vm2582_vm1, %v3396_v56  ;;  %v9192_v56 = vld [vmem:[%s10993_s12 + $0x70] ss:$8 sps:$4 sm:$0xff]  }
 0xe5d   : > { %8627 = vmatpush3.msra.mxu0 %v3796_v24  ;;  %v9182_v24 = vld [vmem:[%s10984_s7 + $0xb4] ss:$8 sps:$4 sm:$0xff]  }
 0xe67   : > { %3793 = vrot.lane.b32.xlu1 %v11244_v28, %s10216_s21 }
 0xe70   : > { %3995 = vrot.lane.b32.xlu0 %v11256_v33, %s10217_s29 }
 0xe74   : > { %8893 = vrot.lane.b32.xlu0 %v8892_v3, %s10217_s29  ;;  %v9144_v3 = vld [vmem:[%s10984_s7 + $0x70] ss:$8 sps:$4 sm:$0xff]  }
 0xe8b   : > { %3984 = vadd.xlane.f32.xlu1 %v3983_v60  ;;  %v9195_v60 = vld [vmem:[%s10993_s12 + $0x60] ss:$8 sps:$4 sm:$0xff]  }
 0xe9c   : > { %3993 = vrot.lane.b32.xlu1 %v11244_v28, %s10217_s29 }
 0xea0   : > { %8898 = vrot.lane.b32.xlu1 %v8897_v47, %s10217_s29 }
 0xea4   : > { %8903 = vrot.lane.b32.xlu1 %v8902_v13, %s10216_s21 }
 0xea8   : > { %8918 = vrot.lane.b32.xlu1 %v8917_v62, %s10215_s26 }
 0xedb   : > { %v3788_v33 = vpop.xlane.xlu0 %3787 }
 0xedc   : > { %9372 = vrcp.f32 %v3788_v33 }
 0xedf   : > { %v3785_v19 = vpop.xlane.xlu1 %3784 }
 0xee0   : > { %9374 = vrcp.f32 %v3785_v19  ;;  %v9200_v19 = vld [vmem:[%s10993_s12 + $0x54] ss:$8 sps:$4 sm:$0xff]  }
 0xee3   : > { %v3794_v28 = vpop.permute.xlu1 %3793  ;;  %v3988_v25 = vpop.xlane.xlu0 %3987 }
 0xee4   : > { %8628 = vmatprep.subr.mxu0 %v3794_v28  ;;  %9376 = vrcp.f32 %v3988_v25  ;;  %v9218_v25 = vld [vmem:[%s11002_s23 + $0x34] ss:$8 sps:$4 sm:$0xff]  }
 0xee5   : > { %8629 = vmatpush3.msra.mxu0 %v3794_v28 }
 0xee6   : > { %4564 = vmatprep.subr.bf16.mxu0 %v9194_v27 }
 0xee7   : > { %v3996_v45 = vpop.permute.xlu0 %3995 }
 0xee8   : > { %8640 = vmatprep.subr.mxu1 %v3996_v45 }
 0xee9   : > { %8641 = vmatpush3.msra.mxu1 %v3996_v45  ;;  %v9373_v46 = vpop.eup %9372  ;;  %v9198_v45 = vld [vmem:[%s10993_s12 + $0x50] ss:$8 sps:$4 sm:$0xff]  }
 0xeea   : > { %v3792_v12 = vmul.f32 %v9373_v46, %v9363_v20  ;;  %v9180_v20 = vld [vmem:[%s10984_s7 + $0xb0] ss:$8 sps:$4 sm:$0xff]  }
 0xeeb   : > { %v9203_v46 = vld [vmem:[%s10993_s12 + $0x44] ss:$8 sps:$4 sm:$0xff]  }
 0xeed   : > { %v9375_v47 = vpop.eup %9374 }
 0xeee   : > { %v3791_v11 = vmul.f32 %v9375_v47, %v9365_v50  ;;  %v9183_v50 = vld [vmem:[%s10984_s7 + $0xa0] ss:$8 sps:$4 sm:$0xff]   ;;  %v9201_v47 = vld [vmem:[%s10993_s12 + $0x40] ss:$8 sps:$4 sm:$0xff]  }
 0xef0   : > { %8630 = vmatprep.mubr.msk.f32.mxu0 %vm2582_vm1, %v3791_v11  ;;  %v9206_v11 = vld [vmem:[%s10993_s12 + $0x34] ss:$8 sps:$4 sm:$0xff]  }
 0xef1   : > { %8631 = vmatmul.mubr.msk.f32.vlgmr.msra.gmra.mxu0 %vm2582_vm1, %v3792_v12  ;;  %v9377_v23 = vpop.eup %9376  ;;  %v9204_v12 = vld [vmem:[%s10993_s12 + $0x30] ss:$8 sps:$4 sm:$0xff]  }
 0xef2   : > { %v3992_v2 = vmul.f32 %v9377_v23, %v9367_v52  ;;  %v9186_v52 = vld [vmem:[%s10984_s7 + $0x90] ss:$8 sps:$4 sm:$0xff]   ;;  %4565 = vmatpush1.bf16.msra.mxu0 %v9192_v56 }
 0xef3   : > { %4566 = vmatprep.subr.bf16.mxu0 %v9197_v58  ;;  %v9212_v23 = vld [vmem:[%s10993_s12 + $0x14] ss:$8 sps:$4 sm:$0xff]  }
 0xef4   : > { %v9216_v58 = vld [vmem:[%s11002_s23 + $0x30] ss:$8 sps:$4 sm:$0xff]  }
 0xef6   : > { %4567 = vmatpush1.bf16.msra.mxu0 %v9195_v60  ;;  %v9224_v60 = vld [vmem:[%s11002_s23 + $0x24] ss:$8 sps:$4 sm:$0xff]  }
 0xef7   : > { %4568 = vmatprep.subr.bf16.mxu0 %v9200_v19  ;;  %v9230_v19 = vld [vmem:[%s11002_s23 + $0x14] ss:$8 sps:$4 sm:$0xff]  }
 0xefa   : > { %4569 = vmatpush1.bf16.msra.mxu0 %v9198_v45  ;;  %v9234_v45 = vld [vmem:[%s11002_s23] ss:$8 sps:$4 sm:$0xff]  }
 0xefb   : > { %4570 = vmatprep.subr.bf16.mxu0 %v9203_v46  ;;  %v1440_v46 = vld [vmem:[%s12226_s25] sm:$0xff] }
 0xefe   : > { %4571 = vmatpush1.bf16.msra.mxu0 %v9201_v47 }
 0xeff   : > { %4572 = vmatprep.subr.bf16.mxu0 %v9206_v11  ;;  %v9245_v11 = vld [vmem:[%s10993_s12 + $0xa4] ss:$8 sps:$4 sm:$0xff]  }
 0xf02   : > { %4573 = vmatpush1.bf16.msra.mxu0 %v9204_v12  ;;  %v9243_v12 = vld [vmem:[%s10993_s12 + $0xa0] ss:$8 sps:$4 sm:$0xff]  }
 0xf14   : > { %v3985_v13 = vpop.xlane.xlu1 %3984 }
 0xf15   : > { %9378 = vrcp.f32 %v3985_v13  ;;  %v9209_v13 = vld [vmem:[%s10993_s12 + $0x24] ss:$8 sps:$4 sm:$0xff]  }
 0xf16   : > { %4574 = vmatprep.subr.bf16.mxu0 %v9209_v13  ;;  %v9248_v13 = vld [vmem:[%s10993_s12 + $0x94] ss:$8 sps:$4 sm:$0xff]  }
 0xf18   : > { %v3994_v61 = vpop.permute.xlu1 %3993 }
 0xf19   : > { %8642 = vmatprep.subr.mxu1 %v3994_v61 }
 0xf1a   : > { %8643 = vmatpush3.msra.mxu1 %v3994_v61  ;;  %v9207_v61 = vld [vmem:[%s10993_s12 + $0x20] ss:$8 sps:$4 sm:$0xff]  }
 0xf1b   : > { %4315 = vmatprep.subr.bf16.mxu1 %v9146_v4  ;;  %4575 = vmatpush1.bf16.msra.mxu0 %v9207_v61  ;;  %v9219_v4 = vld [vmem:[%s10993_s12 + $0xf0] ss:$8 sps:$4 sm:$0xff]  }
 0xf1c   : > { %v11492_v9 = vpop.f32.mrf.mxu0  ;;  %4576 = vmatprep.subr.bf16.mxu0 %v9212_v23  ;;  %v9246_v61 = vld [vmem:[%s10993_s12 + $0x90] ss:$8 sps:$4 sm:$0xff]   ;;  %v9251_v23 = vld [vmem:[%s10993_s12 + $0x84] ss:$8 sps:$4 sm:$0xff]  }
 0xf1e   : > { %v11498_v15 = vpop.f32.mrf.mxu0 }
 0xf22   : > { %v9379_v62 = vpop.eup %9378 }
 0xf23   : > { %v3991_v63 = vmul.f32 %v9379_v62, %v9371_v59  ;;  %v9210_v62 = vld [vmem:[%s10993_s12 + $0x10] ss:$8 sps:$4 sm:$0xff]  }
 0xf24   : > { %4577 = vmatpush1.bf16.msra.mxu0 %v9210_v62  ;;  %v9249_v62 = vld [vmem:[%s10993_s12 + $0x80] ss:$8 sps:$4 sm:$0xff]  }
 0xf25   : > { %8644 = vmatprep.mubr.msk.f32.mxu1 %vm2582_vm1, %v3991_v63  ;;  %v9215_v63 = vld [vmem:[%s10993_s12 + $0x4] ss:$8 sps:$4 sm:$0xff]  }
 0xf26   : > { %8645 = vmatmul.mubr.msk.f32.vlgmr.msra.gmra.mxu1 %vm2582_vm1, %v3992_v2  ;;  %v9213_v2 = vld [vmem:[%s10993_s12] ss:$8 sps:$4 sm:$0xff]   ;;  %4578 = vmatprep.subr.bf16.mxu0 %v9215_v63 }
 0xf27   : > { %4316 = vmatpush1.bf16.msra.mxu1 %v9144_v3  ;;  %v9221_v3 = vld [vmem:[%s10993_s12 + $0xf4] ss:$8 sps:$4 sm:$0xff]  }
 0xf28   : > { %4317 = vmatprep.subr.bf16.mxu1 %v9149_v5  ;;  %4579 = vmatpush1.bf16.msra.mxu0 %v9213_v2  ;;  %v9227_v5 = vld [vmem:[%s10993_s12 + $0xe4] ss:$8 sps:$4 sm:$0xff]  }
 0xf29   : > { %4580 = vmatprep.subr.bf16.mxu0 %v9221_v3 }
 0xf2b   : > { %4318 = vmatpush1.bf16.msra.mxu1 %v9147_v6  ;;  %v9225_v6 = vld [vmem:[%s10993_s12 + $0xe0] ss:$8 sps:$4 sm:$0xff]  }
 0xf2c   : > { %4319 = vmatprep.subr.bf16.mxu1 %v9152_v10  ;;  %4581 = vmatpush2.bf16.msra.mxu0 %v9219_v4  ;;  %v9231_v10 = vld [vmem:[%s10993_s12 + $0xd0] ss:$8 sps:$4 sm:$0xff]  }
 0xf2d   : > { %4582 = vmatprep.subr.bf16.mxu0 %v9227_v5 }
 0xf2f   : > { %4320 = vmatpush1.bf16.msra.mxu1 %v9150_v18  ;;  %v9233_v18 = vld [vmem:[%s10993_s12 + $0xd4] ss:$8 sps:$4 sm:$0xff]  }
 0xf30   : > { %4321 = vmatprep.subr.bf16.mxu1 %v9155_v7  ;;  %4583 = vmatpush2.bf16.msra.mxu0 %v9225_v6  ;;  %v9239_v7 = vld [vmem:[%s10993_s12 + $0xc4] ss:$8 sps:$4 sm:$0xff]  }
 0xf31   : > { %4584 = vmatprep.subr.bf16.mxu0 %v9233_v18 }
 0xf33   : > { %4322 = vmatpush1.bf16.msra.mxu1 %v9153_v14  ;;  %v9237_v14 = vld [vmem:[%s10993_s12 + $0xc0] ss:$8 sps:$4 sm:$0xff]  }
 0xf34   : > { %4323 = vmatprep.subr.bf16.mxu1 %v9158_v16  ;;  %4585 = vmatpush2.bf16.msra.mxu0 %v9231_v10  ;;  %v9242_v16 = vld [vmem:[%s10993_s12 + $0xb4] ss:$8 sps:$4 sm:$0xff]  }
 0xf35   : > { %4586 = vmatprep.subr.bf16.mxu0 %v9239_v7 }
 0xf37   : > { %4324 = vmatpush1.bf16.msra.mxu1 %v9156_v43  ;;  %v8899_v43 = vpop.permute.xlu1 %8898 }
 0xf38   : > { %4325 = vmatprep.subr.bf16.mxu1 %v9161_v30  ;;  %4587 = vmatpush2.bf16.msra.mxu0 %v9237_v14  ;;  %v8894_v30 = vpop.permute.xlu0 %8893 }
 0xf39   : > { %4588 = vmatprep.subr.bf16.mxu0 %v9242_v16 }
 0xf3b   : > { %4326 = vmatpush1.bf16.msra.mxu1 %v9159_v32 }
 0xf3c   : > { %4327 = vmatprep.subr.bf16.mxu1 %v9164_v34  ;;  %v8901_v34 = vunpack.i.h.bf16 %v8899_v43 }
 0xf3f   : > { %4328 = vmatpush1.bf16.msra.mxu1 %v9162_v35  ;;  %v8900_v35 = vunpack.i.l.bf16 %v8899_v43 }
 0xf40   : > { %4329 = vmatprep.subr.bf16.mxu1 %v9167_v36  ;;  %v8896_v36 = vunpack.i.h.bf16 %v8894_v30 }
 0xf43   : > { %4330 = vmatpush1.bf16.msra.mxu1 %v9165_v37  ;;  %v8895_v37 = vunpack.i.l.bf16 %v8894_v30 }
 0xf44   : > { %4331 = vmatprep.subr.bf16.mxu1 %v9170_v38 }
 0xf47   : > { %4332 = vmatpush2.bf16.msra.mxu1 %v9168_v39 }
 0xf48   : > { %4333 = vmatprep.subr.bf16.mxu1 %v9173_v40 }
 0xf4b   : > { %4334 = vmatpush2.bf16.msra.mxu1 %v9171_v41 }
 0xf4c   : > { %4335 = vmatprep.subr.bf16.mxu1 %v9176_v29 }
 0xf4f   : > { %4336 = vmatpush2.bf16.msra.mxu1 %v9174_v26 }
 0xf50   : > { %4337 = vmatprep.subr.bf16.mxu1 %v9179_v48  ;;  %v4137_v48 = vsel %vm2494_vm0, %v11492_v9, %v8896_v36 }
 0xf53   : > { %4338 = vmatpush2.bf16.msra.mxu1 %v9177_v49  ;;  %v4129_v49 = vsel %vm2494_vm0, %v11310_v42, %v8901_v34 }
 0xf54   : > { %4339 = vmatprep.subr.bf16.mxu1 %v9182_v24  ;;  %v4128_v24 = vsel %vm2494_vm0, %v11312_v44, %v8900_v35 }
 0xf57   : > { %4340 = vmatpush2.bf16.msra.mxu1 %v9180_v20  ;;  %v4136_v20 = vsel %vm2494_vm0, %v11498_v15, %v8895_v37 }
 0xf58   : > { %4341 = vmatprep.subr.bf16.mxu1 %v9185_v21 }
 0xf5b   : > { %4342 = vmatpush2.bf16.msra.mxu1 %v9183_v50 }
 0xf5c   : > { %4343 = vmatprep.subr.bf16.mxu1 %v9188_v51 }
 0xf5f   : > { %4344 = vmatpush2.bf16.msra.mxu1 %v9186_v52 }
 0xf60   : > { %4345 = vmatprep.subr.bf16.mxu1 %v9191_v54 }
 0xf63   : > { %4346 = vmatpush2.bf16.msra.mxu1 %v9189_v53 }
 0xf64   : > { %4678 = vmatprep.subr.bf16.mxu1 %v9218_v25  ;;  %v9236_v25 = vld [vmem:[%s11002_s23 + $0x4] ss:$8 sps:$4 sm:$0xff]  }
 0xfb1   : > { %v8632_v17 = vpop.f32.mrf.mxu0 }
 0xfb3   : > { %v3871_v22 = vpop.f32.mrf.mxu0 }
 0xfb4   : > { %v8907_v31 = vpack.i.bf16 %v8632_v17, %v3871_v22  ;;  %v9240_v17 = vld [vmem:[%s10993_s12 + $0xb0] ss:$8 sps:$4 sm:$0xff]   ;;  %v8904_v22 = vpop.permute.xlu1 %8903  ;;  %s12229_s12 = scalar_lea.vmem [#allocation27], %s10941_s13 }
 0xfb5   : > { %4589 = vmatpush2.bf16.msra.mxu0 %v9240_v17  ;;  %v8906_v38 = vunpack.i.h.bf16 %v8904_v22  ;;  %v8905_v39 = vunpack.i.l.bf16 %v8904_v22  ;;  %v4615_v22 = vld [vmem:[%s12229_s12] sm:$0x3] }
 0xfb6   : > { %8908 = vrot.lane.b32.xlu0 %v8907_v31, %s10216_s21  ;;  %4590 = vmatprep.subr.bf16.mxu0 %v9245_v11  ;;  %v11597_v30 = vrot.slane %v4615_v22, %v11160_v57 }
 0xfb7   : > { %v4131_v50 = vsel %vm4130_vm2, %v4128_v24, %v8905_v39  ;;  %v4132_v51 = vsel %vm4130_vm2, %v4129_v49, %v8906_v38  ;;  %v11618_v39 = vld [vmem:[%s12230_s3] sm:$0x3] }
 0xfb8   : > { %v8919_v31 = vpop.permute.xlu1 %8918 }
 0xfb9   : > { %v8921_v40 = vunpack.i.h.bf16 %v8919_v31  ;;  %v8920_v41 = vunpack.i.l.bf16 %v8919_v31  ;;  %4591 = vmatpush2.bf16.msra.mxu0 %v9243_v12 }
 0xfba   : > { %4592 = vmatprep.subr.bf16.mxu0 %v9248_v13 }
 0xfbb   : > { %v4134_v9 = vsel %vm4133_vm3, %v4131_v50, %v8920_v41  ;;  %v4135_v42 = vsel %vm4133_vm3, %v4132_v51, %v8921_v40  ;;  %v4397_v40 = vrot.slane %v11618_v39, %v11156_v55  ;;  %v11645_v50 = vld [vmem:[%s12232_s6] sm:$0xff] }
 0xfbd   : > { %4593 = vmatpush2.bf16.msra.mxu0 %v9246_v61 }
 0xfbe   : > { %4594 = vmatprep.subr.bf16.mxu0 %v9251_v23 }
 0xfc1   : > { %4595 = vmatpush2.bf16.msra.mxu0 %v9249_v62 }
 0xfe6   : > { %v8646_v59 = vpop.f32.mrf.mxu1 }
 0xfe8   : > { %v4071_v33 = vpop.f32.mrf.mxu1 }
 0xfe9   : > { %v8912_v28 = vpack.i.bf16 %v8646_v59, %v4071_v33  ;;  %v4142_v59 = vpack.c.bf16 %v4135_v42, %v4134_v9  ;;  %v9222_v33 = vld [vmem:[%s11002_s23 + $0x20] ss:$8 sps:$4 sm:$0xff]  }
 0xfeb   : > { %8913 = vrot.lane.b32.xlu0 %v8912_v28, %s10215_s26  ;;  %v9228_v28 = vld [vmem:[%s11002_s23 + $0x10] ss:$8 sps:$4 sm:$0xff]   ;;  %s12228_s23 = scalar_lea.vmem [#allocation21], %s10941_s13 }
 0xfec   : > { %v2493_v2 = vld [vmem:[%s12228_s23] sm:$0x3] }
 0xfed   : > { %v4152_v4 = vrot.slane %v2493_v2, %v11160_v57  ;;  %v4148_v5 = vrot.slane %v2493_v2, %v11156_v55 }
0x1028   : > { %v8909_v32 = vpop.permute.xlu0 %8908 }
0x1029   : > { %v8911_v29 = vunpack.i.h.bf16 %v8909_v32  ;;  %v8910_v26 = vunpack.i.l.bf16 %v8909_v32  ;;  %v4620_v32 = vrot.slane %v4615_v22, %v11156_v55 }
0x102b   : > { %v4138_v54 = vsel %vm4130_vm2, %v4136_v20, %v8910_v26  ;;  %v4139_v44 = vsel %vm4130_vm2, %v4137_v48, %v8911_v29  ;;  %v11640_v20 = vld [vmem:[%s12231_s1 + $0x8] sm:$0xff] }
0x105d   : > { %v8914_v21 = vpop.permute.xlu0 %8913 }
0x105e   : > { %v8916_v52 = vunpack.i.h.bf16 %v8914_v21  ;;  %v8915_v53 = vunpack.i.l.bf16 %v8914_v21 }
0x1060   : > { %v4140_v15 = vsel %vm4133_vm3, %v4138_v54, %v8915_v53  ;;  %v4141_v56 = vsel %vm4133_vm3, %v4139_v44, %v8916_v52 }
0x1061   : > { %v4143_v27 = vpack.c.bf16 %v4141_v56, %v4140_v15 }
0x1063   : > { %4347 = vmatprep.mubr.bf16.mxu1 %v4143_v27 }
0x1064   : > { %4348 = vmatmul.mubr.bf16.vlgmr.msra.gmra.mxu1 %v4142_v59 }
0x1065   : > { %4679 = vmatpush1.bf16.msra.mxu1 %v9216_v58  ;;  %4702 = vmatprep.mubr.bf16.mxu1 %v10214_v8  ;;  %v1441_v8 = vld [vmem:[%s12227_s19 + $0x8] sm:$0xff] }
0x1066   : > { %4680 = vmatprep.subr.bf16.mxu1 %v9224_v60  ;;  %v1442_v47 = vpack.c.bf16 %v1441_v8, %v1440_v46 }
0x1069   : > { %4681 = vmatpush1.bf16.msra.mxu1 %v9222_v33 }
0x106a   : > { %4682 = vmatprep.subr.bf16.mxu1 %v9230_v19 }
0x106d   : > { %4683 = vmatpush1.bf16.msra.mxu1 %v9228_v28 }
0x106e   : > { %4684 = vmatprep.subr.bf16.mxu1 %v9236_v25 }
0x1071   : > { %4685 = vmatpush1.bf16.msra.mxu1 %v9234_v45 }
0x1074   : > { %8197 = vmatmul.mubr.msk.bf16.vlgmr.msra.gmra.mxu1 %vm4130_vm2, %v1442_v47 }
0x1124   : > { %v4349_v63 = vpop.f32.mrf.mxu1 }
0x1125   : > { %v4350_v16 = vadd.f32 %v4349_v63, %v4148_v5 }
0x1126   : > { %v4351_v3 = vpop.f32.mrf.mxu1 }
0x1127   : > { %v4352_v7 = vadd.f32 %v4351_v3, %v4152_v4 }
0x1128   : > { %v4353_v6 = vpop.f32.mrf.mxu1 }
0x1129   : > { %v4354_v18 = vadd.f32 %v4353_v6, %v4148_v5 }
0x112a   : > { %v4355_v10 = vpop.f32.mrf.mxu1 }
0x112b   : > { %v4356_v14 = vadd.f32 %v4355_v10, %v4152_v4  ;;  %v4358_v43 = vpack.c.bf16 %v4354_v18, %v4350_v16 }
0x112d   : > { %v4359_v17 = vpack.c.bf16 %v4356_v14, %v4352_v7 }
0x112f   : > { %4596 = vmatprep.mubr.bf16.mxu0 %v4359_v17 }
0x1130   : > { %4597 = vmatmul.mubr.bf16.vlgmr.msra.gmra.mxu0 %v4358_v43 }
0x1134   : > { %v4704_v31 = vpop.f32.mrf.mxu1 }
0x1135   : > { %v11603_v37 = vadd.f32 %v4704_v31, %v4620_v32 }
0x1136   : > { %v4706_v34 = vpop.f32.mrf.mxu1 }
0x1137   : > { %v11601_v35 = vadd.f32 %v4706_v34, %v11597_v30 }
0x1138   : > { %v4708_v36 = vpop.f32.mrf.mxu1 }
0x1139   : > { %v11605_v38 = vadd.f32 %v4708_v36, %v4620_v32 }
0x113b   : > { %8647 = vmatprep.subr.msk.mxu0 %vm2494_vm0, %v11605_v38 }
0x113c   : > { %8648 = vmatpush3.xpose.msk.msra.mxu0 %vm2494_vm0, %v11605_v38 }
0x113d   : > { %8649 = vmatprep.subr.msk.mxu0 %vm2494_vm0, %v11603_v37 }
0x1140   : > { %8650 = vmatpush3.xpose.msk.msra.mxu0 %vm2494_vm0, %v11603_v37 }
0x1141   : > { %8654 = vmatprep.subr.mxu0 %v11605_v38 }
0x11f0   : > { %v4598_v41 = vpop.f32.mrf.mxu0 }
0x11f1   : > { %v11622_v29 = vadd.f32 %v4598_v41, %v4397_v40 }
0x11f2   : > { %v11624_v26 = vpop.f32.mrf.mxu0 }
0x11f3   : > { %8651 = vmatprep.mubr.msk.f32.mxu0 %vm2494_vm0, %v11622_v29 }
0x11f4   : > { %v4602_v48 = vpop.f32.mrf.mxu0 }
0x11f5   : > { %v11628_v49 = vadd.f32 %v4602_v48, %v4397_v40 }
0x11f6   : > { %v11635_v24 = vpop.f32.mrf.mxu0 }
0x11f7   : > { %8652 = vmatmul.mubr.msk.f32.vlgmr.msra.gmra.mxu0 %vm2494_vm0, %v11628_v49 }
0x11f8   : > { %8655 = vmatpush3.msra.mxu0 %v11605_v38 }
0x11f9   : > { %8656 = vmatprep.subr.mxu0 %v11603_v37 }
0x11fa   : > { %8657 = vmatpush3.msra.mxu0 %v11603_v37 }
0x12b7   : > { %v8653_v21 = vpop.f32.mrf.mxu0 }
0x12b8   : > { %v4830_v51 = vadd.f32 %v8653_v21, %v11640_v20 }
0x12b9   : > { %v4824_v52 = vpop.f32.mrf.mxu0 }
0x12ba   : > { %v4825_v53 = vadd.f32 %v4824_v52, %v11645_v50  ;;  %v4836_v9 = vsel %vm2582_vm1, %v4830_v51, -inf }
0x12bb   : > { %4837 = vmax.xlane.f32.xlu1 %v4836_v9 }
0x12bc   : > { %v4833_v42 = vsel %vm2582_vm1, %v4825_v53, -inf }
0x12bd   : > { %4834 = vmax.xlane.f32.xlu0 %v4833_v42 }
0x12cc   : > { %4942 = vrot.lane.b32.xlu1 %v11605_v38, %s10215_s26 }
0x12d0   : > { %4936 = vrot.lane.b32.xlu1 %v11622_v29, %s10215_s26 }
0x12d4   : > { %5138 = vrot.lane.b32.xlu1 %v11605_v38, %s10216_s21 }
0x12d8   : > { %5136 = vrot.lane.b32.xlu1 %v11603_v37, %s10216_s21 }
0x12dc   : > { %5134 = vrot.lane.b32.xlu1 %v11628_v49, %s10216_s21 }
0x1344   : > { %v4838_v54 = vpop.xlane.xlu1 %4837 }
0x1345   : > { %v4840_v44 = vsub.f32 %v4830_v51, %v4838_v54 }
0x1346   : > { %v4835_v15 = vpop.xlane.xlu0 %4834 }
0x1347   : > { %v4839_v56 = vsub.f32 %v4825_v53, %v4835_v15  ;;  %v4843_v58 = vmul.f32 1.442695, %v4840_v44 }
0x1348   : > { %v4943_v27 = vpop.permute.xlu1 %4942 }
0x1349   : > { %v4841_v59 = vmul.f32 1.442695, %v4839_v56  ;;  %8661 = vmatprep.subr.msk.mxu0 %vm2494_vm0, %v4943_v27  ;;  %8668 = vmatprep.subr.mxu1 %v4943_v27 }
0x134a   : > { %8669 = vmatpush3.msra.mxu1 %v4943_v27 }
0x134b   : > { %9380 = vpow2.f32 %v4841_v59 }
0x134c   : > { %9382 = vpow2.f32 %v4843_v58  ;;  %v4937_v45 = vpop.permute.xlu1 %4936 }
0x1350   : > { %v11670_v47 = vpop.permute.xlu1 %5138 }
0x1354   : > { %v11682_v63 = vpop.permute.xlu1 %5136 }
0x1358   : > { %v9381_v60 = vpop.eup %9380  ;;  %v5135_v2 = vpop.permute.xlu1 %5134 }
0x1359   : > { %v4845_v33 = vsel %vm2582_vm1, %v9381_v60, 0.0  ;;  %v9383_v19 = vpop.eup %9382 }
0x135a   : > { %4846 = vadd.xlane.f32.xlu0 %v4845_v33  ;;  %v4848_v28 = vsel %vm2582_vm1, %v9383_v19, 0.0 }
0x135e   : > { %4849 = vadd.xlane.f32.xlu0 %v4848_v28 }
0x1374   : > { %4940 = vrot.lane.b32.xlu0 %v11603_v37, %s10215_s26 }
0x1378   : > { %4938 = vrot.lane.b32.xlu0 %v11628_v49, %s10215_s26 }
0x137c   : > { %5132 = vrot.lane.b32.xlu0 %v11622_v29, %s10216_s21 }
0x13e3   : > { %v4847_v25 = vpop.xlane.xlu0 %4846 }
0x13e4   : > { %9384 = vrcp.f32 %v4847_v25 }
0x13e7   : > { %v4850_v46 = vpop.xlane.xlu0 %4849 }
0x13e8   : > { %9386 = vrcp.f32 %v4850_v46  ;;  %v4710_v46 = vpop.f32.mrf.mxu1 }
0x13eb   : > { %v4941_v8 = vpop.permute.xlu0 %4940 }
0x13ec   : > { %8670 = vmatprep.subr.mxu1 %v4941_v8 }
0x13ed   : > { %8671 = vmatpush3.msra.mxu1 %v4941_v8 }
0x13ee   : > { %8682 = vmatprep.subr.mxu1 %v11670_v47 }
0x13ef   : > { %v4939_v23 = vpop.permute.xlu0 %4938 }
0x13f1   : > { %v9385_v11 = vpop.eup %9384 }
0x13f2   : > { %v4853_v12 = vmul.f32 %v9385_v11, %v9381_v60 }
0x13f3   : > { %v5133_v62 = vpop.permute.xlu0 %5132 }
0x13f4   : > { %8658 = vmatprep.mubr.msk.f32.mxu0 %vm2582_vm1, %v4853_v12 }
0x13f5   : > { %v9387_v13 = vpop.eup %9386 }
0x13f6   : > { %v4854_v61 = vmul.f32 %v9387_v13, %v9383_v19 }
0x13f8   : > { %8659 = vmatmul.mubr.msk.f32.vlgmr.msra.gmra.mxu0 %vm2582_vm1, %v4854_v61 }
0x13f9   : > { %8662 = vmatpush3.xpose.msk.msra.mxu0 %vm2494_vm0, %v4943_v27  ;;  %8665 = vmatprep.mubr.msk.f32.mxu0 %vm2494_vm0, %v4937_v45 }
0x13fa   : > { %8663 = vmatprep.subr.msk.mxu0 %vm2494_vm0, %v4941_v8 }
0x13fd   : > { %8664 = vmatpush3.xpose.msk.msra.mxu0 %vm2494_vm0, %v4941_v8 }
0x13fe   : > { %8675 = vmatprep.subr.msk.mxu0 %vm2494_vm0, %v11670_v47 }
0x1400   : > { %8666 = vmatmul.mubr.msk.f32.vlgmr.msra.gmra.mxu0 %vm2494_vm0, %v4939_v23 }
0x1401   : > { %8676 = vmatpush3.xpose.msk.msra.mxu0 %vm2494_vm0, %v11670_v47  ;;  %8679 = vmatprep.mubr.msk.f32.mxu0 %vm2494_vm0, %v5133_v62 }
0x1402   : > { %8677 = vmatprep.subr.msk.mxu0 %vm2494_vm0, %v11682_v63 }
0x1405   : > { %8678 = vmatpush3.xpose.msk.msra.mxu0 %vm2494_vm0, %v11682_v63 }
0x1408   : > { %8680 = vmatmul.mubr.msk.f32.vlgmr.msra.gmra.mxu0 %vm2494_vm0, %v5135_v2 }
0x14b8   : > { %v11692_v3 = vpop.f32.mrf.mxu0 }
0x14ba   : > { %v11694_v4 = vpop.f32.mrf.mxu0 }
0x14c0   : > { %v8667_v5 = vpop.f32.mrf.mxu0 }
0x14c1   : > { %v5024_v6 = vadd.f32 %v8667_v5, %v11640_v20 }
0x14c2   : > { %v5018_v18 = vpop.f32.mrf.mxu0 }
0x14c3   : > { %v5019_v10 = vadd.f32 %v5018_v18, %v11645_v50  ;;  %v5030_v7 = vsel %vm2582_vm1, %v5024_v6, -inf }
0x14c4   : > { %5031 = vmax.xlane.f32.xlu1 %v5030_v7 }
0x14c5   : > { %v5027_v14 = vsel %vm2582_vm1, %v5019_v10, -inf }
0x14c6   : > { %5028 = vmax.xlane.f32.xlu0 %v5027_v14 }
0x14c8   : > { %v8681_v16 = vpop.f32.mrf.mxu0 }
0x14c9   : > { %v5220_v22 = vadd.f32 %v8681_v16, %v11640_v20 }
0x14ca   : > { %v5214_v17 = vpop.f32.mrf.mxu0 }
0x14cb   : > { %v5215_v43 = vadd.f32 %v5214_v17, %v11645_v50  ;;  %v5226_v32 = vsel %vm2582_vm1, %v5220_v22, -inf }
0x14cd   : > { %v5223_v31 = vsel %vm2582_vm1, %v5215_v43, -inf }
0x14ce   : > { %5224 = vmax.xlane.f32.xlu0 %v5223_v31 }
0x14d2   : > { %5227 = vmax.xlane.f32.xlu0 %v5226_v32 }
0x14d5   : > { %5334 = vrot.lane.b32.xlu1 %v11605_v38, %s10217_s29 }
0x154d   : > { %v5032_v34 = vpop.xlane.xlu1 %5031 }
0x154e   : > { %v5034_v36 = vsub.f32 %v5024_v6, %v5032_v34 }
0x154f   : > { %v5029_v40 = vpop.xlane.xlu0 %5028 }
0x1550   : > { %v5037_v41 = vmul.f32 1.442695, %v5034_v36  ;;  %v5033_v48 = vsub.f32 %v5019_v10, %v5029_v40 }
0x1551   : > { %v5335_v21 = vpop.permute.xlu1 %5334 }
0x1552   : > { %9388 = vpow2.f32 %v5037_v41  ;;  %v5035_v51 = vmul.f32 1.442695, %v5033_v48  ;;  %8696 = vmatprep.subr.mxu0 %v5335_v21 }
0x1553   : > { %8697 = vmatpush3.msra.mxu0 %v5335_v21 }
0x1554   : > { %9390 = vpow2.f32 %v5035_v51 }
0x1557   : > { %v5225_v52 = vpop.xlane.xlu0 %5224 }
0x1558   : > { %v5229_v58 = vsub.f32 %v5215_v43, %v5225_v52 }
0x155a   : > { %v5231_v59 = vmul.f32 1.442695, %v5229_v58 }
0x155b   : > { %v5228_v53 = vpop.xlane.xlu0 %5227 }
0x155c   : > { %v5230_v9 = vsub.f32 %v5220_v22, %v5228_v53 }
0x155e   : > { %v5233_v42 = vmul.f32 1.442695, %v5230_v9 }
0x155f   : > { %v9389_v54 = vpop.eup %9388 }
0x1560   : > { %9392 = vpow2.f32 %v5233_v42  ;;  %v5042_v44 = vsel %vm2582_vm1, %v9389_v54, 0.0 }
0x1561   : > { %v9391_v38 = vpop.eup %9390  ;;  %5043 = vadd.xlane.f32.xlu0 %v5042_v44  ;;  %9394 = vpow2.f32 %v5231_v59  ;;  %v4401_v44 = vrot.slane %v11618_v39, %v11160_v57 }
0x1562   : > { %v5039_v15 = vsel %vm2582_vm1, %v9391_v38, 0.0 }
0x1563   : > { %5040 = vadd.xlane.f32.xlu1 %v5039_v15  ;;  %v11772_v39 = vadd.f32 %v11635_v24, %v4401_v44 }
0x156d   : > { %v9393_v56 = vpop.eup %9392 }
0x156e   : > { %v5238_v27 = vsel %vm2582_vm1, %v9393_v56, 0.0  ;;  %v9395_v60 = vpop.eup %9394 }
0x156f   : > { %5239 = vadd.xlane.f32.xlu0 %v5238_v27  ;;  %v5235_v33 = vsel %vm2582_vm1, %v9395_v60, 0.0 }
0x1574   : > { %5328 = vrot.lane.b32.xlu1 %v11622_v29, %s10217_s29 }
0x1585   : > { %5332 = vrot.lane.b32.xlu0 %v11603_v37, %s10217_s29  ;;  %v11717_v37 = vadd.f32 %v4710_v46, %v11597_v30 }
0x1598   : > { %5236 = vadd.xlane.f32.xlu1 %v5235_v33 }
0x15a9   : > { %5330 = vrot.lane.b32.xlu1 %v11628_v49, %s10217_s29 }
0x15ea   : > { %v5044_v19 = vpop.xlane.xlu0 %5043 }
0x15eb   : > { %9396 = vrcp.f32 %v5044_v19 }
0x15ec   : > { %v5041_v28 = vpop.xlane.xlu1 %5040 }
0x15ed   : > { %9398 = vrcp.f32 %v5041_v28 }
0x15f0   : > { %v5329_v49 = vpop.permute.xlu1 %5328 }
0x15f8   : > { %v5240_v25 = vpop.xlane.xlu0 %5239  ;;  %v9397_v45 = vpop.eup %9396 }
0x15f9   : > { %v5048_v12 = vmul.f32 %v9397_v45, %v9389_v54  ;;  %9400 = vrcp.f32 %v5240_v25 }
0x15fa   : > { %v9399_v29 = vpop.eup %9398 }
0x15fb   : > { %v5047_v8 = vmul.f32 %v9399_v29, %v9391_v38 }
0x15fc   : > { %v5333_v11 = vpop.permute.xlu0 %5332 }
0x15fd   : > { %8672 = vmatprep.mubr.msk.f32.mxu1 %vm2582_vm1, %v5047_v8  ;;  %8698 = vmatprep.subr.mxu0 %v5333_v11 }
0x15fe   : > { %8673 = vmatmul.mubr.msk.f32.vlgmr.msra.gmra.mxu1 %vm2582_vm1, %v5048_v12  ;;  %8699 = vmatpush3.msra.mxu0 %v5333_v11 }
0x15ff   : > { %8683 = vmatpush3.msra.mxu1 %v11670_v47  ;;  %8703 = vmatprep.subr.msk.mxu0 %vm2494_vm0, %v11717_v37 }
0x1600   : > { %8684 = vmatprep.subr.mxu1 %v11682_v63 }
0x1601   : > { %8685 = vmatpush3.msra.mxu1 %v11682_v63 }
0x1602   : > { %8689 = vmatprep.subr.msk.mxu1 %vm2494_vm0, %v5335_v21 }
0x1606   : > { %v9401_v13 = vpop.eup %9400 }
0x1607   : > { %v5244_v62 = vmul.f32 %v9401_v13, %v9393_v56  ;;  %v11760_v56 = vadd.f32 %v11624_v26, %v4401_v44 }
0x1621   : > { %v5237_v30 = vpop.xlane.xlu1 %5236 }
0x1622   : > { %9402 = vrcp.f32 %v5237_v30 }
0x1625   : > { %v5331_v47 = vpop.permute.xlu1 %5330 }
0x162f   : > { %v9403_v61 = vpop.eup %9402 }
0x1630   : > { %v5243_v23 = vmul.f32 %v9403_v61, %v9395_v60 }
0x1632   : > { %8686 = vmatprep.mubr.msk.f32.mxu1 %vm2582_vm1, %v5243_v23 }
0x1633   : > { %8687 = vmatmul.mubr.msk.f32.vlgmr.msra.gmra.mxu1 %vm2582_vm1, %v5244_v62 }
0x1634   : > { %8690 = vmatpush3.xpose.msk.msra.mxu1 %vm2494_vm0, %v5335_v21  ;;  %8693 = vmatprep.mubr.msk.f32.mxu1 %vm2494_vm0, %v5329_v49 }
0x1635   : > { %8691 = vmatprep.subr.msk.mxu1 %vm2494_vm0, %v5333_v11 }
0x1638   : > { %8692 = vmatpush3.xpose.msk.msra.mxu1 %vm2494_vm0, %v5333_v11 }
0x1639   : > { %8710 = vmatprep.subr.mxu1 %v11717_v37 }
0x163b   : > { %8694 = vmatmul.mubr.msk.f32.vlgmr.msra.gmra.mxu1 %vm2494_vm0, %v5331_v47 }
0x163c   : > { %8711 = vmatpush3.msra.mxu1 %v11717_v37 }
0x163d   : > { %8712 = vmatprep.subr.mxu1 %v11601_v35 }
0x163e   : > { %8713 = vmatpush3.msra.mxu1 %v11601_v35 }
0x16be   : > { %v11738_v63 = vpop.f32.mrf.mxu1 }
0x16c0   : > { %v11740_v2 = vpop.f32.mrf.mxu1 }
0x16c1   : > { %v8927_v5 = vpack.i.bf16 %v11738_v63, %v11740_v2  ;;  %v9252_v63 = vld [vmem:[%s11011_s30 + $0x70] ss:$8 sps:$4 sm:$0xff]   ;;  %v9254_v2 = vld [vmem:[%s11011_s30 + $0x74] ss:$8 sps:$4 sm:$0xff]  }
0x16f3   : > { %v11744_v6 = vpop.f32.mrf.mxu1 }
0x16f5   : > { %v11746_v18 = vpop.f32.mrf.mxu1 }
0x16f6   : > { %v8937_v10 = vpack.i.bf16 %v11744_v6, %v11746_v18 }
0x16fb   : > { %v8695_v7 = vpop.f32.mrf.mxu1 }
0x16fc   : > { %v5416_v14 = vadd.f32 %v8695_v7, %v11640_v20 }
0x16fd   : > { %v5410_v16 = vpop.f32.mrf.mxu1 }
0x16fe   : > { %v5411_v17 = vadd.f32 %v5410_v16, %v11645_v50  ;;  %v5422_v43 = vsel %vm2582_vm1, %v5416_v14, -inf }
0x16ff   : > { %5423 = vmax.xlane.f32.xlu1 %v5422_v43 }
0x1700   : > { %v5419_v22 = vsel %vm2582_vm1, %v5411_v17, -inf }
0x1701   : > { %5420 = vmax.xlane.f32.xlu0 %v5419_v22 }
0x1788   : > { %v5424_v31 = vpop.xlane.xlu1 %5423 }
0x1789   : > { %v5426_v32 = vsub.f32 %v5416_v14, %v5424_v31 }
0x178a   : > { %v5421_v34 = vpop.xlane.xlu0 %5420 }
0x178b   : > { %v5425_v36 = vsub.f32 %v5411_v17, %v5421_v34  ;;  %v5429_v40 = vmul.f32 1.442695, %v5426_v32 }
0x178d   : > { %v5427_v41 = vmul.f32 1.442695, %v5425_v36 }
0x178f   : > { %9404 = vpow2.f32 %v5427_v41 }
0x1790   : > { %9406 = vpow2.f32 %v5429_v40 }
0x179c   : > { %v9405_v48 = vpop.eup %9404 }
0x179d   : > { %v5431_v21 = vsel %vm2582_vm1, %v9405_v48, 0.0  ;;  %v9407_v51 = vpop.eup %9406 }
0x179e   : > { %5432 = vadd.xlane.f32.xlu0 %v5431_v21  ;;  %v5434_v52 = vsel %vm2582_vm1, %v9407_v51, 0.0 }
0x17a2   : > { %5435 = vadd.xlane.f32.xlu0 %v5434_v52 }
0x1827   : > { %v5433_v53 = vpop.xlane.xlu0 %5432 }
0x1828   : > { %9408 = vrcp.f32 %v5433_v53 }
0x182b   : > { %v5436_v9 = vpop.xlane.xlu0 %5435 }
0x182c   : > { %9410 = vrcp.f32 %v5436_v9 }
0x1835   : > { %v9409_v42 = vpop.eup %9408 }
0x1836   : > { %v5439_v54 = vmul.f32 %v9409_v42, %v9405_v48 }
0x1838   : > { %8700 = vmatprep.mubr.msk.f32.mxu0 %vm2582_vm1, %v5439_v54 }
0x1839   : > { %v9411_v38 = vpop.eup %9410 }
0x183a   : > { %v5440_v15 = vmul.f32 %v9411_v38, %v9407_v51 }
0x183c   : > { %8701 = vmatmul.mubr.msk.f32.vlgmr.msra.gmra.mxu0 %vm2582_vm1, %v5440_v15 }
0x183d   : > { %8704 = vmatpush3.xpose.msk.msra.mxu0 %vm2494_vm0, %v11717_v37  ;;  %8707 = vmatprep.mubr.msk.f32.mxu0 %vm2494_vm0, %v11760_v56 }
0x183e   : > { %8705 = vmatprep.subr.msk.mxu0 %vm2494_vm0, %v11601_v35 }
0x1841   : > { %8706 = vmatpush3.xpose.msk.msra.mxu0 %vm2494_vm0, %v11601_v35 }
0x1844   : > { %8708 = vmatmul.mubr.msk.f32.vlgmr.msra.gmra.mxu0 %vm2494_vm0, %v11772_v39 }
0x18fc   : > { %v11776_v26 = vpop.f32.mrf.mxu0 }
0x18fe   : > { %v11778_v27 = vpop.f32.mrf.mxu0 }
0x18ff   : > { %v8947_v58 = vpack.i.bf16 %v11776_v26, %v11778_v27 }
0x1904   : > { %v8709_v59 = vpop.f32.mrf.mxu0 }
0x1905   : > { %v5608_v60 = vadd.f32 %v8709_v59, %v11640_v20 }
0x1906   : > { %v5602_v33 = vpop.f32.mrf.mxu0 }
0x1907   : > { %v5603_v19 = vadd.f32 %v5602_v33, %v11645_v50  ;;  %v5614_v28 = vsel %vm2582_vm1, %v5608_v60, -inf }
0x1908   : > { %5615 = vmax.xlane.f32.xlu0 %v5614_v28 }
0x1909   : > { %v5611_v24 = vsel %vm2582_vm1, %v5603_v19, -inf }
0x190a   : > { %5612 = vmax.xlane.f32.xlu1 %v5611_v24 }
0x191b   : > { %5720 = vrot.lane.b32.xlu1 %v11717_v37, %s10215_s26 }
0x191f   : > { %5714 = vrot.lane.b32.xlu1 %v11760_v56, %s10215_s26 }
0x1991   : > { %v5616_v25 = vpop.xlane.xlu0 %5615 }
0x1992   : > { %v5618_v45 = vsub.f32 %v5608_v60, %v5616_v25 }
0x1993   : > { %v5613_v29 = vpop.xlane.xlu1 %5612 }
0x1994   : > { %v5621_v46 = vmul.f32 1.442695, %v5618_v45  ;;  %v5617_v8 = vsub.f32 %v5603_v19, %v5613_v29 }
0x1996   : > { %9412 = vpow2.f32 %v5621_v46  ;;  %v5619_v11 = vmul.f32 1.442695, %v5617_v8 }
0x1997   : > { %v5721_v12 = vpop.permute.xlu1 %5720 }
0x1998   : > { %9414 = vpow2.f32 %v5619_v11  ;;  %8717 = vmatprep.subr.msk.mxu1 %vm2494_vm0, %v5721_v12  ;;  %8724 = vmatprep.subr.mxu0 %v5721_v12 }
0x1999   : > { %8725 = vmatpush3.msra.mxu0 %v5721_v12 }
0x199b   : > { %v5715_v23 = vpop.permute.xlu1 %5714 }
0x19a3   : > { %v9413_v49 = vpop.eup %9412 }
0x19a4   : > { %v5626_v30 = vsel %vm2582_vm1, %v9413_v49, 0.0 }
0x19a5   : > { %v9415_v13 = vpop.eup %9414  ;;  %5627 = vadd.xlane.f32.xlu0 %v5626_v30 }
0x19a6   : > { %v5623_v61 = vsel %vm2582_vm1, %v9415_v13, 0.0 }
0x19a7   : > { %5624 = vadd.xlane.f32.xlu1 %v5623_v61 }
0x19b8   : > { %5716 = vrot.lane.b32.xlu1 %v11772_v39, %s10215_s26 }
0x19bb   : > { %5718 = vrot.lane.b32.xlu0 %v11601_v35, %s10215_s26 }
0x1a2e   : > { %v5628_v62 = vpop.xlane.xlu0 %5627 }
0x1a2f   : > { %9416 = vrcp.f32 %v5628_v62 }
0x1a30   : > { %v5625_v47 = vpop.xlane.xlu1 %5624 }
0x1a31   : > { %9418 = vrcp.f32 %v5625_v47 }
0x1a32   : > { %v5719_v7 = vpop.permute.xlu0 %5718 }
0x1a33   : > { %8726 = vmatprep.subr.mxu0 %v5719_v7 }
0x1a34   : > { %8727 = vmatpush3.msra.mxu0 %v5719_v7  ;;  %v5717_v22 = vpop.permute.xlu1 %5716 }
0x1a3c   : > { %v9417_v14 = vpop.eup %9416 }
0x1a3d   : > { %v5632_v43 = vmul.f32 %v9417_v14, %v9413_v49 }
0x1a3e   : > { %v9419_v16 = vpop.eup %9418 }
0x1a3f   : > { %v5631_v17 = vmul.f32 %v9419_v16, %v9415_v13 }
0x1a41   : > { %8714 = vmatprep.mubr.msk.f32.mxu1 %vm2582_vm1, %v5631_v17 }
0x1a42   : > { %8715 = vmatmul.mubr.msk.f32.vlgmr.msra.gmra.mxu1 %vm2582_vm1, %v5632_v43 }
0x1a43   : > { %8718 = vmatpush3.xpose.msk.msra.mxu1 %vm2494_vm0, %v5721_v12  ;;  %8721 = vmatprep.mubr.msk.f32.mxu1 %vm2494_vm0, %v5715_v23 }
0x1a44   : > { %8719 = vmatprep.subr.msk.mxu1 %vm2494_vm0, %v5719_v7 }
0x1a47   : > { %8720 = vmatpush3.xpose.msk.msra.mxu1 %vm2494_vm0, %v5719_v7 }
0x1a4a   : > { %8722 = vmatmul.mubr.msk.f32.vlgmr.msra.gmra.mxu1 %vm2494_vm0, %v5717_v22 }
0x1b02   : > { %v11804_v31 = vpop.f32.mrf.mxu1 }
0x1b04   : > { %v11806_v32 = vpop.f32.mrf.mxu1 }
0x1b0a   : > { %v8723_v34 = vpop.f32.mrf.mxu1 }
0x1b0b   : > { %v5802_v36 = vadd.f32 %v8723_v34, %v11640_v20 }
0x1b0c   : > { %v5796_v40 = vpop.f32.mrf.mxu1 }
0x1b0d   : > { %v5797_v41 = vadd.f32 %v5796_v40, %v11645_v50  ;;  %v5808_v48 = vsel %vm2582_vm1, %v5802_v36, -inf }
0x1b0e   : > { %5809 = vmax.xlane.f32.xlu1 %v5808_v48 }
0x1b0f   : > { %v5805_v21 = vsel %vm2582_vm1, %v5797_v41, -inf }
0x1b10   : > { %5806 = vmax.xlane.f32.xlu0 %v5805_v21 }
0x1b1f   : > { %5916 = vrot.lane.b32.xlu1 %v11717_v37, %s10216_s21 }
0x1b23   : > { %5910 = vrot.lane.b32.xlu1 %v11760_v56, %s10216_s21 }
0x1b27   : > { %5912 = vrot.lane.b32.xlu1 %v11772_v39, %s10216_s21 }
0x1b97   : > { %v5810_v51 = vpop.xlane.xlu1 %5809 }
0x1b98   : > { %v5812_v52 = vsub.f32 %v5802_v36, %v5810_v51 }
0x1b99   : > { %v5807_v53 = vpop.xlane.xlu0 %5806 }
0x1b9a   : > { %v5811_v9 = vsub.f32 %v5797_v41, %v5807_v53  ;;  %v5815_v54 = vmul.f32 1.442695, %v5812_v52 }
0x1b9b   : > { %v5917_v42 = vpop.permute.xlu1 %5916 }
0x1b9c   : > { %v5813_v44 = vmul.f32 1.442695, %v5811_v9  ;;  %8731 = vmatprep.subr.msk.mxu0 %vm2494_vm0, %v5917_v42  ;;  %8738 = vmatprep.subr.mxu1 %v5917_v42 }
0x1b9d   : > { %8739 = vmatpush3.msra.mxu1 %v5917_v42 }
0x1b9e   : > { %9420 = vpow2.f32 %v5813_v44 }
0x1b9f   : > { %9422 = vpow2.f32 %v5815_v54  ;;  %v5911_v46 = vpop.permute.xlu1 %5910 }
0x1ba3   : > { %v5913_v8 = vpop.permute.xlu1 %5912 }
0x1bab   : > { %v9421_v38 = vpop.eup %9420 }
0x1bac   : > { %v5817_v15 = vsel %vm2582_vm1, %v9421_v38, 0.0  ;;  %v9423_v59 = vpop.eup %9422 }
0x1bad   : > { %5818 = vadd.xlane.f32.xlu0 %v5817_v15  ;;  %v5820_v60 = vsel %vm2582_vm1, %v9423_v59, 0.0 }
0x1bb1   : > { %5821 = vadd.xlane.f32.xlu0 %v5820_v60 }
0x1bc7   : > { %5914 = vrot.lane.b32.xlu0 %v11601_v35, %s10216_s21 }
0x1c36   : > { %v5819_v33 = vpop.xlane.xlu0 %5818 }
0x1c37   : > { %9424 = vrcp.f32 %v5819_v33 }
0x1c3a   : > { %v5822_v19 = vpop.xlane.xlu0 %5821 }
0x1c3b   : > { %9426 = vrcp.f32 %v5822_v19 }
0x1c3e   : > { %v5915_v28 = vpop.permute.xlu0 %5914 }
0x1c3f   : > { %8740 = vmatprep.subr.mxu1 %v5915_v28 }
0x1c40   : > { %8741 = vmatpush3.msra.mxu1 %v5915_v28 }
0x1c44   : > { %v9425_v24 = vpop.eup %9424 }
0x1c45   : > { %v5825_v25 = vmul.f32 %v9425_v24, %v9421_v38 }
0x1c47   : > { %8728 = vmatprep.mubr.msk.f32.mxu0 %vm2582_vm1, %v5825_v25 }
0x1c48   : > { %v9427_v45 = vpop.eup %9426 }
0x1c49   : > { %v5826_v29 = vmul.f32 %v9427_v45, %v9423_v59 }
0x1c4b   : > { %8729 = vmatmul.mubr.msk.f32.vlgmr.msra.gmra.mxu0 %vm2582_vm1, %v5826_v29 }
0x1c4c   : > { %8732 = vmatpush3.xpose.msk.msra.mxu0 %vm2494_vm0, %v5917_v42  ;;  %8735 = vmatprep.mubr.msk.f32.mxu0 %vm2494_vm0, %v5911_v46 }
0x1c4d   : > { %8733 = vmatprep.subr.msk.mxu0 %vm2494_vm0, %v5915_v28 }
0x1c50   : > { %8734 = vmatpush3.xpose.msk.msra.mxu0 %vm2494_vm0, %v5915_v28 }
0x1c53   : > { %8736 = vmatmul.mubr.msk.f32.vlgmr.msra.gmra.mxu0 %vm2494_vm0, %v5913_v8 }
0x1d0b   : > { %v11830_v11 = vpop.f32.mrf.mxu0 }
0x1d0d   : > { %v5901_v12 = vpop.f32.mrf.mxu0 }
0x1d0e   : > { %v8922_v49 = vpack.i.bf16 %v11830_v11, %v5901_v12  ;;  %v9255_v12 = vld [vmem:[%s11011_s30 + $0x60] ss:$8 sps:$4 sm:$0xff]  }
0x1d13   : > { %v8737_v30 = vpop.f32.mrf.mxu0 }
0x1d14   : > { %v5998_v13 = vadd.f32 %v8737_v30, %v11640_v20  ;;  %v9258_v30 = vld [vmem:[%s11011_s30 + $0x50] ss:$8 sps:$4 sm:$0xff]  }
0x1d15   : > { %v5992_v61 = vpop.f32.mrf.mxu0 }
0x1d16   : > { %v5993_v23 = vadd.f32 %v5992_v61, %v11645_v50  ;;  %v6004_v62 = vsel %vm2582_vm1, %v5998_v13, -inf  ;;  %v9261_v61 = vld [vmem:[%s11011_s30 + $0x40] ss:$8 sps:$4 sm:$0xff]  }
0x1d17   : > { %6005 = vmax.xlane.f32.xlu1 %v6004_v62  ;;  %v9264_v62 = vld [vmem:[%s11011_s30 + $0x30] ss:$8 sps:$4 sm:$0xff]  }
0x1d18   : > { %v6001_v47 = vsel %vm2582_vm1, %v5993_v23, -inf }
0x1d19   : > { %6002 = vmax.xlane.f32.xlu0 %v6001_v47  ;;  %v9269_v47 = vld [vmem:[%s11011_s30 + $0x24] ss:$8 sps:$4 sm:$0xff]  }
0x1d28   : > { %6112 = vrot.lane.b32.xlu1 %v11717_v37, %s10217_s29 }
0x1d2c   : > { %6106 = vrot.lane.b32.xlu1 %v11760_v56, %s10217_s29 }
0x1d30   : > { %6108 = vrot.lane.b32.xlu1 %v11772_v39, %s10217_s29 }
0x1da0   : > { %v6006_v7 = vpop.xlane.xlu1 %6005 }
0x1da1   : > { %v6008_v14 = vsub.f32 %v5998_v13, %v6006_v7  ;;  %v9263_v13 = vld [vmem:[%s11011_s30 + $0x44] ss:$8 sps:$4 sm:$0xff]   ;;  %v9267_v7 = vld [vmem:[%s11011_s30 + $0x20] ss:$8 sps:$4 sm:$0xff]  }
0x1da2   : > { %v6003_v16 = vpop.xlane.xlu0 %6002 }
0x1da3   : > { %v6007_v17 = vsub.f32 %v5993_v23, %v6003_v16  ;;  %v6011_v22 = vmul.f32 1.442695, %v6008_v14  ;;  %v9266_v23 = vld [vmem:[%s11011_s30 + $0x34] ss:$8 sps:$4 sm:$0xff]   ;;  %v9270_v16 = vld [vmem:[%s11011_s30 + $0x10] ss:$8 sps:$4 sm:$0xff]  }
0x1da4   : > { %v6113_v43 = vpop.permute.xlu1 %6112  ;;  %v9272_v14 = vld [vmem:[%s11011_s30 + $0x14] ss:$8 sps:$4 sm:$0xff]  }
0x1da5   : > { %v6009_v34 = vmul.f32 1.442695, %v6007_v17  ;;  %8745 = vmatprep.subr.msk.mxu1 %vm2494_vm0, %v6113_v43  ;;  %8752 = vmatprep.subr.mxu0 %v6113_v43  ;;  %v9275_v17 = vld [vmem:[%s11011_s30 + $0x4] ss:$8 sps:$4 sm:$0xff]  }
0x1da6   : > { %8753 = vmatpush3.msra.mxu0 %v6113_v43 }
0x1da7   : > { %9428 = vpow2.f32 %v6009_v34  ;;  %v9276_v34 = vld [vmem:[%s11011_s30 + $0xf0] ss:$8 sps:$4 sm:$0xff]  }
0x1da8   : > { %9430 = vpow2.f32 %v6011_v22  ;;  %v6107_v9 = vpop.permute.xlu1 %6106  ;;  %v9278_v22 = vld [vmem:[%s11011_s30 + $0xf4] ss:$8 sps:$4 sm:$0xff]  }
0x1db4   : > { %v9429_v37 = vpop.eup %9428 }
0x1db5   : > { %v6013_v36 = vsel %vm2582_vm1, %v9429_v37, 0.0  ;;  %v9431_v56 = vpop.eup %9430 }
0x1db6   : > { %6014 = vadd.xlane.f32.xlu0 %v6013_v36  ;;  %v6016_v39 = vsel %vm2582_vm1, %v9431_v56, 0.0  ;;  %v9279_v36 = vld [vmem:[%s11011_s30 + $0xe0] ss:$8 sps:$4 sm:$0xff]  }
0x1dba   : > { %6017 = vadd.xlane.f32.xlu0 %v6016_v39  ;;  %v9282_v39 = vld [vmem:[%s11011_s30 + $0xd0] ss:$8 sps:$4 sm:$0xff]  }
0x1dd0   : > { %6110 = vrot.lane.b32.xlu0 %v11601_v35, %s10217_s29  ;;  %v6109_v35 = vpop.permute.xlu1 %6108 }
0x1e3f   : > { %v6015_v40 = vpop.xlane.xlu0 %6014 }
0x1e40   : > { %9432 = vrcp.f32 %v6015_v40  ;;  %v9287_v40 = vld [vmem:[%s11011_s30 + $0xc4] ss:$8 sps:$4 sm:$0xff]  }
0x1e43   : > { %v6018_v41 = vpop.xlane.xlu0 %6017 }
0x1e44   : > { %9434 = vrcp.f32 %v6018_v41  ;;  %v9285_v41 = vld [vmem:[%s11011_s30 + $0xc0] ss:$8 sps:$4 sm:$0xff]  }
0x1e47   : > { %v6111_v48 = vpop.permute.xlu0 %6110 }
0x1e48   : > { %8754 = vmatprep.subr.mxu0 %v6111_v48 }
0x1e49   : > { %8755 = vmatpush3.msra.mxu0 %v6111_v48 }
0x1e4a   : > { %6535 = vmatprep.subr.bf16.mxu0 %v9254_v2 }
0x1e4d   : > { %v9433_v21 = vpop.eup %9432 }
0x1e4e   : > { %v6021_v51 = vmul.f32 %v9433_v21, %v9429_v37  ;;  %v9281_v37 = vld [vmem:[%s11011_s30 + $0xe4] ss:$8 sps:$4 sm:$0xff]   ;;  %v9288_v21 = vld [vmem:[%s11011_s30 + $0xb0] ss:$8 sps:$4 sm:$0xff]  }
0x1e50   : > { %8742 = vmatprep.mubr.msk.f32.mxu1 %vm2582_vm1, %v6021_v51  ;;  %v9293_v51 = vld [vmem:[%s11011_s30 + $0xa4] ss:$8 sps:$4 sm:$0xff]  }
0x1e51   : > { %v9435_v52 = vpop.eup %9434 }
0x1e52   : > { %v6022_v53 = vmul.f32 %v9435_v52, %v9431_v56  ;;  %v9284_v56 = vld [vmem:[%s11011_s30 + $0xd4] ss:$8 sps:$4 sm:$0xff]   ;;  %v9291_v52 = vld [vmem:[%s11011_s30 + $0xa0] ss:$8 sps:$4 sm:$0xff]  }
0x1e54   : > { %8743 = vmatmul.mubr.msk.f32.vlgmr.msra.gmra.mxu1 %vm2582_vm1, %v6022_v53  ;;  %v9296_v53 = vld [vmem:[%s11011_s30 + $0x94] ss:$8 sps:$4 sm:$0xff]  }
0x1e55   : > { %8746 = vmatpush3.xpose.msk.msra.mxu1 %vm2494_vm0, %v6113_v43  ;;  %8749 = vmatprep.mubr.msk.f32.mxu1 %vm2494_vm0, %v6107_v9  ;;  %v9273_v43 = vld [vmem:[%s11011_s30] ss:$8 sps:$4 sm:$0xff]   ;;  %v9294_v9 = vld [vmem:[%s11011_s30 + $0x90] ss:$8 sps:$4 sm:$0xff]  }
0x1e56   : > { %8747 = vmatprep.subr.msk.mxu1 %vm2494_vm0, %v6111_v48 }
0x1e59   : > { %8748 = vmatpush3.xpose.msk.msra.mxu1 %vm2494_vm0, %v6111_v48  ;;  %v9290_v48 = vld [vmem:[%s11011_s30 + $0xb4] ss:$8 sps:$4 sm:$0xff]  }
0x1e5c   : > { %8750 = vmatmul.mubr.msk.f32.vlgmr.msra.gmra.mxu1 %vm2494_vm0, %v6109_v35  ;;  %v9297_v35 = vld [vmem:[%s11011_s30 + $0x80] ss:$8 sps:$4 sm:$0xff]  }
0x1f14   : > { %v8744_v42 = vpop.f32.mrf.mxu1 }
0x1f16   : > { %v6097_v54 = vpop.f32.mrf.mxu1 }
0x1f17   : > { %v8932_v19 = vpack.i.bf16 %v8744_v42, %v6097_v54  ;;  %v9299_v42 = vld [vmem:[%s11011_s30 + $0x84] ss:$8 sps:$4 sm:$0xff]  }
0x1f1c   : > { %v8751_v44 = vpop.f32.mrf.mxu1 }
0x1f1d   : > { %v6194_v38 = vadd.f32 %v8751_v44, %v11640_v20 }
0x1f1e   : > { %v6188_v15 = vpop.f32.mrf.mxu1 }
0x1f1f   : > { %v6189_v59 = vadd.f32 %v6188_v15, %v11645_v50  ;;  %v6200_v60 = vsel %vm2582_vm1, %v6194_v38, -inf }
0x1f20   : > { %6201 = vmax.xlane.f32.xlu1 %v6200_v60 }
0x1f21   : > { %v6197_v33 = vsel %vm2582_vm1, %v6189_v59, -inf }
0x1f22   : > { %6198 = vmax.xlane.f32.xlu0 %v6197_v33 }
0x1f31   : > { %8923 = vrot.lane.b32.xlu1 %v8922_v49, %s10217_s29  ;;  %v9260_v49 = vld [vmem:[%s11011_s30 + $0x54] ss:$8 sps:$4 sm:$0xff]  }
0x1f35   : > { %8933 = vrot.lane.b32.xlu1 %v8932_v19, %s10216_s21 }
0x1f39   : > { %8938 = vrot.lane.b32.xlu1 %v8937_v10, %s10216_s21 }
0x1f3d   : > { %8948 = vrot.lane.b32.xlu1 %v8947_v58, %s10215_s26 }
0x1fa9   : > { %v6202_v20 = vpop.xlane.xlu1 %6201 }
0x1faa   : > { %v6204_v50 = vsub.f32 %v6194_v38, %v6202_v20 }
0x1fab   : > { %v6199_v28 = vpop.xlane.xlu0 %6198 }
0x1fac   : > { %v6203_v24 = vsub.f32 %v6189_v59, %v6199_v28  ;;  %v6207_v25 = vmul.f32 1.442695, %v6204_v50 }
0x1fad   : > { %v8924_v15 = vpop.permute.xlu1 %8923 }
0x1fae   : > { %v6205_v45 = vmul.f32 1.442695, %v6203_v24  ;;  %v8926_v24 = vunpack.i.h.bf16 %v8924_v15 }
0x1fb0   : > { %9436 = vpow2.f32 %v6205_v45 }
0x1fb1   : > { %9438 = vpow2.f32 %v6207_v25  ;;  %v8934_v59 = vpop.permute.xlu1 %8933  ;;  %v8925_v25 = vunpack.i.l.bf16 %v8924_v15 }
0x1fb5   : > { %v8939_v33 = vpop.permute.xlu1 %8938 }
0x1fb6   : > { %v8941_v45 = vunpack.i.h.bf16 %v8939_v33 }
0x1fbd   : > { %v9437_v29 = vpop.eup %9436 }
0x1fbe   : > { %v6209_v46 = vsel %vm2582_vm1, %v9437_v29, 0.0  ;;  %v9439_v8 = vpop.eup %9438 }
0x1fbf   : > { %6210 = vadd.xlane.f32.xlu0 %v6209_v46  ;;  %v6212_v6 = vsel %vm2582_vm1, %v9439_v8, 0.0  ;;  %v8949_v46 = vpop.permute.xlu1 %8948 }
0x1fc3   : > { %6213 = vadd.xlane.f32.xlu0 %v6212_v6  ;;  %v8935_v6 = vunpack.i.l.bf16 %v8934_v59 }
0x1fd9   : > { %8928 = vrot.lane.b32.xlu0 %v8927_v5, %s10217_s29  ;;  %v9257_v5 = vld [vmem:[%s11011_s30 + $0x64] ss:$8 sps:$4 sm:$0xff]   ;;  %s12233_s30 = sld [smem:[#allocation46_spill]] }
0x1fdf   : > { %s8405_s21 = sshll.u32 %s12233_s30, 5 }
0x1fe0   : > { %s6580_s29 = scalar_lea.vmem [#allocation3], %s8405_s21 }
0x2048   : > { %v6211_v18 = vpop.xlane.xlu0 %6210 }
0x2049   : > { %9440 = vrcp.f32 %v6211_v18 }
0x204c   : > { %v6214_v10 = vpop.xlane.xlu0 %6213 }
0x204d   : > { %9442 = vrcp.f32 %v6214_v10 }
0x2050   : > { %v8929_v60 = vpop.permute.xlu0 %8928 }
0x2051   : > { %v8931_v19 = vunpack.i.h.bf16 %v8929_v60  ;;  %v8930_v20 = vunpack.i.l.bf16 %v8929_v60 }
0x2053   : > { %v6351_v50 = vsel %vm2494_vm0, %v11692_v3, %v8931_v19  ;;  %v6350_v28 = vsel %vm2494_vm0, %v11694_v4, %v8930_v20  ;;  %v6357_v3 = vsel %vm2494_vm0, %v11804_v31, %v8926_v24  ;;  %v6356_v4 = vsel %vm2494_vm0, %v11806_v32, %v8925_v25 }
0x2054   : > { %v6353_v18 = vsel %vm4130_vm2, %v6351_v50, %v8941_v45  ;;  %v6358_v2 = vsel %vm4130_vm2, %v6356_v4, %v8935_v6 }
0x2056   : > { %v9441_v26 = vpop.eup %9440 }
0x2057   : > { %v6217_v27 = vmul.f32 %v9441_v26, %v9437_v29  ;;  %v8940_v29 = vunpack.i.l.bf16 %v8939_v33  ;;  %v8951_v26 = vunpack.i.h.bf16 %v8949_v46 }
0x2059   : > { %8756 = vmatprep.mubr.msk.f32.mxu0 %vm2582_vm1, %v6217_v27  ;;  %v6352_v10 = vsel %vm4130_vm2, %v6350_v28, %v8940_v29  ;;  %v8950_v27 = vunpack.i.l.bf16 %v8949_v46 }
0x205a   : > { %v9443_v58 = vpop.eup %9442 }
0x205b   : > { %v6218_v11 = vmul.f32 %v9443_v58, %v9439_v8  ;;  %v8936_v8 = vunpack.i.h.bf16 %v8934_v59 }
0x205d   : > { %8757 = vmatmul.mubr.msk.f32.vlgmr.msra.gmra.mxu0 %vm2582_vm1, %v6218_v11 }
0x205e   : > { %6536 = vmatpush1.bf16.msra.mxu0 %v9252_v63 }
0x205f   : > { %6537 = vmatprep.subr.bf16.mxu0 %v9257_v5  ;;  %v6359_v5 = vsel %vm4130_vm2, %v6357_v3, %v8936_v8 }
0x2062   : > { %6538 = vmatpush1.bf16.msra.mxu0 %v9255_v12  ;;  %v6354_v12 = vsel %vm4133_vm3, %v6352_v10, %v8950_v27 }
0x2063   : > { %6539 = vmatprep.subr.bf16.mxu0 %v9260_v49  ;;  %v6355_v49 = vsel %vm4133_vm3, %v6353_v18, %v8951_v26 }
0x2064   : > { %v6362_v31 = vpack.c.bf16 %v6355_v49, %v6354_v12 }
0x2066   : > { %6540 = vmatpush1.bf16.msra.mxu0 %v9258_v30 }
0x2067   : > { %6541 = vmatprep.subr.bf16.mxu0 %v9263_v13 }
0x206a   : > { %6542 = vmatpush1.bf16.msra.mxu0 %v9261_v61 }
0x206b   : > { %6543 = vmatprep.subr.bf16.mxu0 %v9266_v23 }
0x206e   : > { %6544 = vmatpush1.bf16.msra.mxu0 %v9264_v62 }
0x206f   : > { %6545 = vmatprep.subr.bf16.mxu0 %v9269_v47 }
0x2072   : > { %6546 = vmatpush1.bf16.msra.mxu0 %v9267_v7 }
0x2073   : > { %6547 = vmatprep.subr.bf16.mxu0 %v9272_v14 }
0x2076   : > { %6548 = vmatpush1.bf16.msra.mxu0 %v9270_v16 }
0x2077   : > { %6549 = vmatprep.subr.bf16.mxu0 %v9275_v17 }
0x207a   : > { %6550 = vmatpush1.bf16.msra.mxu0 %v9273_v43 }
0x207b   : > { %6551 = vmatprep.subr.bf16.mxu0 %v9278_v22 }
0x207e   : > { %6552 = vmatpush2.bf16.msra.mxu0 %v9276_v34 }
0x207f   : > { %6553 = vmatprep.subr.bf16.mxu0 %v9281_v37 }
0x2082   : > { %6554 = vmatpush2.bf16.msra.mxu0 %v9279_v36 }
0x2083   : > { %6555 = vmatprep.subr.bf16.mxu0 %v9284_v56 }
0x2086   : > { %6556 = vmatpush2.bf16.msra.mxu0 %v9282_v39 }
0x2087   : > { %6557 = vmatprep.subr.bf16.mxu0 %v9287_v40 }
0x208a   : > { %6558 = vmatpush2.bf16.msra.mxu0 %v9285_v41 }
0x208b   : > { %6559 = vmatprep.subr.bf16.mxu0 %v9290_v48 }
0x208e   : > { %6560 = vmatpush2.bf16.msra.mxu0 %v9288_v21 }
0x208f   : > { %6561 = vmatprep.subr.bf16.mxu0 %v9293_v51 }
0x2092   : > { %6562 = vmatpush2.bf16.msra.mxu0 %v9291_v52 }
0x2093   : > { %6563 = vmatprep.subr.bf16.mxu0 %v9296_v53 }
0x2096   : > { %6564 = vmatpush2.bf16.msra.mxu0 %v9294_v9 }
0x2097   : > { %6565 = vmatprep.subr.bf16.mxu0 %v9299_v42 }
0x209a   : > { %6566 = vmatpush2.bf16.msra.mxu0 %v9297_v35 }
0x211d   : > { %v8758_v54 = vpop.f32.mrf.mxu0 }
0x211f   : > { %v6293_v44 = vpop.f32.mrf.mxu0 }
0x2120   : > { %v8942_v38 = vpack.i.bf16 %v8758_v54, %v6293_v44 }
0x2122   : > { %8943 = vrot.lane.b32.xlu0 %v8942_v38, %s10215_s26  ;;  %s12234_s26 = scalar_lea.vmem [#allocation30], %s10941_s13 }
0x2123   : > { %v4745_v32 = vld [vmem:[%s12234_s26] sm:$0x3] }
0x2124   : > { %v6368_v23 = vrot.slane %v4745_v32, %v11156_v55  ;;  %v6372_v62 = vrot.slane %v4745_v32, %v11160_v57 }
0x2194   : > { %v8944_v58 = vpop.permute.xlu0 %8943 }
0x2195   : > { %v8946_v11 = vunpack.i.h.bf16 %v8944_v58  ;;  %v8945_v63 = vunpack.i.l.bf16 %v8944_v58 }
0x2197   : > { %v6360_v30 = vsel %vm4133_vm3, %v6358_v2, %v8945_v63  ;;  %v6361_v13 = vsel %vm4133_vm3, %v6359_v5, %v8946_v11 }
0x2198   : > { %v6363_v61 = vpack.c.bf16 %v6361_v13, %v6360_v30 }
0x219a   : > { %6567 = vmatprep.mubr.bf16.mxu0 %v6363_v61 }
0x219b   : > { %6568 = vmatmul.mubr.bf16.vlgmr.msra.gmra.mxu0 %v6362_v31 }
0x225b   : > { %v6569_v47 = vpop.f32.mrf.mxu0 }
0x225c   : > { %v6570_v7 = vadd.f32 %v6569_v47, %v6368_v23 }
0x225d   : > { %v6571_v14 = vpop.f32.mrf.mxu0 }
0x225e   : > { %6581 = vst [vmem:[%s6580_s29] sm:$0xff] %v6570_v7  ;;  %6585 = vst [vmem:[#allocation2 + $0x10] sm:$0xff] %v6570_v7  ;;  %v6572_v16 = vadd.f32 %v6571_v14, %v6372_v62 }
0x225f   : > { %v6573_v17 = vpop.f32.mrf.mxu0 }
0x2260   : > { %6582 = vst [vmem:[%s6580_s29 + $0x8] sm:$0xff] %v6572_v16  ;;  %6586 = vst [vmem:[#allocation2] sm:$0xff] %v6572_v16  ;;  %v6574_v43 = vadd.f32 %v6573_v17, %v6368_v23 }
0x2261   : > { %v6575_v22 = vpop.f32.mrf.mxu0 }
0x2262   : > { %6583 = vst [vmem:[%s6580_s29 + $0x10] sm:$0xff] %v6574_v43  ;;  %6587 = vst [vmem:[#allocation2 + $0x18] sm:$0xff] %v6574_v43  ;;  %v6576_v34 = vadd.f32 %v6575_v22, %v6372_v62 }
0x2264   : > { %6584 = vst [vmem:[%s6580_s29 + $0x18] sm:$0xff] %v6576_v34  ;;  %6588 = vst [vmem:[#allocation2 + $0x8] sm:$0xff] %v6576_v34 }
0x2265 PF: > { %s12235_s13 = sld [smem:[#allocation46_spill]] }
0x226b   : > { %p8280_p1 = scmp.ne.s32.totalorder %s12235_s13, 4 }
0x226d   : > { %6592 = sbr.rel (%p8280_p1) target bundleno = 9123 (0x23a3), region = 196 }
0x2272   : > { %v9445_v55 = vld [vmem:[#allocation14 + $0x74] ss:$8 sps:$4 sm:$0xff]   ;;  %v9447_v57 = vld [vmem:[#allocation14 + $0x70] ss:$8 sps:$4 sm:$0xff]   ;;  %v10218_v37 = vmov 0   ;;  %v6593_v26 = vld [vmem:[#allocation2 + $0x10] sm:$0xff]  ;;  %v6633_v3 = vlaneseq }
0x2273   : > { %9444 = vset.pattern.permute.xlu0 %v10218_v37  ;;  %6803 = vmatprep.subr.bf16.mxu0 %v9445_v55  ;;  %v9448_v36 = vld [vmem:[#allocation14 + $0x64] ss:$8 sps:$4 sm:$0xff]   ;;  %v9450_v56 = vld [vmem:[#allocation14 + $0x60] ss:$8 sps:$4 sm:$0xff]   ;;  %v9451_v39 = vld [vmem:[#allocation14 + $0x54] ss:$8 sps:$4 sm:$0xff]  }
0x2274   : > { %6849 = vperm.xlu0 %9444, %v11022_v0   ;;  %6804 = vmatpush1.bf16.msra.mxu0 %v9447_v57  ;;  %v9453_v40 = vld [vmem:[#allocation14 + $0x50] ss:$8 sps:$4 sm:$0xff]   ;;  %v9454_v41 = vld [vmem:[#allocation14 + $0x44] ss:$8 sps:$4 sm:$0xff]   ;;  %v9456_v48 = vld [vmem:[#allocation14 + $0x40] ss:$8 sps:$4 sm:$0xff]  }
0x2275   : > { %6805 = vmatprep.subr.bf16.mxu0 %v9448_v36  ;;  %v9457_v21 = vld [vmem:[#allocation14 + $0x34] ss:$8 sps:$4 sm:$0xff]   ;;  %v9459_v51 = vld [vmem:[#allocation14 + $0x30] ss:$8 sps:$4 sm:$0xff]   ;;  %v9460_v52 = vld [vmem:[#allocation14 + $0x24] ss:$8 sps:$4 sm:$0xff]  }
0x2276   : > { %v9462_v53 = vld [vmem:[#allocation14 + $0x20] ss:$8 sps:$4 sm:$0xff]   ;;  %v9463_v9 = vld [vmem:[#allocation14 + $0x14] ss:$8 sps:$4 sm:$0xff]   ;;  %v9465_v44 = vld [vmem:[#allocation14 + $0x10] ss:$8 sps:$4 sm:$0xff]  }
0x2277   : > { %v11934_v35 = vld [vmem:[#allocation2] sm:$0xff]  ;;  %v11936_v42 = vld [vmem:[#allocation2 + $0x8] sm:$0xff]  ;;  %v9466_v38 = vld [vmem:[#allocation14 + $0x4] ss:$8 sps:$4 sm:$0xff]   ;;  %v6634_v4 = vshrl.u32 %v6633_v3, 7 }
0x2278   : > { %6854 = vperm.xlu0 %9444, %v11027_v1   ;;  %6806 = vmatpush1.bf16.msra.mxu0 %v9450_v56  ;;  %v6598_v54 = vpack.c.bf16 %v11936_v42, %v11934_v35  ;;  %v9468_v15 = vld [vmem:[#allocation14] ss:$8 sps:$4 sm:$0xff]   ;;  %v9469_v59 = vld [vmem:[#allocation14 + $0xf4] ss:$8 sps:$4 sm:$0xff]   ;;  %v9471_v60 = vld [vmem:[#allocation14 + $0xf0] ss:$8 sps:$4 sm:$0xff]  }
0x2279   : > { %6807 = vmatprep.subr.bf16.mxu0 %v9451_v39  ;;  %v9472_v33 = vld [vmem:[#allocation14 + $0xe4] ss:$8 sps:$4 sm:$0xff]   ;;  %v9474_v19 = vld [vmem:[#allocation14 + $0xe0] ss:$8 sps:$4 sm:$0xff]   ;;  %v9475_v20 = vld [vmem:[#allocation14 + $0xd4] ss:$8 sps:$4 sm:$0xff]  }
0x227a   : > { %6835 = vmatprep.mubr.bf16.mxu0 %v6598_v54  ;;  %v9477_v50 = vld [vmem:[#allocation14 + $0xd0] ss:$8 sps:$4 sm:$0xff]   ;;  %v9478_v28 = vld [vmem:[#allocation14 + $0xc4] ss:$8 sps:$4 sm:$0xff]   ;;  %v9480_v24 = vld [vmem:[#allocation14 + $0xc0] ss:$8 sps:$4 sm:$0xff]  }
0x227b   : > { %v9481_v25 = vld [vmem:[#allocation14 + $0xb4] ss:$8 sps:$4 sm:$0xff]   ;;  %v9483_v45 = vld [vmem:[#allocation14 + $0xb0] ss:$8 sps:$4 sm:$0xff]   ;;  %v9484_v29 = vld [vmem:[#allocation14 + $0xa4] ss:$8 sps:$4 sm:$0xff]  }
0x227c   : > { %6808 = vmatpush1.bf16.msra.mxu0 %v9453_v40  ;;  %v9486_v46 = vld [vmem:[#allocation14 + $0xa0] ss:$8 sps:$4 sm:$0xff]   ;;  %v9487_v8 = vld [vmem:[#allocation14 + $0x94] ss:$8 sps:$4 sm:$0xff]   ;;  %v9489_v6 = vld [vmem:[#allocation14 + $0x90] ss:$8 sps:$4 sm:$0xff]  }
0x227d   : > { %6809 = vmatprep.subr.bf16.mxu0 %v9454_v41  ;;  %v9490_v18 = vld [vmem:[#allocation14 + $0x84] ss:$8 sps:$4 sm:$0xff]   ;;  %v9492_v10 = vld [vmem:[#allocation14 + $0x80] ss:$8 sps:$4 sm:$0xff]   ;;  %v6635_v11 = vsub.s32 0, %v6634_v4  ;;  %v6639_v2 = vsub.s32 1, %v6634_v4 }
0x227e   : > { %v11940_v27 = vld [vmem:[#allocation2 + $0x18] sm:$0xff]  ;;  %v6846_v63 = vld [vmem:[#allocation17] sm:$0x3]  ;;  %v6631_v5 = vld [vmem:[#allocation15] sm:$0x3] }
0x227f   : > { %v6597_v58 = vpack.c.bf16 %v11940_v27, %v6593_v26  ;;  %v6861_v12 = vrot.slane %v6846_v63, %v6635_v11  ;;  %v6865_v30 = vrot.slane %v6846_v63, %v6639_v2  ;;  %v6636_v13 = vrot.slane %v6631_v5, %v6635_v11 }
0x2280   : > { %6810 = vmatpush1.bf16.msra.mxu0 %v9456_v48  ;;  %v6640_v31 = vrot.slane %v6631_v5, %v6639_v2 }
0x2281   : > { %6811 = vmatprep.subr.bf16.mxu0 %v9457_v21 }
0x2284   : > { %6812 = vmatpush1.bf16.msra.mxu0 %v9459_v51 }
0x2285   : > { %6813 = vmatprep.subr.bf16.mxu0 %v9460_v52 }
0x2288   : > { %6814 = vmatpush1.bf16.msra.mxu0 %v9462_v53 }
0x2289   : > { %6815 = vmatprep.subr.bf16.mxu0 %v9463_v9 }
0x228c   : > { %6816 = vmatpush1.bf16.msra.mxu0 %v9465_v44 }
0x228d   : > { %6817 = vmatprep.subr.bf16.mxu0 %v9466_v38 }
0x2290   : > { %6818 = vmatpush1.bf16.msra.mxu0 %v9468_v15 }
0x2291   : > { %6819 = vmatprep.subr.bf16.mxu0 %v9469_v59 }
0x2294   : > { %6820 = vmatpush2.bf16.msra.mxu0 %v9471_v60 }
0x2295   : > { %6821 = vmatprep.subr.bf16.mxu0 %v9472_v33 }
0x2298   : > { %6822 = vmatpush2.bf16.msra.mxu0 %v9474_v19 }
0x2299   : > { %6823 = vmatprep.subr.bf16.mxu0 %v9475_v20 }
0x229c   : > { %6824 = vmatpush2.bf16.msra.mxu0 %v9477_v50 }
0x229d   : > { %6825 = vmatprep.subr.bf16.mxu0 %v9478_v28 }
0x22a0   : > { %6826 = vmatpush2.bf16.msra.mxu0 %v9480_v24 }
0x22a1   : > { %6827 = vmatprep.subr.bf16.mxu0 %v9481_v25 }
0x22a4   : > { %6828 = vmatpush2.bf16.msra.mxu0 %v9483_v45 }
0x22a5   : > { %6829 = vmatprep.subr.bf16.mxu0 %v9484_v29 }
0x22a8   : > { %6830 = vmatpush2.bf16.msra.mxu0 %v9486_v46 }
0x22a9   : > { %6831 = vmatprep.subr.bf16.mxu0 %v9487_v8 }
0x22ac   : > { %6832 = vmatpush2.bf16.msra.mxu0 %v9489_v6 }
0x22ad   : > { %6833 = vmatprep.subr.bf16.mxu0 %v9490_v18 }
0x22b0   : > { %6834 = vmatpush2.bf16.msra.mxu0 %v9492_v10 }
0x22b3   : > { %6836 = vmatmul.mubr.bf16.vlgmr.msra.gmra.mxu0 %v6597_v58 }
0x22ef   : > { %v6850_v49 = vpop.permute.xlu0 %6849 }
0x22f0   : > { %v6868_v61 = vmul.f32 %v6861_v12, %v6850_v49  ;;  %v6869_v23 = vmul.f32 %v6865_v30, %v6850_v49 }
0x22f3   : > { %v6855_v47 = vpop.permute.xlu0 %6854 }
0x22f4   : > { %v6870_v22 = vmul.f32 %v6861_v12, %v6855_v47  ;;  %v6871_v57 = vmul.f32 %v6865_v30, %v6855_v47 }
0x2373   : > { %v6837_v32 = vpop.f32.mrf.mxu0 }
0x2374   : > { %v6838_v62 = vadd.f32 %v6837_v32, %v6636_v13 }
0x2375   : > { %v6839_v7 = vpop.f32.mrf.mxu0 }
0x2376   : > { %v6872_v14 = vadd.f32 %v6868_v61, %v6838_v62  ;;  %v6840_v16 = vadd.f32 %v6839_v7, %v6640_v31 }
0x2377   : > { %v6841_v17 = vpop.f32.mrf.mxu0 }
0x2378   : > { %v8313_v43 = vmul.f32 -1.442695, %v6872_v14  ;;  %v6873_v34 = vadd.f32 %v6869_v23, %v6840_v16  ;;  %v6842_v55 = vadd.f32 %v6841_v17, %v6636_v13 }
0x2379   : > { %v6843_v37 = vpop.f32.mrf.mxu0 }
0x237a   : > { %9493 = vpow2.f32 %v8313_v43  ;;  %v8314_v36 = vmul.f32 -1.442695, %v6873_v34  ;;  %v6874_v56 = vadd.f32 %v6870_v22, %v6842_v55  ;;  %v6844_v39 = vadd.f32 %v6843_v37, %v6640_v31 }
0x237c   : > { %9495 = vpow2.f32 %v8314_v36  ;;  %v8315_v40 = vmul.f32 -1.442695, %v6874_v56  ;;  %v6875_v41 = vadd.f32 %v6871_v57, %v6844_v39 }
0x237e   : > { %9497 = vpow2.f32 %v8315_v40  ;;  %v8316_v48 = vmul.f32 -1.442695, %v6875_v41 }
0x2380   : > { %9499 = vpow2.f32 %v8316_v48 }
0x2387   : > { %v9494_v21 = vpop.eup %9493 }
0x2388   : > { %v6888_v51 = vadd.f32 1.0, %v9494_v21 }
0x2389   : > { %v9496_v52 = vpop.eup %9495 }
0x238a   : > { %9501 = vrcp.f32 %v6888_v51  ;;  %v6889_v53 = vadd.f32 1.0, %v9496_v52 }
0x238b   : > { %v9498_v9 = vpop.eup %9497 }
0x238c   : > { %9503 = vrcp.f32 %v6889_v53  ;;  %v6890_v54 = vadd.f32 1.0, %v9498_v9 }
0x238d   : > { %v9500_v44 = vpop.eup %9499 }
0x238e   : > { %9505 = vrcp.f32 %v6890_v54  ;;  %v6891_v38 = vadd.f32 1.0, %v9500_v44 }
0x2390   : > { %9507 = vrcp.f32 %v6891_v38 }
0x2397   : > { %v9502_v15 = vpop.eup %9501 }
0x2398   : > { %v6900_v59 = vmul.f32 %v9502_v15, %v6872_v14 }
0x2399   : > { %v9504_v60 = vpop.eup %9503 }
0x239a   : > { %v6904_v33 = vadd.f32 %v6900_v59, %v6593_v26  ;;  %v6901_v19 = vmul.f32 %v9504_v60, %v6873_v34 }
0x239b   : > { %v9506_v20 = vpop.eup %9505 }
0x239c   : > { %6908 = vst [vmem:[#allocation2 + $0x10] sm:$0xff] %v6904_v33  ;;  %v6905_v50 = vadd.f32 %v6901_v19, %v11934_v35  ;;  %v6902_v28 = vmul.f32 %v9506_v20, %v6874_v56 }
0x239d   : > { %v9508_v24 = vpop.eup %9507 }
0x239e   : > { %6909 = vst [vmem:[#allocation2] sm:$0xff] %v6905_v50  ;;  %v6906_v25 = vadd.f32 %v6902_v28, %v11940_v27  ;;  %v6903_v45 = vmul.f32 %v9508_v24, %v6875_v41 }
0x23a0   : > { %6910 = vst [vmem:[#allocation2 + $0x18] sm:$0xff] %v6906_v25  ;;  %v6907_v29 = vadd.f32 %v6903_v45, %v11936_v42 }
0x23a2   : > { %6911 = vst [vmem:[#allocation2 + $0x8] sm:$0xff] %v6907_v29 }
0x23a3 PF: > { %s12236_s25 = sld [smem:[#allocation46_spill]] }
0x23a9   : > { %p8317_p7 = scmp.le.s32.totalorder %s12236_s25, 4 }
0x23aa   : > { %s12237_s4 = sld [smem:[#allocation46_spill]] (!%p8317_p7)  ;;  %s12239_s3 = scalar_lea.vmem (!%p8317_p7), [#allocation11], %s10958_s2 }
0x23ab   : > { %6915 = sbr.rel (%p8317_p7) target bundleno = 9444 (0x24e4), region = 200 }
0x23b0   : > { %v9510_v35 = vld [vmem:[%s10952_s5 + $0x74] ss:$8 sps:$4 sm:$0xff]   ;;  %v10219_v8 = vmov 0   ;;  %v9514_v42 = vld [vmem:[%s10952_s5 + $0x70] ss:$8 sps:$4 sm:$0xff]   ;;  %s6920_s22 = ssub.s32 8, %s12237_s4 }
0x23b1   : > { %v9512_v46 = vld [vmem:[%s10952_s5 + $0x174] ss:$8 sps:$4 sm:$0xff]   ;;  %9509 = vset.pattern.permute.xlu0 %v10219_v8  ;;  %7328 = vmatprep.subr.bf16.mxu0 %v9510_v35  ;;  %v9515_v6 = vld [vmem:[%s10952_s5 + $0x170] ss:$8 sps:$4 sm:$0xff]   ;;  %v9516_v18 = vld [vmem:[%s10952_s5 + $0x64] ss:$8 sps:$4 sm:$0xff]  }
0x23b2   : > { %7417 = vperm.xlu0 %9509, %v11022_v0   ;;  %7371 = vmatprep.subr.bf16.mxu1 %v9512_v46  ;;  %v9518_v10 = vld [vmem:[%s10952_s5 + $0x164] ss:$8 sps:$4 sm:$0xff]   ;;  %v9520_v26 = vld [vmem:[%s10952_s5 + $0x60] ss:$8 sps:$4 sm:$0xff]   ;;  %v9522_v58 = vld [vmem:[%s10952_s5 + $0x54] ss:$8 sps:$4 sm:$0xff]  }
0x23b3   : > { %7329 = vmatpush1.bf16.msra.mxu0 %v9514_v42  ;;  %7372 = vmatpush1.bf16.msra.mxu1 %v9515_v6  ;;  %v9521_v27 = vld [vmem:[%s10952_s5 + $0x160] ss:$8 sps:$4 sm:$0xff]   ;;  %v9524_v3 = vld [vmem:[%s10952_s5 + $0x154] ss:$8 sps:$4 sm:$0xff]   ;;  %v9526_v0 = vld [vmem:[%s10952_s5 + $0x50] ss:$8 sps:$4 sm:$0xff]  }
0x23b4   : > { %7330 = vmatprep.subr.bf16.mxu0 %v9516_v18  ;;  %7373 = vmatprep.subr.bf16.mxu1 %v9518_v10  ;;  %v9527_v4 = vld [vmem:[%s10952_s5 + $0x150] ss:$8 sps:$4 sm:$0xff]   ;;  %v9528_v11 = vld [vmem:[%s10952_s5 + $0x44] ss:$8 sps:$4 sm:$0xff]   ;;  %v9532_v2 = vld [vmem:[%s10952_s5 + $0x40] ss:$8 sps:$4 sm:$0xff]  }
0x23b5   : > { %v9530_v63 = vld [vmem:[%s10952_s5 + $0x144] ss:$8 sps:$4 sm:$0xff]   ;;  %v9533_v5 = vld [vmem:[%s10952_s5 + $0x140] ss:$8 sps:$4 sm:$0xff]   ;;  %v9536_v12 = vld [vmem:[%s10952_s5 + $0x134] ss:$8 sps:$4 sm:$0xff]  }
0x23b6   : > { %7422 = vperm.xlu0 %9509, %v11027_v1   ;;  %v9534_v1 = vld [vmem:[%s10952_s5 + $0x34] ss:$8 sps:$4 sm:$0xff]   ;;  %v9538_v49 = vld [vmem:[%s10952_s5 + $0x30] ss:$8 sps:$4 sm:$0xff]   ;;  %v9540_v13 = vld [vmem:[%s10952_s5 + $0x24] ss:$8 sps:$4 sm:$0xff]  }
0x23b7   : > { %7331 = vmatpush1.bf16.msra.mxu0 %v9520_v26  ;;  %7374 = vmatpush1.bf16.msra.mxu1 %v9521_v27  ;;  %v9539_v30 = vld [vmem:[%s10952_s5 + $0x130] ss:$8 sps:$4 sm:$0xff]   ;;  %v9542_v61 = vld [vmem:[%s10952_s5 + $0x124] ss:$8 sps:$4 sm:$0xff]   ;;  %v9544_v31 = vld [vmem:[%s10952_s5 + $0x20] ss:$8 sps:$4 sm:$0xff]  }
0x23b8   : > { %7332 = vmatprep.subr.bf16.mxu0 %v9522_v58  ;;  %7375 = vmatprep.subr.bf16.mxu1 %v9524_v3  ;;  %v9545_v32 = vld [vmem:[%s10952_s5 + $0x120] ss:$8 sps:$4 sm:$0xff]   ;;  %v9546_v23 = vld [vmem:[%s10952_s5 + $0x14] ss:$8 sps:$4 sm:$0xff]   ;;  %v9550_v47 = vld [vmem:[%s10952_s5 + $0x10] ss:$8 sps:$4 sm:$0xff]  }
0x23b9   : > { %v9548_v62 = vld [vmem:[%s10952_s5 + $0x114] ss:$8 sps:$4 sm:$0xff]   ;;  %v9551_v7 = vld [vmem:[%s10952_s5 + $0x110] ss:$8 sps:$4 sm:$0xff]   ;;  %v9552_v14 = vld [vmem:[%s10952_s5 + $0x4] ss:$8 sps:$4 sm:$0xff]  }
0x23ba   : > { %v9554_v16 = vld [vmem:[%s10952_s5 + $0x104] ss:$8 sps:$4 sm:$0xff]   ;;  %v9556_v17 = vld [vmem:[%s10952_s5] ss:$8 sps:$4 sm:$0xff]   ;;  %v9558_v22 = vld [vmem:[%s10952_s5 + $0xf4] ss:$8 sps:$4 sm:$0xff]  }
0x23bb   : > { %7333 = vmatpush1.bf16.msra.mxu0 %v9526_v0  ;;  %7376 = vmatpush1.bf16.msra.mxu1 %v9527_v4  ;;  %v9557_v43 = vld [vmem:[%s10952_s5 + $0x100] ss:$8 sps:$4 sm:$0xff]   ;;  %v9560_v34 = vld [vmem:[%s10952_s5 + $0x1f4] ss:$8 sps:$4 sm:$0xff]   ;;  %v9562_v55 = vld [vmem:[%s10952_s5 + $0xf0] ss:$8 sps:$4 sm:$0xff]  }
0x23bc   : > { %7334 = vmatprep.subr.bf16.mxu0 %v9528_v11  ;;  %7377 = vmatprep.subr.bf16.mxu1 %v9530_v63  ;;  %v9563_v57 = vld [vmem:[%s10952_s5 + $0x1f0] ss:$8 sps:$4 sm:$0xff]   ;;  %v9564_v37 = vld [vmem:[%s10952_s5 + $0xe4] ss:$8 sps:$4 sm:$0xff]   ;;  %v9568_v56 = vld [vmem:[%s10952_s5 + $0xe0] ss:$8 sps:$4 sm:$0xff]   ;;  %v6998_v11 = vlaneseq }
0x23bd   : > { %v9566_v36 = vld [vmem:[%s10952_s5 + $0x1e4] ss:$8 sps:$4 sm:$0xff]   ;;  %v9569_v39 = vld [vmem:[%s10952_s5 + $0x1e0] ss:$8 sps:$4 sm:$0xff]   ;;  %v9570_v40 = vld [vmem:[%s10952_s5 + $0xd4] ss:$8 sps:$4 sm:$0xff]  }
0x23be   : > { %v9572_v41 = vld [vmem:[%s10952_s5 + $0x1d4] ss:$8 sps:$4 sm:$0xff]   ;;  %s8406_s23 = sshll.u32 %s6920_s22, 5  ;;  %v9574_v48 = vld [vmem:[%s10952_s5 + $0xd0] ss:$8 sps:$4 sm:$0xff]   ;;  %v11998_v9 = vld [vmem:[#allocation2 + $0x8] sm:$0xff] }
0x23bf   : > { %7335 = vmatpush1.bf16.msra.mxu0 %v9532_v2  ;;  %7378 = vmatpush1.bf16.msra.mxu1 %v9533_v5  ;;  %v9575_v21 = vld [vmem:[%s10952_s5 + $0x1d0] ss:$8 sps:$4 sm:$0xff]   ;;  %v9576_v51 = vld [vmem:[%s10952_s5 + $0xc4] ss:$8 sps:$4 sm:$0xff]   ;;  %s12000_s12 = scalar_lea.vmem [#allocation3], %s8406_s23  ;;  %v6999_v63 = vshrl.u32 %v6998_v11, 7 }
0x23c0   : > { %7336 = vmatprep.subr.bf16.mxu0 %v9534_v1  ;;  %7379 = vmatprep.subr.bf16.mxu1 %v9536_v12  ;;  %v9578_v52 = vld [vmem:[%s10952_s5 + $0x1c4] ss:$8 sps:$4 sm:$0xff]   ;;  %v11996_v53 = vld [vmem:[#allocation2] sm:$0xff]  ;;  %v6927_v44 = vld [vmem:[%s12000_s12 + $0x18] sm:$0xff] }
0x23c1   : > { %v6925_v54 = vld [vmem:[%s12000_s12 + $0x8] sm:$0xff]  ;;  %v6929_v59 = vpack.c.bf16 %v11998_v9, %v11996_v53  ;;  %v9582_v33 = vld [vmem:[%s10952_s5 + $0xb4] ss:$8 sps:$4 sm:$0xff]   ;;  %v9586_v20 = vld [vmem:[%s10952_s5 + $0xb0] ss:$8 sps:$4 sm:$0xff]   ;;  %v7000_v2 = vsub.s32 0, %v6999_v63 }
0x23c2   : > { %v9580_v38 = vld [vmem:[%s10952_s5 + $0xc0] ss:$8 sps:$4 sm:$0xff]   ;;  %v6931_v60 = vpack.c.bf16 %v6927_v44, %v6925_v54  ;;  %v9584_v19 = vld [vmem:[%s10952_s5 + $0x1b4] ss:$8 sps:$4 sm:$0xff]   ;;  %v9587_v50 = vld [vmem:[%s10952_s5 + $0x1b0] ss:$8 sps:$4 sm:$0xff]  }
0x23c3   : > { %7337 = vmatpush1.bf16.msra.mxu0 %v9538_v49  ;;  %7380 = vmatpush1.bf16.msra.mxu1 %v9539_v30  ;;  %v9581_v15 = vld [vmem:[%s10952_s5 + $0x1c0] ss:$8 sps:$4 sm:$0xff]   ;;  %v9588_v28 = vld [vmem:[%s10952_s5 + $0xa4] ss:$8 sps:$4 sm:$0xff]   ;;  %v9594_v29 = vld [vmem:[%s10952_s5 + $0x94] ss:$8 sps:$4 sm:$0xff]  }
0x23c4   : > { %7338 = vmatprep.subr.bf16.mxu0 %v9540_v13  ;;  %7381 = vmatprep.subr.bf16.mxu1 %v9542_v61  ;;  %v9590_v24 = vld [vmem:[%s10952_s5 + $0x1a4] ss:$8 sps:$4 sm:$0xff]   ;;  %v9592_v25 = vld [vmem:[%s10952_s5 + $0xa0] ss:$8 sps:$4 sm:$0xff]   ;;  %v9596_v35 = vld [vmem:[%s10952_s5 + $0x194] ss:$8 sps:$4 sm:$0xff]  }
0x23c5   : > { %7360 = vmatprep.mubr.bf16.mxu0 %v6929_v59  ;;  %7403 = vmatprep.mubr.bf16.mxu1 %v6931_v60  ;;  %v9593_v45 = vld [vmem:[%s10952_s5 + $0x1a0] ss:$8 sps:$4 sm:$0xff]   ;;  %v9598_v46 = vld [vmem:[%s10952_s5 + $0x90] ss:$8 sps:$4 sm:$0xff]   ;;  %v9600_v42 = vld [vmem:[%s10952_s5 + $0x84] ss:$8 sps:$4 sm:$0xff]  }
0x23c6   : > { %v9599_v8 = vld [vmem:[%s10952_s5 + $0x190] ss:$8 sps:$4 sm:$0xff]   ;;  %v9602_v6 = vld [vmem:[%s10952_s5 + $0x184] ss:$8 sps:$4 sm:$0xff]   ;;  %v9604_v18 = vld [vmem:[%s10952_s5 + $0x80] ss:$8 sps:$4 sm:$0xff]  }
0x23c7   : > { %7339 = vmatpush1.bf16.msra.mxu0 %v9544_v31  ;;  %7382 = vmatpush1.bf16.msra.mxu1 %v9545_v32  ;;  %v9605_v10 = vld [vmem:[%s10952_s5 + $0x180] ss:$8 sps:$4 sm:$0xff]   ;;  %v12026_v27 = vld [vmem:[#allocation2 + $0x18] sm:$0xff]  ;;  %v6924_v58 = vld [vmem:[%s12000_s12] sm:$0xff]  ;;  %s12238_s5 = scalar_lea.vmem [#allocation12], %s10958_s2  ;;  %v7004_v12 = vsub.s32 1, %v6999_v63 }
0x23c8   : > { %7340 = vmatprep.subr.bf16.mxu0 %v9546_v23  ;;  %7383 = vmatprep.subr.bf16.mxu1 %v9548_v62  ;;  %v12024_v26 = vld [vmem:[#allocation2 + $0x10] sm:$0xff]  ;;  %v7414_v5 = vld [vmem:[%s12238_s5] sm:$0x3]  ;;  %v6996_v1 = vld [vmem:[%s12239_s3] sm:$0x3] }
0x23c9   : > { %v6926_v3 = vld [vmem:[%s12000_s12 + $0x10] sm:$0xff]  ;;  %v6928_v0 = vpack.c.bf16 %v12026_v27, %v12024_v26  ;;  %v7429_v30 = vrot.slane %v7414_v5, %v7000_v2  ;;  %v7001_v13 = vrot.slane %v6996_v1, %v7000_v2  ;;  %v7433_v61 = vrot.slane %v7414_v5, %v7004_v12 }
0x23ca   : > { %v6930_v4 = vpack.c.bf16 %v6926_v3, %v6924_v58  ;;  %v7005_v31 = vrot.slane %v6996_v1, %v7004_v12 }
0x23cb   : > { %7341 = vmatpush1.bf16.msra.mxu0 %v9550_v47  ;;  %7384 = vmatpush1.bf16.msra.mxu1 %v9551_v7 }
0x23cc   : > { %7342 = vmatprep.subr.bf16.mxu0 %v9552_v14  ;;  %7385 = vmatprep.subr.bf16.mxu1 %v9554_v16 }
0x23cf   : > { %7343 = vmatpush1.bf16.msra.mxu0 %v9556_v17  ;;  %7386 = vmatpush1.bf16.msra.mxu1 %v9557_v43 }
0x23d0   : > { %7344 = vmatprep.subr.bf16.mxu0 %v9558_v22  ;;  %7387 = vmatprep.subr.bf16.mxu1 %v9560_v34 }
0x23d3   : > { %7345 = vmatpush2.bf16.msra.mxu0 %v9562_v55  ;;  %7388 = vmatpush2.bf16.msra.mxu1 %v9563_v57 }
0x23d4   : > { %7346 = vmatprep.subr.bf16.mxu0 %v9564_v37  ;;  %7389 = vmatprep.subr.bf16.mxu1 %v9566_v36 }
0x23d7   : > { %7347 = vmatpush2.bf16.msra.mxu0 %v9568_v56  ;;  %7390 = vmatpush2.bf16.msra.mxu1 %v9569_v39 }
0x23d8   : > { %7348 = vmatprep.subr.bf16.mxu0 %v9570_v40  ;;  %7391 = vmatprep.subr.bf16.mxu1 %v9572_v41 }
0x23db   : > { %7349 = vmatpush2.bf16.msra.mxu0 %v9574_v48  ;;  %7392 = vmatpush2.bf16.msra.mxu1 %v9575_v21 }
0x23dc   : > { %7350 = vmatprep.subr.bf16.mxu0 %v9576_v51  ;;  %7393 = vmatprep.subr.bf16.mxu1 %v9578_v52 }
0x23df   : > { %7351 = vmatpush2.bf16.msra.mxu0 %v9580_v38  ;;  %7394 = vmatpush2.bf16.msra.mxu1 %v9581_v15 }
0x23e0   : > { %7352 = vmatprep.subr.bf16.mxu0 %v9582_v33  ;;  %7395 = vmatprep.subr.bf16.mxu1 %v9584_v19 }
0x23e3   : > { %7353 = vmatpush2.bf16.msra.mxu0 %v9586_v20  ;;  %7396 = vmatpush2.bf16.msra.mxu1 %v9587_v50 }
0x23e4   : > { %7354 = vmatprep.subr.bf16.mxu0 %v9588_v28  ;;  %7397 = vmatprep.subr.bf16.mxu1 %v9590_v24 }
0x23e7   : > { %7355 = vmatpush2.bf16.msra.mxu0 %v9592_v25  ;;  %7398 = vmatpush2.bf16.msra.mxu1 %v9593_v45 }
0x23e8   : > { %7356 = vmatprep.subr.bf16.mxu0 %v9594_v29  ;;  %7399 = vmatprep.subr.bf16.mxu1 %v9596_v35 }
0x23eb   : > { %7357 = vmatpush2.bf16.msra.mxu0 %v9598_v46  ;;  %7400 = vmatpush2.bf16.msra.mxu1 %v9599_v8 }
0x23ec   : > { %7358 = vmatprep.subr.bf16.mxu0 %v9600_v42  ;;  %7401 = vmatprep.subr.bf16.mxu1 %v9602_v6 }
0x23ef   : > { %7359 = vmatpush2.bf16.msra.mxu0 %v9604_v18  ;;  %7402 = vmatpush2.bf16.msra.mxu1 %v9605_v10 }
0x23f2   : > { %7361 = vmatmul.mubr.bf16.vlgmr.msra.gmra.mxu0 %v6928_v0  ;;  %7404 = vmatmul.mubr.bf16.vlgmr.msra.gmra.mxu1 %v6930_v4 }
0x242d   : > { %v7418_v49 = vpop.permute.xlu0 %7417 }
0x242e   : > { %v7436_v62 = vmul.f32 %v7429_v30, %v7418_v49  ;;  %v7437_v16 = vmul.f32 %v7433_v61, %v7418_v49 }
0x2431   : > { %v7423_v22 = vpop.permute.xlu0 %7422 }
0x2432   : > { %v7438_v56 = vmul.f32 %v7429_v30, %v7423_v22  ;;  %v7439_v51 = vmul.f32 %v7433_v61, %v7423_v22 }
0x24b2   : > { %v7362_v32 = vpop.f32.mrf.mxu0  ;;  %v7405_v23 = vpop.f32.mrf.mxu1 }
0x24b3   : > { %v7363_v47 = vadd.f32 %v7362_v32, %v7001_v13 }
0x24b4   : > { %v7364_v7 = vpop.f32.mrf.mxu0  ;;  %v7407_v14 = vpop.f32.mrf.mxu1 }
0x24b5   : > { %v7406_v17 = vadd.f32 %v7405_v23, %v7363_v47  ;;  %v7365_v43 = vadd.f32 %v7364_v7, %v7005_v31 }
0x24b6   : > { %v7366_v34 = vpop.f32.mrf.mxu0  ;;  %v7409_v55 = vpop.f32.mrf.mxu1 }
0x24b7   : > { %v7440_v57 = vadd.f32 %v7436_v62, %v7406_v17  ;;  %v7408_v37 = vadd.f32 %v7407_v14, %v7365_v43  ;;  %v7367_v36 = vadd.f32 %v7366_v34, %v7001_v13 }
0x24b8   : > { %v7368_v39 = vpop.f32.mrf.mxu0  ;;  %v7411_v52 = vpop.f32.mrf.mxu1 }
0x24b9   : > { %v8384_v40 = vmul.f32 -1.442695, %v7440_v57  ;;  %v7441_v41 = vadd.f32 %v7437_v16, %v7408_v37  ;;  %v7410_v48 = vadd.f32 %v7409_v55, %v7367_v36  ;;  %v7369_v21 = vadd.f32 %v7368_v39, %v7005_v31 }
0x24bb   : > { %9606 = vpow2.f32 %v8384_v40  ;;  %v8385_v54 = vmul.f32 -1.442695, %v7441_v41  ;;  %v7442_v44 = vadd.f32 %v7438_v56, %v7410_v48  ;;  %v7412_v38 = vadd.f32 %v7411_v52, %v7369_v21 }
0x24bd   : > { %9608 = vpow2.f32 %v8385_v54  ;;  %v8386_v15 = vmul.f32 -1.442695, %v7442_v44  ;;  %v7443_v59 = vadd.f32 %v7439_v51, %v7412_v38 }
0x24bf   : > { %9610 = vpow2.f32 %v8386_v15  ;;  %v8387_v60 = vmul.f32 -1.442695, %v7443_v59 }
0x24c1   : > { %9612 = vpow2.f32 %v8387_v60 }
0x24c8   : > { %v9607_v33 = vpop.eup %9606 }
0x24c9   : > { %v7456_v19 = vadd.f32 1.0, %v9607_v33 }
0x24ca   : > { %v9609_v20 = vpop.eup %9608 }
0x24cb   : > { %9614 = vrcp.f32 %v7456_v19  ;;  %v7457_v50 = vadd.f32 1.0, %v9609_v20 }
0x24cc   : > { %v9611_v28 = vpop.eup %9610 }
0x24cd   : > { %9616 = vrcp.f32 %v7457_v50  ;;  %v7458_v24 = vadd.f32 1.0, %v9611_v28 }
0x24ce   : > { %v9613_v25 = vpop.eup %9612 }
0x24cf   : > { %9618 = vrcp.f32 %v7458_v24  ;;  %v7459_v45 = vadd.f32 1.0, %v9613_v25 }
0x24d1   : > { %9620 = vrcp.f32 %v7459_v45 }
0x24d8   : > { %v9615_v29 = vpop.eup %9614 }
0x24d9   : > { %v7468_v35 = vmul.f32 %v9615_v29, %v7440_v57 }
0x24da   : > { %v9617_v46 = vpop.eup %9616 }
0x24db   : > { %v7472_v8 = vadd.f32 %v7468_v35, %v12024_v26  ;;  %v7469_v42 = vmul.f32 %v9617_v46, %v7441_v41 }
0x24dc   : > { %v9619_v6 = vpop.eup %9618 }
0x24dd   : > { %7476 = vst [vmem:[#allocation2 + $0x10] sm:$0xff] %v7472_v8  ;;  %v7473_v18 = vadd.f32 %v7469_v42, %v11996_v53  ;;  %v7470_v10 = vmul.f32 %v9619_v6, %v7442_v44 }
0x24de   : > { %v9621_v58 = vpop.eup %9620 }
0x24df   : > { %7477 = vst [vmem:[#allocation2] sm:$0xff] %v7473_v18  ;;  %v7474_v3 = vadd.f32 %v7470_v10, %v12026_v27  ;;  %v7471_v0 = vmul.f32 %v9621_v58, %v7443_v59 }
0x24e1   : > { %7478 = vst [vmem:[#allocation2 + $0x18] sm:$0xff] %v7474_v3  ;;  %v7475_v4 = vadd.f32 %v7471_v0, %v11998_v9 }
0x24e3   : > { %7479 = vst [vmem:[#allocation2 + $0x8] sm:$0xff] %v7475_v4 }
0x24e4 PF: > { %s12240_s2 = sld [smem:[#allocation46_spill]] }
0x24ea   : > { %p8388_p6 = scmp.ne.s32.totalorder %s12240_s2, 8 }
0x24eb   : > { %s12241_s1 = sld [smem:[#allocation73_spill]] (!%p8388_p6) }
0x24ec   : > { %7483 = sbr.rel (%p8388_p6) target bundleno = 9461 (0x24f5), region = 204 }
0x24f1   : > { %v7484_v26 = vld [vmem:[#allocation2 + $0x10] sm:$0xff]  ;;  %v7485_v11 = vld [vmem:[#allocation2] sm:$0xff]  ;;  %v7486_v63 = vld [vmem:[#allocation2 + $0x18] sm:$0xff]  ;;  %s12242_s7 = smov %s12241_s1 }
0x24f2   : > { %7488 = vst [vmem:[%s12241_s1] sm:$0xff] %v7484_v26  ;;  %v7487_v53 = vld [vmem:[#allocation2 + $0x8] sm:$0xff] }
0x24f3   : > { %7489 = vst [vmem:[%s12242_s7 + $0x8] sm:$0xff] %v7485_v11  ;;  %7490 = vst [vmem:[%s12242_s7 + $0x10] sm:$0xff] %v7486_v63 }
0x24f4   : > { %7491 = vst [vmem:[%s12242_s7 + $0x18] sm:$0xff] %v7487_v53 }
0x24f5 PF: > { %s12243_s26 = sld [smem:[#allocation47_spill]]  ;;  %s12249_s30 = smov %s10172_s24 }
0x24f6   : > { %s12244_s4 = sld [smem:[#allocation43_spill]] }
0x24f7   : > { %s12245_s25 = sld [smem:[#allocation51_spill]] }
0x24f8   : > { %s12246_s22 = sld [smem:[#allocation44_spill]] }
0x24f9   : > { %s12247_s5 = sld [smem:[#allocation45_spill]] }
0x24fa   : > { %s12248_s1 = sld [smem:[#allocation49_spill]] }
0x24fb   : > { %p58_p10 = scmp.ge.s32.totalorder %s12243_s26, 11  }
0x24fd   : > { %s12250_s24 = smov %s12245_s25  ;;  %60 = sbr.rel (!%p58_p10) target bundleno = 44 (0x2c), region = 352 }
0x24fe   : > { %s12251_s25 = smov %s12246_s22 }
0x2502   :  { %7503 = vsyncpa [#allocation5], 1 }
0x2503   :  { %7505 = vsyncpa [#allocation5 + $0x1], 1 }
0x2504   :  { %7506 = vsyncpa [#allocation7], 1 }
0x2505   :  { %7508 = vsyncpa [#allocation7 + $0x1], 1 }
0x2506   :  { %7509 = vsyncpa [#allocation10], 1 }
0x2507   :  { %7511 = vsyncpa [#allocation10 + $0x1], 1 }
0x2508   :  { %7512 = vsyncpa [#allocation13], 1 }
0x2509   :  { %7514 = vsyncpa [#allocation13 + $0x1], 1 }
0x250a   :  { %7515 = vsyncpa [#allocation16], 1 }
0x250b   :  { %7516 = vsyncpa [#allocation19], 1 }
0x250c   :  { %7518 = vsyncpa [#allocation19 + $0x1], 1 }
0x250d   :  { %7519 = vsyncpa [#allocation22], 1 }
0x250e   :  { %7521 = vsyncpa [#allocation22 + $0x1], 1 }
0x250f   :  { %7522 = vsyncpa [#allocation25], 1 }
0x2510   :  { %7524 = vsyncpa [#allocation25 + $0x1], 1 }
0x2511   :  { %7525 = vsyncpa [#allocation28], 1 }
0x2512   :  { %7527 = vsyncpa [#allocation28 + $0x1], 1 }
0x2513   :  { %7528 = vsyncpa [#allocation31], 1 }
0x2514   :  { %7530 = vsyncpa [#allocation31 + $0x1], 1 }

</bundles_post_ra>
